<compile_context>
chip_gen: v5e
topology: v5e:2x2
jax: 0.10.0
libtpu: 0.0.40
codegen_flags: <defaults>
</compile_context>

<pallas_src>
import jax
import jax.numpy as jnp
from jax.experimental import pallas as pl
from jax.experimental.pallas import tpu as pltpu

K = 5          # Conv1d kernel size (both conv layers, from the module)
CONV_CH = 128  # conv output channels (both layers)
NOUT = 128     # lane-dense padded width of the fused second-Linear output

f32 = jnp.float32
bf16 = jnp.bfloat16


# --------------------------------------------------------------------------- #
# One-time weight relayout (hoisted out of the per-forward path).             #
# --------------------------------------------------------------------------- #
def prepare_weights(params):
    """Relayout torch-convention params into kernel-friendly operands.

    Pure function of params: call it once when params are created/updated and
    pass the result to dqn_conv1d_forward (NOT rebuilt on every forward).
    """
    O1, C, _ = params['w1'].shape
    O2 = params['w2'].shape[0]
    hid = params['wv1'].shape[0]            # 512
    F = params['wv1'].shape[1]              # O2*L2 + 2
    L2 = (F - 2) // O2
    A = params['wa2'].shape[0]
    assert A + 1 <= NOUT

    # conv1 weight for the im2col matmul: row index = k*C + c_in
    w1 = jnp.transpose(params['w1'], (2, 1, 0)).reshape(K * C, O1).astype(bf16)
    # conv2 as K accumulated matmuls: w2s[k] is (c_in, c_out)
    w2s = jnp.transpose(params['w2'], (2, 1, 0)).astype(bf16)          # (K,128,128)
    b1 = params['b1'].reshape(1, O1).astype(f32)
    b2 = params['b2'].reshape(1, O2).astype(f32)

    # Fused first Linear of both heads.  The kernel flattens conv2 output
    # (L2, O2) row-major (feature index t*O2 + c); torch flatten is c*L2 + t.
    def head_conv_part(w):                                   # (hid, O2*L2 + 2)
        wc = w[:, :O2 * L2].reshape(hid, O2, L2)             # [h, c, t]
        return jnp.transpose(wc, (2, 1, 0)).reshape(L2 * O2, hid)  # row = t*O2+c

    w_fc1 = jnp.concatenate([head_conv_part(params['wv1']),
                             head_conv_part(params['wa1'])], axis=1).astype(bf16)
    w_ext = jnp.concatenate([params['wv1'][:, O2 * L2:].T,
                             params['wa1'][:, O2 * L2:].T], axis=1).astype(f32)
    b_fc1 = jnp.concatenate([params['bv1'], params['ba1']]
                            ).reshape(1, 2 * hid).astype(f32)

    # Fused second Linear: columns 0..A-1 = advantage, column A = value.
    # NOTE: columns A+1..NOUT-1 of w_fc2 AND b_fc2 must stay EXACTLY zero —
    # the in-kernel dueling mean relies on sum(o2) - val == sum(adv).
    w_fc2 = jnp.zeros((2 * hid, NOUT), f32)
    w_fc2 = w_fc2.at[:hid, A].set(params['wv2'][0])
    w_fc2 = w_fc2.at[hid:, :A].set(params['wa2'].T)
    w_fc2 = w_fc2.astype(bf16)
    b_fc2 = jnp.zeros((1, NOUT), f32)
    b_fc2 = b_fc2.at[0, :A].set(params['ba2'])
    b_fc2 = b_fc2.at[0, A].set(params['bv2'][0])

    return dict(w1=w1, b1=b1, w2s=w2s, b2=b2,
                w_fc1=w_fc1, w_ext=w_ext, b_fc1=b_fc1,
                w_fc2=w_fc2, b_fc2=b_fc2)


def _choose_tb(batch):
    """Largest 8-aligned batch tile (<=256) keeping >=2 grid steps if possible."""
    for tb in (256, 128, 64, 32, 16, 8):
        if batch >= 2 * tb:
            return tb
    return 8


# --------------------------------------------------------------------------- #
# Fused forward pass.                                                         #
# --------------------------------------------------------------------------- #
def dqn_conv1d_forward(weights, price_data, has_position, position, *, action_count):
    """price_data: (B, C, L) as in PyTorch; has_position / position: (B, 1)."""
    B, C, L = price_data.shape
    L1 = L - (K - 1)
    L2 = L1 - (K - 1)
    L1P = ((L1 + 7) // 8) * 8            # pad conv1 rows to a sublane multiple
    O1 = O2 = CONV_CH
    KC = K * C
    A = action_count
    assert A + 1 <= NOUT

    TB = _choose_tb(B)
    n_blocks = (B + TB - 1) // TB
    B_pad = n_blocks * TB

    # ---- per-call input prep (cheap, O(B*L*C)) ------------------------------
    # conv1 im2col: (B, C, L) -> (B_pad*L1P, K*C); feature index = k*C + c,
    # rows L1..L1P-1 of each example are zero padding (never read by valid
    # conv2 outputs since t+k <= L1-1).
    x_nlc = jnp.transpose(price_data, (0, 2, 1)).astype(f32)            # (B, L, C)
    x_col = jnp.concatenate([x_nlc[:, k:k + L1, :] for k in range(K)], axis=2)
    x_col = jnp.pad(x_col, ((0, B_pad - B), (0, L1P - L1), (0, 0)))
    x_flat = x_col.reshape(B_pad * L1P, KC).astype(bf16)

    ext = jnp.concatenate([has_position, position], axis=1).astype(f32)  # (B, 2)
    ext = jnp.pad(ext, ((0, B_pad - B), (0, 0)))

    w1, b1 = weights['w1'], weights['b1']
    w2s, b2 = weights['w2s'], weights['b2']
    w_fc1, w_ext, b_fc1 = weights['w_fc1'], weights['w_ext'], weights['b_fc1']
    w_fc2, b_fc2 = weights['w_fc2'], weights['b_fc2']

    # ---- fused kernel: TB examples per grid step ----------------------------
    def kernel(x_ref, ext_ref, w1_ref, b1_ref, w2_ref, b2_ref,
               wfc1_ref, wext_ref, bfc1_ref, wfc2_ref, bfc2_ref, out_ref):
        # Conv1d(C -> 128, k=5) + ReLU: one im2col matmul over TB*L1P rows.
        h1 = jnp.dot(x_ref[...], w1_ref[...], preferred_element_type=f32)
        h1 = jnp.maximum(h1 + b1_ref[...], 0.0)                  # (TB*L1P, 128)
        h1_3d = h1.reshape(TB, L1P, O1)                          # 8-aligned split

        # Conv1d(128 -> 128, k=5) + ReLU: K accumulated MXU matmuls (no concat).
        h2 = None
        for k in range(K):
            tap = h1_3d[:, k:k + L2, :].reshape(TB * L2, O1).astype(bf16)
            part = jnp.dot(tap, w2_ref[k], preferred_element_type=f32)
            h2 = part if h2 is None else h2 + part
        h2 = jnp.maximum(h2 + b2_ref[...], 0.0)                  # (TB*L2, 128)

        # Fused first Linear of value+advantage heads: (TB,1024)x(1024,1024).
        feat = h2.reshape(TB, L2 * O2).astype(bf16)
        h = jnp.dot(feat, wfc1_ref[...], preferred_element_type=f32)   # (TB, 2*512)
        e = ext_ref[...]                                         # (TB, 2)
        h = h + e[:, 0:1] * wext_ref[0:1, :] + e[:, 1:2] * wext_ref[1:2, :]
        h = jnp.maximum(h + bfc1_ref[...], 0.0)

        # Fused second Linear -> lane-dense (TB, 128): cols 0..A-1 = advantage,
        # col A = value, cols A+1.. = exact zeros (required by the mean below).
        o2 = jnp.dot(h.astype(bf16), wfc2_ref[...], preferred_element_type=f32)
        o2 = o2 + bfc2_ref[...]
        val = o2[:, A:A + 1]
        adv_mean = (jnp.sum(o2, axis=1, keepdims=True) - val) * (1.0 / A)
        out_ref[...] = o2 + val - adv_mean                       # (TB, 128)

    def const_spec(arr):
        n = arr.ndim
        return pl.BlockSpec(arr.shape, lambda b, n=n: (0,) * n)

    out_pad = pl.pallas_call(
        kernel,
        out_shape=jax.ShapeDtypeStruct((B_pad, NOUT), f32),
        grid=(n_blocks,),
        in_specs=[
            pl.BlockSpec((TB * L1P, KC), lambda b: (b, 0)),      # im2col block
            pl.BlockSpec((TB, 2), lambda b: (b, 0)),             # ext block
            const_spec(w1), const_spec(b1), const_spec(w2s), const_spec(b2),
            const_spec(w_fc1), const_spec(w_ext), const_spec(b_fc1),
            const_spec(w_fc2), const_spec(b_fc2),
        ],
        out_specs=pl.BlockSpec((TB, NOUT), lambda b: (b, 0)),
        compiler_params=pltpu.CompilerParams(
            dimension_semantics=("parallel",),
            vmem_limit_bytes=32 * 1024 * 1024,
        ),
    )(x_flat, ext, w1, b1, w2s, b2, w_fc1, w_ext, b_fc1, w_fc2, b_fc2)

    return out_pad[:B, :A]


# --------------------------------------------------------------------------- #
# Pure-JAX f32 mirror of the PyTorch forward (for validation).                #
# --------------------------------------------------------------------------- #
def _torch_style_reference(params, price_data, has_position, position):
    def conv1d(x, w, b):                      # x (B,C,L), w (O,C,K), b (O,)
        O, _, Kk = w.shape
        Lo = x.shape[2] - Kk + 1
        out = jnp.zeros((x.shape[0], O, Lo), jnp.float32)
        for k in range(Kk):
            out = out + jnp.einsum('bcl,oc->bol', x[:, :, k:k + Lo], w[:, :, k])
        return out + b[None, :, None]

    y = jax.nn.relu(conv1d(price_data, params['w1'], params['b1']))
    y = jax.nn.relu(conv1d(y, params['w2'], params['b2']))
    feat = jnp.concatenate([y.reshape(y.shape[0], -1), has_position, position], axis=1)
    hv = jax.nn.relu(feat @ params['wv1'].T + params['bv1'])
    val = hv @ params['wv2'].T + params['bv2']
    ha = jax.nn.relu(feat @ params['wa1'].T + params['ba1'])
    adv = ha @ params['wa2'].T + params['ba2']
    return val + (adv - adv.mean(axis=1, keepdims=True))


if __name__ == "__main__":
    B, C, L, A = 2, 4, 16, 3                  # small shapes: shape=(4, 16), 3 actions
    L2 = L - 2 * (K - 1)                      # conv output length = 8
    F = CONV_CH * L2 + 2                      # conv_output_size (+2 as in _get_conv_out)

    key = jax.random.PRNGKey(0)
    ks = jax.random.split(key, 16)
    s = 0.05
    params = {
        'w1':  s * jax.random.normal(ks[0], (CONV_CH, C, K), jnp.float32),
        'b1':  s * jax.random.normal(ks[1], (CONV_CH,), jnp.float32),
        'w2':  s * jax.random.normal(ks[2], (CONV_CH, CONV_CH, K), jnp.float32),
        'b2':  s * jax.random.normal(ks[3], (CONV_CH,), jnp.float32),
        'wv1': s * jax.random.normal(ks[4], (512, F), jnp.float32),
        'bv1': s * jax.random.normal(ks[5], (512,), jnp.float32),
        'wv2': s * jax.random.normal(ks[6], (1, 512), jnp.float32),
        'bv2': s * jax.random.normal(ks[7], (1,), jnp.float32),
        'wa1': s * jax.random.normal(ks[8], (512, F), jnp.float32),
        'ba1': s * jax.random.normal(ks[9], (512,), jnp.float32),
        'wa2': s * jax.random.normal(ks[10], (A, 512), jnp.float32),
        'ba2': s * jax.random.normal(ks[11], (A,), jnp.float32),
    }
    price = jax.random.normal(ks[12], (B, C, L), jnp.float32)
    has_pos = (jax.random.uniform(ks[13], (B, 1)) > 0.5).astype(jnp.float32)
    pos = jax.random.normal(ks[14], (B, 1), jnp.float32)

    weights = prepare_weights(params)         # one-time relayout, hoisted out of forward
    fwd = jax.jit(dqn_conv1d_forward, static_argnames=('action_count',))
    out = jax.block_until_ready(fwd(weights, price, has_pos, pos, action_count=A))
    ref = jax.block_until_ready(_torch_style_reference(params, price, has_pos, pos))

    assert out.shape == (B, A), out.shape
    assert jnp.allclose(out, ref, atol=5e-2, rtol=5e-2), (out, ref)
    print("KERNEL_OK")
</pallas_src>

<mosaic_0001>
module attributes {stable_mosaic.version = 11 : i64} {
  func.func @kernel(%arg0: i32, %arg1: memref<128x20xbf16, #tpu.memory_space<vmem>>, %arg2: memref<8x2xf32, #tpu.memory_space<vmem>>, %arg3: memref<20x128xbf16, #tpu.memory_space<vmem>>, %arg4: memref<1x128xf32, #tpu.memory_space<vmem>>, %arg5: memref<5x128x128xbf16, #tpu.memory_space<vmem>>, %arg6: memref<1x128xf32, #tpu.memory_space<vmem>>, %arg7: memref<1024x1024xbf16, #tpu.memory_space<vmem>>, %arg8: memref<2x1024xf32, #tpu.memory_space<vmem>>, %arg9: memref<1x1024xf32, #tpu.memory_space<vmem>>, %arg10: memref<1024x128xbf16, #tpu.memory_space<vmem>>, %arg11: memref<1x128xf32, #tpu.memory_space<vmem>>, %arg12: memref<8x128xf32, #tpu.memory_space<vmem>>) attributes {dimension_semantics = [#tpu.dimension_semantics<parallel>], iteration_bounds = array<i64: 1>, scalar_prefetch = 0 : i64, scratch_operands = 0 : i64, tpu.core_type = #tpu.core_type<tc>, window_params = [{transform_indices = @transform_0, window_bounds = array<i64: 128, 20>}, {transform_indices = @transform_1, window_bounds = array<i64: 8, 2>}, {pipeline_mode = #tpu.pipeline_mode<synchronous>, transform_indices = @transform_2, window_bounds = array<i64: 20, 128>}, {pipeline_mode = #tpu.pipeline_mode<synchronous>, transform_indices = @transform_3, window_bounds = array<i64: 1, 128>}, {pipeline_mode = #tpu.pipeline_mode<synchronous>, transform_indices = @transform_4, window_bounds = array<i64: 5, 128, 128>}, {pipeline_mode = #tpu.pipeline_mode<synchronous>, transform_indices = @transform_5, window_bounds = array<i64: 1, 128>}, {pipeline_mode = #tpu.pipeline_mode<synchronous>, transform_indices = @transform_6, window_bounds = array<i64: 1024, 1024>}, {pipeline_mode = #tpu.pipeline_mode<synchronous>, transform_indices = @transform_7, window_bounds = array<i64: 2, 1024>}, {pipeline_mode = #tpu.pipeline_mode<synchronous>, transform_indices = @transform_8, window_bounds = array<i64: 1, 1024>}, {pipeline_mode = #tpu.pipeline_mode<synchronous>, transform_indices = @transform_9, window_bounds = array<i64: 1024, 128>}, {pipeline_mode = #tpu.pipeline_mode<synchronous>, transform_indices = @transform_10, window_bounds = array<i64: 1, 128>}, {transform_indices = @transform_11, window_bounds = array<i64: 8, 128>}]} {
    %c0 = arith.constant 0 : index
    %c0_0 = arith.constant 0 : index
    %0 = vector.load %arg1[%c0, %c0_0] : memref<128x20xbf16, #tpu.memory_space<vmem>>, vector<128x20xbf16>
    %c0_1 = arith.constant 0 : index
    %c0_2 = arith.constant 0 : index
    %1 = vector.load %arg3[%c0_1, %c0_2] : memref<20x128xbf16, #tpu.memory_space<vmem>>, vector<20x128xbf16>
    %cst = arith.constant dense<0.000000e+00> : vector<128x128xf32>
    %2 = tpu.matmul %0, %1, %cst {dimension_numbers = #tpu.dot_dimension_numbers<[1], [0], [0], [1], [0, 0, 1, 1], [], []>} : vector<128x20xbf16>, vector<20x128xbf16>, vector<128x128xf32> -> vector<128x128xf32>
    %c0_3 = arith.constant 0 : index
    %c0_4 = arith.constant 0 : index
    %3 = vector.load %arg4[%c0_3, %c0_4] : memref<1x128xf32, #tpu.memory_space<vmem>>, vector<1x128xf32>
    %4 = vector.broadcast %3 : vector<1x128xf32> to vector<128x128xf32>
    %5 = arith.addf %2, %4 : vector<128x128xf32>
    %cst_5 = arith.constant 0.000000e+00 : f32
    %6 = vector.broadcast %cst_5 : f32 to vector<128x128xf32>
    %7 = arith.maximumf %5, %6 : vector<128x128xf32>
    %8 = vector.shape_cast %7 : vector<128x128xf32> to vector<8x16x128xf32>
    %9 = vector.extract_strided_slice %8 {offsets = [0, 0, 0], sizes = [8, 8, 128], strides = [1, 1, 1]} : vector<8x16x128xf32> to vector<8x8x128xf32>
    %10 = vector.shape_cast %9 : vector<8x8x128xf32> to vector<64x128xf32>
    %11 = arith.truncf %10 : vector<64x128xf32> to vector<64x128xbf16>
    %c0_6 = arith.constant 0 : index
    %c0_7 = arith.constant 0 : index
    %c0_8 = arith.constant 0 : index
    %12 = vector.load %arg5[%c0_6, %c0_7, %c0_8] : memref<5x128x128xbf16, #tpu.memory_space<vmem>>, vector<1x128x128xbf16>
    %13 = vector.shape_cast %12 : vector<1x128x128xbf16> to vector<128x128xbf16>
    %cst_9 = arith.constant dense<0.000000e+00> : vector<64x128xf32>
    %14 = tpu.matmul %11, %13, %cst_9 {dimension_numbers = #tpu.dot_dimension_numbers<[1], [0], [0], [1], [0, 0, 1, 1], [], []>} : vector<64x128xbf16>, vector<128x128xbf16>, vector<64x128xf32> -> vector<64x128xf32>
    %15 = vector.extract_strided_slice %8 {offsets = [0, 1, 0], sizes = [8, 8, 128], strides = [1, 1, 1]} : vector<8x16x128xf32> to vector<8x8x128xf32>
    %16 = vector.shape_cast %15 : vector<8x8x128xf32> to vector<64x128xf32>
    %17 = arith.truncf %16 : vector<64x128xf32> to vector<64x128xbf16>
    %c1 = arith.constant 1 : index
    %c0_10 = arith.constant 0 : index
    %c0_11 = arith.constant 0 : index
    %18 = vector.load %arg5[%c1, %c0_10, %c0_11] : memref<5x128x128xbf16, #tpu.memory_space<vmem>>, vector<1x128x128xbf16>
    %19 = vector.shape_cast %18 : vector<1x128x128xbf16> to vector<128x128xbf16>
    %cst_12 = arith.constant dense<0.000000e+00> : vector<64x128xf32>
    %20 = tpu.matmul %17, %19, %cst_12 {dimension_numbers = #tpu.dot_dimension_numbers<[1], [0], [0], [1], [0, 0, 1, 1], [], []>} : vector<64x128xbf16>, vector<128x128xbf16>, vector<64x128xf32> -> vector<64x128xf32>
    %21 = arith.addf %14, %20 : vector<64x128xf32>
    %22 = vector.extract_strided_slice %8 {offsets = [0, 2, 0], sizes = [8, 8, 128], strides = [1, 1, 1]} : vector<8x16x128xf32> to vector<8x8x128xf32>
    %23 = vector.shape_cast %22 : vector<8x8x128xf32> to vector<64x128xf32>
    %24 = arith.truncf %23 : vector<64x128xf32> to vector<64x128xbf16>
    %c2 = arith.constant 2 : index
    %c0_13 = arith.constant 0 : index
    %c0_14 = arith.constant 0 : index
    %25 = vector.load %arg5[%c2, %c0_13, %c0_14] : memref<5x128x128xbf16, #tpu.memory_space<vmem>>, vector<1x128x128xbf16>
    %26 = vector.shape_cast %25 : vector<1x128x128xbf16> to vector<128x128xbf16>
    %cst_15 = arith.constant dense<0.000000e+00> : vector<64x128xf32>
    %27 = tpu.matmul %24, %26, %cst_15 {dimension_numbers = #tpu.dot_dimension_numbers<[1], [0], [0], [1], [0, 0, 1, 1], [], []>} : vector<64x128xbf16>, vector<128x128xbf16>, vector<64x128xf32> -> vector<64x128xf32>
    %28 = arith.addf %21, %27 : vector<64x128xf32>
    %29 = vector.extract_strided_slice %8 {offsets = [0, 3, 0], sizes = [8, 8, 128], strides = [1, 1, 1]} : vector<8x16x128xf32> to vector<8x8x128xf32>
    %30 = vector.shape_cast %29 : vector<8x8x128xf32> to vector<64x128xf32>
    %31 = arith.truncf %30 : vector<64x128xf32> to vector<64x128xbf16>
    %c3 = arith.constant 3 : index
    %c0_16 = arith.constant 0 : index
    %c0_17 = arith.constant 0 : index
    %32 = vector.load %arg5[%c3, %c0_16, %c0_17] : memref<5x128x128xbf16, #tpu.memory_space<vmem>>, vector<1x128x128xbf16>
    %33 = vector.shape_cast %32 : vector<1x128x128xbf16> to vector<128x128xbf16>
    %cst_18 = arith.constant dense<0.000000e+00> : vector<64x128xf32>
    %34 = tpu.matmul %31, %33, %cst_18 {dimension_numbers = #tpu.dot_dimension_numbers<[1], [0], [0], [1], [0, 0, 1, 1], [], []>} : vector<64x128xbf16>, vector<128x128xbf16>, vector<64x128xf32> -> vector<64x128xf32>
    %35 = arith.addf %28, %34 : vector<64x128xf32>
    %36 = vector.extract_strided_slice %8 {offsets = [0, 4, 0], sizes = [8, 8, 128], strides = [1, 1, 1]} : vector<8x16x128xf32> to vector<8x8x128xf32>
    %37 = vector.shape_cast %36 : vector<8x8x128xf32> to vector<64x128xf32>
    %38 = arith.truncf %37 : vector<64x128xf32> to vector<64x128xbf16>
    %c4 = arith.constant 4 : index
    %c0_19 = arith.constant 0 : index
    %c0_20 = arith.constant 0 : index
    %39 = vector.load %arg5[%c4, %c0_19, %c0_20] : memref<5x128x128xbf16, #tpu.memory_space<vmem>>, vector<1x128x128xbf16>
    %40 = vector.shape_cast %39 : vector<1x128x128xbf16> to vector<128x128xbf16>
    %cst_21 = arith.constant dense<0.000000e+00> : vector<64x128xf32>
    %41 = tpu.matmul %38, %40, %cst_21 {dimension_numbers = #tpu.dot_dimension_numbers<[1], [0], [0], [1], [0, 0, 1, 1], [], []>} : vector<64x128xbf16>, vector<128x128xbf16>, vector<64x128xf32> -> vector<64x128xf32>
    %42 = arith.addf %35, %41 : vector<64x128xf32>
    %c0_22 = arith.constant 0 : index
    %c0_23 = arith.constant 0 : index
    %43 = vector.load %arg6[%c0_22, %c0_23] : memref<1x128xf32, #tpu.memory_space<vmem>>, vector<1x128xf32>
    %44 = vector.broadcast %43 : vector<1x128xf32> to vector<64x128xf32>
    %45 = arith.addf %42, %44 : vector<64x128xf32>
    %cst_24 = arith.constant 0.000000e+00 : f32
    %46 = vector.broadcast %cst_24 : f32 to vector<64x128xf32>
    %47 = arith.maximumf %45, %46 : vector<64x128xf32>
    %48 = vector.shape_cast %47 : vector<64x128xf32> to vector<8x1024xf32>
    %49 = arith.truncf %48 : vector<8x1024xf32> to vector<8x1024xbf16>
    %c0_25 = arith.constant 0 : index
    %c0_26 = arith.constant 0 : index
    %50 = vector.load %arg7[%c0_25, %c0_26] : memref<1024x1024xbf16, #tpu.memory_space<vmem>>, vector<1024x1024xbf16>
    %cst_27 = arith.constant dense<0.000000e+00> : vector<8x1024xf32>
    %51 = tpu.matmul %49, %50, %cst_27 {dimension_numbers = #tpu.dot_dimension_numbers<[1], [0], [0], [1], [0, 0, 1, 1], [], []>} : vector<8x1024xbf16>, vector<1024x1024xbf16>, vector<8x1024xf32> -> vector<8x1024xf32>
    %c0_28 = arith.constant 0 : index
    %c0_29 = arith.constant 0 : index
    %52 = vector.load %arg2[%c0_28, %c0_29] : memref<8x2xf32, #tpu.memory_space<vmem>>, vector<8x2xf32>
    %53 = vector.extract_strided_slice %52 {offsets = [0, 0], sizes = [8, 1], strides = [1, 1]} : vector<8x2xf32> to vector<8x1xf32>
    %c0_30 = arith.constant 0 : index
    %c0_31 = arith.constant 0 : index
    %54 = vector.load %arg8[%c0_30, %c0_31] : memref<2x1024xf32, #tpu.memory_space<vmem>>, vector<1x1024xf32>
    %55 = vector.broadcast %53 : vector<8x1xf32> to vector<8x1024xf32>
    %56 = vector.broadcast %54 : vector<1x1024xf32> to vector<8x1024xf32>
    %57 = arith.mulf %55, %56 : vector<8x1024xf32>
    %58 = arith.addf %51, %57 : vector<8x1024xf32>
    %59 = vector.extract_strided_slice %52 {offsets = [0, 1], sizes = [8, 1], strides = [1, 1]} : vector<8x2xf32> to vector<8x1xf32>
    %c1_32 = arith.constant 1 : index
    %c0_33 = arith.constant 0 : index
    %60 = vector.load %arg8[%c1_32, %c0_33] : memref<2x1024xf32, #tpu.memory_space<vmem>>, vector<1x1024xf32>
    %61 = vector.broadcast %59 : vector<8x1xf32> to vector<8x1024xf32>
    %62 = vector.broadcast %60 : vector<1x1024xf32> to vector<8x1024xf32>
    %63 = arith.mulf %61, %62 : vector<8x1024xf32>
    %64 = arith.addf %58, %63 : vector<8x1024xf32>
    %c0_34 = arith.constant 0 : index
    %c0_35 = arith.constant 0 : index
    %65 = vector.load %arg9[%c0_34, %c0_35] : memref<1x1024xf32, #tpu.memory_space<vmem>>, vector<1x1024xf32>
    %66 = vector.broadcast %65 : vector<1x1024xf32> to vector<8x1024xf32>
    %67 = arith.addf %64, %66 : vector<8x1024xf32>
    %cst_36 = arith.constant 0.000000e+00 : f32
    %68 = vector.broadcast %cst_36 : f32 to vector<8x1024xf32>
    %69 = arith.maximumf %67, %68 : vector<8x1024xf32>
    %70 = arith.truncf %69 : vector<8x1024xf32> to vector<8x1024xbf16>
    %c0_37 = arith.constant 0 : index
    %c0_38 = arith.constant 0 : index
    %71 = vector.load %arg10[%c0_37, %c0_38] : memref<1024x128xbf16, #tpu.memory_space<vmem>>, vector<1024x128xbf16>
    %cst_39 = arith.constant dense<0.000000e+00> : vector<8x128xf32>
    %72 = tpu.matmul %70, %71, %cst_39 {dimension_numbers = #tpu.dot_dimension_numbers<[1], [0], [0], [1], [0, 0, 1, 1], [], []>} : vector<8x1024xbf16>, vector<1024x128xbf16>, vector<8x128xf32> -> vector<8x128xf32>
    %c0_40 = arith.constant 0 : index
    %c0_41 = arith.constant 0 : index
    %73 = vector.load %arg11[%c0_40, %c0_41] : memref<1x128xf32, #tpu.memory_space<vmem>>, vector<1x128xf32>
    %74 = vector.broadcast %73 : vector<1x128xf32> to vector<8x128xf32>
    %75 = arith.addf %72, %74 : vector<8x128xf32>
    %76 = vector.extract_strided_slice %75 {offsets = [0, 3], sizes = [8, 1], strides = [1, 1]} : vector<8x128xf32> to vector<8x1xf32>
    %cst_42 = arith.constant dense<0.000000e+00> : vector<8xf32>
    %77 = vector.multi_reduction <add>, %75, %cst_42 [1] : vector<8x128xf32> to vector<8xf32>
    %78 = vector.shape_cast %77 : vector<8xf32> to vector<8x1xf32>
    %79 = arith.subf %78, %76 : vector<8x1xf32>
    %cst_43 = arith.constant 0.333333343 : f32
    %80 = vector.broadcast %cst_43 : f32 to vector<8x1xf32>
    %81 = arith.mulf %79, %80 : vector<8x1xf32>
    %82 = vector.broadcast %76 : vector<8x1xf32> to vector<8x128xf32>
    %83 = arith.addf %75, %82 : vector<8x128xf32>
    %84 = vector.broadcast %81 : vector<8x1xf32> to vector<8x128xf32>
    %85 = arith.subf %83, %84 : vector<8x128xf32>
    %c0_44 = arith.constant 0 : index
    %c0_45 = arith.constant 0 : index
    %86 = vector.load %arg12[%c0_44, %c0_45] : memref<8x128xf32, #tpu.memory_space<vmem>>, vector<8x128xf32>
    tpu.vector_store %arg12[%c0_44, %c0_45], %85 {strides = array<i32>} : memref<8x128xf32, #tpu.memory_space<vmem>>, vector<8x128xf32>,
    return
  }
  func.func @transform_0(%arg0: i32) -> (i32, i32) {
    %c0_i32 = arith.constant 0 : i32
    %c0_i32_0 = arith.constant 0 : i32
    return %arg0, %c0_i32 : i32, i32
  }
  func.func @transform_1(%arg0: i32) -> (i32, i32) {
    %c0_i32 = arith.constant 0 : i32
    %c0_i32_0 = arith.constant 0 : i32
    return %arg0, %c0_i32 : i32, i32
  }
  func.func @transform_2(%arg0: i32) -> (i32, i32) {
    %c0_i32 = arith.constant 0 : i32
    %c0_i32_0 = arith.constant 0 : i32
    %c0_i32_1 = arith.constant 0 : i32
    return %c0_i32, %c0_i32_0 : i32, i32
  }
  func.func @transform_3(%arg0: i32) -> (i32, i32) {
    %c0_i32 = arith.constant 0 : i32
    %c0_i32_0 = arith.constant 0 : i32
    %c0_i32_1 = arith.constant 0 : i32
    return %c0_i32, %c0_i32_0 : i32, i32
  }
  func.func @transform_4(%arg0: i32) -> (i32, i32, i32) {
    %c0_i32 = arith.constant 0 : i32
    %c0_i32_0 = arith.constant 0 : i32
    %c0_i32_1 = arith.constant 0 : i32
    %c0_i32_2 = arith.constant 0 : i32
    return %c0_i32, %c0_i32_0, %c0_i32_1 : i32, i32, i32
  }
  func.func @transform_5(%arg0: i32) -> (i32, i32) {
    %c0_i32 = arith.constant 0 : i32
    %c0_i32_0 = arith.constant 0 : i32
    %c0_i32_1 = arith.constant 0 : i32
    return %c0_i32, %c0_i32_0 : i32, i32
  }
  func.func @transform_6(%arg0: i32) -> (i32, i32) {
    %c0_i32 = arith.constant 0 : i32
    %c0_i32_0 = arith.constant 0 : i32
    %c0_i32_1 = arith.constant 0 : i32
    return %c0_i32, %c0_i32_0 : i32, i32
  }
  func.func @transform_7(%arg0: i32) -> (i32, i32) {
    %c0_i32 = arith.constant 0 : i32
    %c0_i32_0 = arith.constant 0 : i32
    %c0_i32_1 = arith.constant 0 : i32
    return %c0_i32, %c0_i32_0 : i32, i32
  }
  func.func @transform_8(%arg0: i32) -> (i32, i32) {
    %c0_i32 = arith.constant 0 : i32
    %c0_i32_0 = arith.constant 0 : i32
    %c0_i32_1 = arith.constant 0 : i32
    return %c0_i32, %c0_i32_0 : i32, i32
  }
  func.func @transform_9(%arg0: i32) -> (i32, i32) {
    %c0_i32 = arith.constant 0 : i32
    %c0_i32_0 = arith.constant 0 : i32
    %c0_i32_1 = arith.constant 0 : i32
    return %c0_i32, %c0_i32_0 : i32, i32
  }
  func.func @transform_10(%arg0: i32) -> (i32, i32) {
    %c0_i32 = arith.constant 0 : i32
    %c0_i32_0 = arith.constant 0 : i32
    %c0_i32_1 = arith.constant 0 : i32
    return %c0_i32, %c0_i32_0 : i32, i32
  }
  func.func @transform_11(%arg0: i32) -> (i32, i32) {
    %c0_i32 = arith.constant 0 : i32
    %c0_i32_0 = arith.constant 0 : i32
    return %arg0, %c0_i32 : i32, i32
  }
}

</mosaic_0001>

<bundles_post_ra>
// kernel: dqn_conv1d_forward.1
= control target key start
LH: loop header
LB: loop body
LE: loop exit
PB: predicated region body
PF: predicated region fallthrough
CT: control target
= control target key end

     0   :  { %16 = vsyncpa [#allocation3], 0  ;;  %s9693_s0 = inlined_call_operand.vmem [shape: bf16[128,20], index: 0, kind: input, shape index: {}]   ;;  %s9694_s1 = inlined_call_operand.vmem [shape: f32[8,2], index: 1, kind: input, shape index: {}]   ;;  %s9695_s2 = inlined_call_operand.hbm [shape: bf16[20,128], index: 2, kind: input, shape index: {}]   ;;  %s9696_s3 = inlined_call_operand.hbm [shape: f32[1,128], index: 3, kind: input, shape index: {}]   ;;  %s9697_s4 = inlined_call_operand.hbm [shape: bf16[5,128,128], index: 4, kind: input, shape index: {}]   ;;  %s9698_s5 = inlined_call_operand.hbm [shape: f32[1,128], index: 5, kind: input, shape index: {}]   ;;  %s9699_s6 = inlined_call_operand.hbm [shape: bf16[1024,1024], index: 6, kind: input, shape index: {}]   ;;  %s9700_s7 = inlined_call_operand.hbm [shape: f32[2,1024], index: 7, kind: input, shape index: {}]   ;;  %s9701_s8 = inlined_call_operand.hbm [shape: f32[1,1024], index: 8, kind: input, shape index: {}]   ;;  %s9702_s9 = inlined_call_operand.hbm [shape: bf16[1024,128], index: 9, kind: input, shape index: {}]   ;;  %s9703_s10 = inlined_call_operand.hbm [shape: f32[1,128], index: 10, kind: input, shape index: {}]   ;;  %s9704_s11 = inlined_call_operand.vmem [shape: f32[8,128], index: 11, kind: output, shape index: {}]  }
   0x1   :  { %17 = vsyncpa [#allocation5], 0 }
   0x2   :  { %18 = vsyncpa [#allocation8], 0 }
   0x3   :  { %19 = vsyncpa [#allocation11], 0  ;;  %s43_s19 = sshll.u32 %s9696_s3, 4  ;;  %s44_s19 = int_to_ptr.hbm [resolvable:$true] %s43_s19 }
   0x4   :  { %20 = vsyncpa [#allocation14], 0  ;;  %s9111_s20 = smov [#allocation4]   ;;  %s67_s24 = sshll.u32 %s9698_s5, 4  ;;  %s68_s24 = int_to_ptr.hbm [resolvable:$true] %s67_s24 }
   0x5   :  { %s45_s21 = sshll.u32 %s9111_s20, 4  ;;  %s9112_s25 = smov [#allocation7]   ;;  %s46_s21 = int_to_ptr.vmem [resolvable:$true] %s45_s21 }
   0x6   :  { %48 = dma.hbm_to_vmem [thread:$0]  %s44_s19, 16, %s46_s21, [#allocation5]  }
   0x7   :  { %s69_s26 = sshll.u32 %s9112_s25, 4  ;;  %s91_s29 = sshll.u32 %s9700_s7, 4  ;;  %s70_s26 = int_to_ptr.vmem [resolvable:$true] %s69_s26  ;;  %s92_s29 = int_to_ptr.hbm [resolvable:$true] %s91_s29 }
   0x8   :  { %72 = dma.hbm_to_vmem [thread:$0]  %s68_s24, 16, %s70_s26, [#allocation8]  }
   0x9   :  { %s9113_s3 = smov [#allocation10]   ;;  %s112_s14 = sshll.u32 %s9702_s9, 4  ;;  %s113_s14 = int_to_ptr.hbm [resolvable:$true] %s112_s14 }
   0xa   :  { %s93_s30 = sshll.u32 %s9113_s3, 4  ;;  %s9114_s5 = smov [#allocation13]   ;;  %s94_s30 = int_to_ptr.vmem [resolvable:$true] %s93_s30 }
   0xb   :  { %96 = dma.hbm_to_vmem [thread:$0]  %s92_s29, 256, %s94_s30, [#allocation11]  }
   0xc   :  { %s114_s15 = sshll.u32 %s9114_s5, 4  ;;  %s29_s18 = sshll.u32 %s9695_s2, 4  ;;  %s115_s15 = int_to_ptr.vmem [resolvable:$true] %s114_s15  ;;  %s30_s18 = int_to_ptr.hbm [resolvable:$true] %s29_s18 }
   0xd   :  { %s9115_s7 = smov 64   ;;  %s9116_s19 = smov 4  }
   0xe   :  { %120 = dma.hbm_to_vmem [thread:$0]  %s113_s14, 8192, %s115_s15, [#allocation14], %s9115_s7, %s9115_s7, %s9116_s19  }
   0xf   :  { %s53_s22 = sshll.u32 %s9697_s4, 4  ;;  %s9117_s23 = smov [#allocation2]   ;;  %s54_s22 = int_to_ptr.hbm [resolvable:$true] %s53_s22 }
  0x10   :  { %s31_s24 = sshll.u32 %s9117_s23, 4  ;;  %s9118_s9 = smov [#allocation6]   ;;  %s32_s24 = int_to_ptr.vmem [resolvable:$true] %s31_s24 }
  0x11   :  { %37 = dma.hbm_to_vmem [thread:$0]  %s30_s18, 192, %s32_s24, [#allocation3], %s9115_s7, %s9115_s7, %s9116_s19  }
  0x12   :  { %s55_s25 = sshll.u32 %s9118_s9, 4  ;;  %s77_s2 = sshll.u32 %s9699_s6, 4  ;;  %s56_s25 = int_to_ptr.vmem [resolvable:$true] %s55_s25  ;;  %s78_s2 = int_to_ptr.hbm [resolvable:$true] %s77_s2 }
  0x13   :  { %61 = dma.hbm_to_vmem [thread:$0]  %s54_s22, 5120, %s56_s25, [#allocation5], %s9115_s7, %s9115_s7, %s9116_s19  }
  0x14   :  { %s9119_s28 = smov [#allocation9]   ;;  %s102_s4 = sshll.u32 %s9701_s8, 4  ;;  %s103_s4 = int_to_ptr.hbm [resolvable:$true] %s102_s4 }
  0x15   :  { %s79_s29 = sshll.u32 %s9119_s28, 4  ;;  %s9120_s12 = smov 512   ;;  %s80_s29 = int_to_ptr.vmem [resolvable:$true] %s79_s29 }
  0x16   :  { %s9121_s13 = smov 32   ;;  %s9122_s14 = smov [#allocation12]  }
  0x17   :  { %85 = dma.hbm_to_vmem [thread:$0]  %s78_s2, 65536, %s80_s29, [#allocation8], %s9120_s12, %s9120_s12, %s9121_s13  }
  0x18   :  { %s104_s5 = sshll.u32 %s9122_s14, 4  ;;  %s126_s6 = sshll.u32 %s9703_s10, 4  ;;  %s105_s5 = int_to_ptr.vmem [resolvable:$true] %s104_s5  ;;  %s127_s6 = int_to_ptr.hbm [resolvable:$true] %s126_s6 }
  0x19   :  { %107 = dma.hbm_to_vmem [thread:$0]  %s103_s4, 128, %s105_s5, [#allocation11]  }
  0x1a   :  { %s9123_s17 = smov [#allocation15]  }
  0x1b   :  { %s128_s18 = sshll.u32 %s9123_s17, 4  ;;  %s129_s18 = int_to_ptr.vmem [resolvable:$true] %s128_s18 }
  0x1c   :  { %131 = dma.hbm_to_vmem [thread:$0]  %s127_s6, 16, %s129_s18, [#allocation14]  }
  0x1d   :  { %9101 = dma.done.wait [#allocation3], 192  }
  0x1e   :  { %9102 = vsyncadd [#allocation3], 4294967104 }
  0x1f   :  { %9103 = dma.done.wait [#allocation5], 5136  }
  0x20   :  { %9104 = vsyncadd [#allocation5], 4294962160 }
  0x21   :  { %9105 = dma.done.wait [#allocation8], 65552  }
  0x22   :  { %9106 = vsyncadd [#allocation8], 4294901744 }
  0x23   :  { %9107 = dma.done.wait [#allocation11], 384  }
  0x24   :  { %9108 = vsyncadd [#allocation11], 4294966912 }
  0x25   :  { %9109 = dma.done.wait [#allocation14], 8208  }
  0x26   :  { %9110 = vsyncadd [#allocation14], 4294959088  ;;  %v187_v0 = vld [vmem:[#allocation2 + $0x8] sm:$0x3]  ;;  %vm266_vm0 = vcmask 1041408   ;;  %v8242_v4 = vld [vmem:[#allocation2] sm:$0xff] }
  0x27   :  { %v237_v1 = vunpack.c.l.b16 %v187_v0  ;;  %v8234_v5 = vld [vmem:[%s9693_s0] sm:$0xff]  ;;  %vm241_vm1 = vcmask 162816   ;;  %v8235_v6 = vld [vmem:[%s9693_s0 + $0x8] sm:$0xff]  ;;  %v8236_v7 = vld [vmem:[%s9693_s0 + $0x10] sm:$0xff]  ;;  %vm857_vm2 = vcmask 1043456   ;;  %vm718_vm3 = vcmask 1044480  }
  0x28   :  { %v8237_v8 = vld [vmem:[%s9693_s0 + $0x18] sm:$0xff]  ;;  %v8238_v9 = vld [vmem:[%s9693_s0 + $0x20] sm:$0xff]  ;;  %v8239_v10 = vld [vmem:[%s9693_s0 + $0x28] sm:$0xff]  ;;  %vm371_vm4 = vcmask 1046528   ;;  %vm579_vm5 = vcmask 1045504  }
  0x29   :  { %v239_v2 = vpack.c.b16 %v237_v1, %v237_v1  ;;  %v8250_v11 = vld [vmem:[#allocation6 + $0x38] sm:$0xff]  ;;  %v8249_v12 = vld [vmem:[#allocation6 + $0x30] sm:$0xff]  ;;  %v8248_v13 = vld [vmem:[#allocation6 + $0x28] sm:$0xff] }
  0x2a   :  { %550 = vmatpush.bf16.msra.mxu2 %v8250_v11  ;;  %v8240_v14 = vld [vmem:[%s9693_s0 + $0x30] sm:$0xff]  ;;  %v8257_v18 = vld [vmem:[#allocation6 + $0x70] sm:$0xff]  ;;  %v8256_v21 = vld [vmem:[#allocation6 + $0x68] sm:$0xff] }
  0x2b   :  { %v268_v3 = vsel %vm266_vm0, %v239_v2, 0  ;;  %v8258_v15 = vld [vmem:[#allocation6 + $0x78] sm:$0xff]  ;;  %v8247_v17 = vld [vmem:[#allocation6 + $0x20] sm:$0xff]  ;;  %v8265_v19 = vld [vmem:[#allocation6 + $0xb0] sm:$0xff] }
  0x2c   :  { %276 = vmatpush.bf16.msra.mxu0 %v268_v3  ;;  %v8266_v16 = vld [vmem:[#allocation6 + $0xb8] sm:$0xff]  ;;  %473 = vmatpush.bf16.msra.mxu1 %v8258_v15  ;;  %v8264_v22 = vld [vmem:[#allocation6 + $0xa8] sm:$0xff]  ;;  %v8245_v23 = vld [vmem:[#allocation6 + $0x10] sm:$0xff] }
  0x2d   :  { %681 = vmatpush.bf16.msra.mxu3 %v8266_v16  ;;  %v8246_v20 = vld [vmem:[#allocation6 + $0x18] sm:$0xff]  ;;  %v8255_v24 = vld [vmem:[#allocation6 + $0x60] sm:$0xff]  ;;  %v8244_v26 = vld [vmem:[#allocation6 + $0x8] sm:$0xff] }
  0x2e   :  { %551 = vmatpush.bf16.msra.mxu2 %v8249_v12  ;;  %v8263_v25 = vld [vmem:[#allocation6 + $0xa0] sm:$0xff]  ;;  %v8254_v28 = vld [vmem:[#allocation6 + $0x58] sm:$0xff]  ;;  %v8253_v31 = vld [vmem:[#allocation6 + $0x50] sm:$0xff] }
  0x2f   :  { %v8241_v27 = vld [vmem:[%s9693_s0 + $0x38] sm:$0xff]  ;;  %v8262_v29 = vld [vmem:[#allocation6 + $0x98] sm:$0xff]  ;;  %v8261_v32 = vld [vmem:[#allocation6 + $0x90] sm:$0xff] }
  0x30   :  { %277 = vmatpush.bf16.msra.mxu0 %v8242_v4  ;;  %474 = vmatpush.bf16.msra.mxu1 %v8257_v18  ;;  %v8243_v30 = vld [vmem:[#allocation6] sm:$0xff]  ;;  %v8252_v33 = vld [vmem:[#allocation6 + $0x48] sm:$0xff]  ;;  %v9246_v38 = vld [vmem:[#allocation4] ss:$0 sm:$0xff] }
  0x31   :  { %682 = vmatpush.bf16.msra.mxu3 %v8265_v19  ;;  %v8260_v34 = vld [vmem:[#allocation6 + $0x88] sm:$0xff]  ;;  %v8251_v35 = vld [vmem:[#allocation6 + $0x40] sm:$0xff] }
  0x32   :  { %552 = vmatpush.bf16.msra.mxu2 %v8248_v13  ;;  %v8259_v36 = vld [vmem:[#allocation6 + $0x80] sm:$0xff] }
  0x33   :  { %5762 = vmatmul.msk.bf16.vlgmr.msra.gmra.mxu0 %vm241_vm1, %v8234_v5 }
  0x34   :  { %475 = vmatpush.bf16.msra.mxu1 %v8256_v21 }
  0x35   :  { %683 = vmatpush.bf16.msra.mxu3 %v8264_v22 }
  0x36   :  { %553 = vmatpush.bf16.msra.mxu2 %v8247_v17 }
  0x38   :  { %476 = vmatpush.bf16.msra.mxu1 %v8255_v24 }
  0x39   :  { %684 = vmatpush.bf16.msra.mxu3 %v8263_v25 }
  0x3a   :  { %554 = vmatpush.bf16.msra.mxu2 %v8246_v20 }
  0x3c   :  { %477 = vmatpush.bf16.msra.mxu1 %v8254_v28 }
  0x3d   :  { %685 = vmatpush.bf16.msra.mxu3 %v8262_v29 }
  0x3e   :  { %555 = vmatpush.bf16.msra.mxu2 %v8245_v23 }
  0x40   :  { %478 = vmatpush.bf16.msra.mxu1 %v8253_v31 }
  0x41   :  { %686 = vmatpush.bf16.msra.mxu3 %v8261_v32 }
  0x42   :  { %556 = vmatpush.bf16.msra.mxu2 %v8244_v26 }
  0x43   :  { %5763 = vmatmul.msk.bf16.gmra.mxu0 %vm241_vm1, %v8235_v6 }
  0x44   :  { %479 = vmatpush.bf16.msra.mxu1 %v8252_v33 }
  0x45   :  { %687 = vmatpush.bf16.msra.mxu3 %v8260_v34 }
  0x46   :  { %557 = vmatpush.bf16.msra.mxu2 %v8243_v30 }
  0x48   :  { %480 = vmatpush.bf16.msra.mxu1 %v8251_v35 }
  0x49   :  { %688 = vmatpush.bf16.msra.mxu3 %v8259_v36 }
  0x53   :  { %5764 = vmatmul.msk.bf16.gmra.mxu0 %vm241_vm1, %v8236_v7 }
  0x63   :  { %5765 = vmatmul.msk.bf16.gmra.mxu0 %vm241_vm1, %v8237_v8 }
  0x73   :  { %5766 = vmatmul.msk.bf16.gmra.mxu0 %vm241_vm1, %v8238_v9 }
  0x83   :  { %5767 = vmatmul.msk.bf16.gmra.mxu0 %vm241_vm1, %v8239_v10 }
  0x93   :  { %5768 = vmatmul.msk.bf16.gmra.mxu0 %vm241_vm1, %v8240_v14 }
  0xa3   :  { %5769 = vmatmul.msk.bf16.gmra.mxu0 %vm241_vm1, %v8241_v27 }
  0xb0   :  { %v279_v37 = vpop.f32.mrf.mxu0 }
  0xb1   :  { %v280_v39 = vadd.f32 %v9246_v38, %v279_v37 }
  0xb3   :  { %v319_v41 = vmax.f32 %v280_v39, 0.0 }
  0xb5   :  { %v858_v44 = vrot.slane %v319_v41, 4  ;;  %v719_v46 = vrot.slane %v319_v41, 3  ;;  %v372_v59 = vrot.slane %v319_v41, 1  ;;  %v580_v60 = vrot.slane %v319_v41, 2 }
  0xb8   :  { %v281_v40 = vpop.f32.mrf.mxu0 }
  0xb9   :  { %v282_v42 = vadd.f32 %v9246_v38, %v281_v40 }
  0xbb   :  { %v320_v43 = vmax.f32 %v282_v42, 0.0 }
  0xbd   :  { %v859_v45 = vrot.slane %v320_v43, 4  ;;  %v720_v47 = vrot.slane %v320_v43, 3  ;;  %v373_v56 = vrot.slane %v320_v43, 1  ;;  %v581_v57 = vrot.slane %v320_v43, 2 }
  0xbf   :  { %v9251_v48 = vsel %vm857_vm2, %v858_v44, %v859_v45  ;;  %v9254_v49 = vsel %vm718_vm3, %v719_v46, %v720_v47  ;;  %v374_v5 = vsel %vm371_vm4, %v372_v59, %v373_v56  ;;  %v582_v6 = vsel %vm579_vm5, %v580_v60, %v581_v57 }
  0xc0   :  { %v284_v50 = vpop.f32.mrf.mxu0 }
  0xc1   :  { %v285_v51 = vadd.f32 %v9246_v38, %v284_v50 }
  0xc3   :  { %v321_v52 = vmax.f32 %v285_v51, 0.0 }
  0xc5   :  { %v335_v53 = vpack.c.bf16 %v321_v52, %v319_v41  ;;  %v375_v61 = vrot.slane %v321_v52, 1  ;;  %v583_v62 = vrot.slane %v321_v52, 2  ;;  %v861_v63 = vrot.slane %v321_v52, 4 }
  0xc6   :  { %v722_v0 = vrot.slane %v321_v52, 3 }
  0xc7   :  { %558 = vmatmul.bf16.vlgmr.msra.gmra.mxu2 %v335_v53 }
  0xc8   :  { %v286_v54 = vpop.f32.mrf.mxu0 }
  0xc9   :  { %v287_v55 = vadd.f32 %v9246_v38, %v286_v54 }
  0xcb   :  { %v322_v58 = vmax.f32 %v287_v55, 0.0 }
  0xcd   :  { %v376_v1 = vrot.slane %v322_v58, 1  ;;  %v584_v2 = vrot.slane %v322_v58, 2  ;;  %v862_v3 = vrot.slane %v322_v58, 4  ;;  %v723_v4 = vrot.slane %v322_v58, 3 }
  0xcf   :  { %v377_v7 = vsel %vm371_vm4, %v375_v61, %v376_v1  ;;  %v585_v8 = vsel %vm579_vm5, %v583_v62, %v584_v2  ;;  %v9263_v9 = vsel %vm857_vm2, %v861_v63, %v862_v3  ;;  %v9266_v10 = vsel %vm718_vm3, %v722_v0, %v723_v4  ;;  %v8282_v61 = vld [vmem:[#allocation6 + $0x138] sm:$0xff]  ;;  %v8281_v1 = vld [vmem:[#allocation6 + $0x130] sm:$0xff] }
  0xd0   :  { %v289_v11 = vpop.f32.mrf.mxu0  ;;  %v404_v12 = vpack.c.bf16 %v377_v7, %v374_v5  ;;  %v612_v13 = vpack.c.bf16 %v585_v8, %v582_v6  ;;  %v890_v14 = vpack.c.bf16 %v9263_v9, %v9251_v48  ;;  %v751_v15 = vpack.c.bf16 %v9266_v10, %v9254_v49  ;;  %959 = vmatpush.bf16.msrb.mxu2 %v8282_v61  ;;  %v8280_v7 = vld [vmem:[#allocation6 + $0x128] sm:$0xff]  ;;  %v8270_v61 = vld [vmem:[#allocation6 + $0xd8] sm:$0xff] }
  0xd1   :  { %v290_v16 = vadd.f32 %v9246_v38, %v289_v11 }
  0xd2   :  { %481 = vmatmul.bf16.vlgmr.msra.gmra.mxu1 %v404_v12  ;;  %689 = vmatmul.bf16.vlgmr.msra.gmra.mxu3 %v612_v13 }
  0xd3   :  { %v323_v18 = vmax.f32 %v290_v16, 0.0  ;;  %v8274_v16 = vld [vmem:[#allocation6 + $0xf8] sm:$0xff] }
  0xd4   :  { %960 = vmatpush.bf16.msrb.mxu2 %v8281_v1  ;;  %820 = vmatpush.bf16.msrb.mxu1 %v8274_v16  ;;  %v8268_v1 = vld [vmem:[#allocation6 + $0xc8] sm:$0xff] }
  0xd5   :  { %v864_v21 = vrot.slane %v323_v18, 4  ;;  %v725_v23 = vrot.slane %v323_v18, 3  ;;  %v378_v36 = vrot.slane %v323_v18, 1  ;;  %v586_v37 = vrot.slane %v323_v18, 2 }
  0xd8   :  { %v291_v17 = vpop.f32.mrf.mxu0  ;;  %961 = vmatpush.bf16.msrb.mxu2 %v8280_v7 }
  0xd9   :  { %v292_v19 = vadd.f32 %v9246_v38, %v291_v17  ;;  %v8279_v17 = vld [vmem:[#allocation6 + $0x120] sm:$0xff] }
  0xdb   :  { %v324_v20 = vmax.f32 %v292_v19, 0.0 }
  0xdc   :  { %962 = vmatpush.bf16.msrb.mxu2 %v8279_v17 }
  0xdd   :  { %v865_v22 = vrot.slane %v324_v20, 4  ;;  %v726_v24 = vrot.slane %v324_v20, 3  ;;  %v379_v33 = vrot.slane %v324_v20, 1  ;;  %v587_v34 = vrot.slane %v324_v20, 2  ;;  %v8273_v20 = vld [vmem:[#allocation6 + $0xf0] sm:$0xff] }
  0xde   :  { %821 = vmatpush.bf16.msrb.mxu1 %v8273_v20 }
  0xdf   :  { %v9275_v25 = vsel %vm857_vm2, %v864_v21, %v865_v22  ;;  %v9278_v26 = vsel %vm718_vm3, %v725_v23, %v726_v24  ;;  %v380_v47 = vsel %vm371_vm4, %v378_v36, %v379_v33  ;;  %v588_v50 = vsel %vm579_vm5, %v586_v37, %v587_v34  ;;  %v8278_v21 = vld [vmem:[#allocation6 + $0x118] sm:$0xff]  ;;  %v8272_v24 = vld [vmem:[#allocation6 + $0xe8] sm:$0xff]  ;;  %v8271_v33 = vld [vmem:[#allocation6 + $0xe0] sm:$0xff] }
  0xe0   :  { %v294_v27 = vpop.f32.mrf.mxu0  ;;  %963 = vmatpush.bf16.msrb.mxu2 %v8278_v21  ;;  %v8276_v36 = vld [vmem:[#allocation6 + $0x108] sm:$0xff] }
  0xe1   :  { %v295_v28 = vadd.f32 %v9246_v38, %v294_v27 }
  0xe2   :  { %822 = vmatpush.bf16.msrb.mxu1 %v8272_v24 }
  0xe3   :  { %v325_v29 = vmax.f32 %v295_v28, 0.0 }
  0xe5   :  { %v336_v30 = vpack.c.bf16 %v325_v29, %v323_v18  ;;  %v381_v39 = vrot.slane %v325_v29, 1  ;;  %v589_v40 = vrot.slane %v325_v29, 2  ;;  %v867_v41 = vrot.slane %v325_v29, 4 }
  0xe6   :  { %v728_v42 = vrot.slane %v325_v29, 3  ;;  %v8277_v29 = vld [vmem:[#allocation6 + $0x110] sm:$0xff]  ;;  %823 = vmatpush.bf16.msrb.mxu1 %v8271_v33 }
  0xe7   :  { %563 = vmatmul.bf16.gmra.mxu2 %v336_v30 }
  0xe8   :  { %v296_v31 = vpop.f32.mrf.mxu0  ;;  %964 = vmatpush.bf16.msrb.mxu2 %v8277_v29 }
  0xe9   :  { %v297_v32 = vadd.f32 %v9246_v38, %v296_v31 }
  0xea   :  { %824 = vmatpush.bf16.msrb.mxu1 %v8270_v61  ;;  %v6924_v61 = vld [vmem:[#allocation9 + $0x7c0] sm:$0xf] }
  0xeb   :  { %v326_v35 = vmax.f32 %v297_v32, 0.0 }
  0xec   :  { %965 = vmatpush.bf16.msrb.mxu2 %v8276_v36 }
  0xed   :  { %v382_v43 = vrot.slane %v326_v35, 1  ;;  %v590_v44 = vrot.slane %v326_v35, 2  ;;  %v868_v45 = vrot.slane %v326_v35, 4  ;;  %v729_v46 = vrot.slane %v326_v35, 3 }
  0xef   :  { %v383_v51 = vsel %vm371_vm4, %v381_v39, %v382_v43  ;;  %v591_v52 = vsel %vm579_vm5, %v589_v40, %v590_v44  ;;  %v9287_v53 = vsel %vm857_vm2, %v867_v41, %v868_v45  ;;  %v9290_v54 = vsel %vm718_vm3, %v728_v42, %v729_v46 }
  0xf0   :  { %v299_v55 = vpop.f32.mrf.mxu0  ;;  %v405_v56 = vpack.c.bf16 %v383_v51, %v380_v47  ;;  %v613_v57 = vpack.c.bf16 %v591_v52, %v588_v50  ;;  %v891_v58 = vpack.c.bf16 %v9287_v53, %v9275_v25  ;;  %v752_v59 = vpack.c.bf16 %v9290_v54, %v9278_v26 }
  0xf1   :  { %v300_v60 = vadd.f32 %v9246_v38, %v299_v55 }
  0xf2   :  { %486 = vmatmul.bf16.gmra.mxu1 %v405_v56  ;;  %694 = vmatmul.bf16.gmra.mxu3 %v613_v57 }
  0xf3   :  { %v327_v63 = vmax.f32 %v300_v60, 0.0 }
  0xf5   :  { %v870_v3 = vrot.slane %v327_v63, 4  ;;  %v731_v5 = vrot.slane %v327_v63, 3  ;;  %v384_v31 = vrot.slane %v327_v63, 1  ;;  %v592_v32 = vrot.slane %v327_v63, 2 }
  0xf8   :  { %v301_v62 = vpop.f32.mrf.mxu0 }
  0xf9   :  { %v302_v0 = vadd.f32 %v9246_v38, %v301_v62  ;;  %v8275_v62 = vld [vmem:[#allocation6 + $0x100] sm:$0xff] }
  0xfa   :  { %966 = vmatpush.bf16.msrb.mxu2 %v8275_v62  ;;  %v8535_v62 = vld [vmem:[#allocation9 + $0x7dc] sm:$0xf0] }
  0xfb   :  { %v328_v2 = vmax.f32 %v302_v0, 0.0 }
  0xfd   :  { %v871_v4 = vrot.slane %v328_v2, 4  ;;  %v732_v6 = vrot.slane %v328_v2, 3  ;;  %v385_v27 = vrot.slane %v328_v2, 1  ;;  %v593_v28 = vrot.slane %v328_v2, 2 }
  0xff   :  { %v9299_v8 = vsel %vm857_vm2, %v870_v3, %v871_v4  ;;  %v9302_v11 = vsel %vm718_vm3, %v731_v5, %v732_v6  ;;  %v386_v44 = vsel %vm371_vm4, %v384_v31, %v385_v27  ;;  %v594_v45 = vsel %vm579_vm5, %v592_v32, %v593_v28  ;;  %v8267_v6 = vld [vmem:[#allocation6 + $0xc0] sm:$0xff] }
 0x100   :  { %v304_v12 = vpop.f32.mrf.mxu0 }
 0x101   :  { %v305_v13 = vadd.f32 %v9246_v38, %v304_v12 }
 0x103   :  { %v329_v18 = vmax.f32 %v305_v13, 0.0 }
 0x105   :  { %v337_v19 = vpack.c.bf16 %v329_v18, %v327_v63  ;;  %v387_v34 = vrot.slane %v329_v18, 1  ;;  %v595_v35 = vrot.slane %v329_v18, 2  ;;  %v873_v37 = vrot.slane %v329_v18, 4  ;;  %v8269_v63 = vld [vmem:[#allocation6 + $0xd0] sm:$0xff] }
 0x106   :  { %v734_v39 = vrot.slane %v329_v18, 3  ;;  %825 = vmatpush.bf16.msrb.mxu1 %v8269_v63 }
 0x107   :  { %568 = vmatmul.bf16.gmra.mxu2 %v337_v19 }
 0x108   :  { %v306_v22 = vpop.f32.mrf.mxu0 }
 0x109   :  { %v307_v23 = vadd.f32 %v9246_v38, %v306_v22 }
 0x10a   :  { %826 = vmatpush.bf16.msrb.mxu1 %v8268_v1  ;;  %v7180_v1 = vld [vmem:[#allocation9 + $0x9c0] sm:$0xf] }
 0x10b   :  { %v330_v30 = vmax.f32 %v307_v23, 0.0 }
 0x10d   :  { %v388_v40 = vrot.slane %v330_v30, 1  ;;  %v596_v41 = vrot.slane %v330_v30, 2  ;;  %v874_v42 = vrot.slane %v330_v30, 4  ;;  %v735_v43 = vrot.slane %v330_v30, 3 }
 0x10e   :  { %827 = vmatpush.bf16.msrb.mxu1 %v8267_v6  ;;  %v8335_v6 = vld [vmem:[#allocation9 + $0x19c] sm:$0xf0] }
 0x10f   :  { %v389_v46 = vsel %vm371_vm4, %v387_v34, %v388_v40  ;;  %v597_v47 = vsel %vm579_vm5, %v595_v35, %v596_v41  ;;  %v875_v50 = vsel %vm857_vm2, %v873_v37, %v874_v42  ;;  %v9312_v51 = vsel %vm718_vm3, %v734_v39, %v735_v43 }
 0x110   :  { %v309_v52 = vpop.f32.mrf.mxu0  ;;  %v406_v55 = vpack.c.bf16 %v389_v46, %v386_v44  ;;  %v614_v56 = vpack.c.bf16 %v597_v47, %v594_v45  ;;  %v892_v57 = vpack.c.bf16 %v875_v50, %v9299_v8  ;;  %v753_v60 = vpack.c.bf16 %v9312_v51, %v9302_v11  ;;  %v6156_v51 = vld [vmem:[#allocation9 + $0x1c0] sm:$0xf] }
 0x111   :  { %v310_v0 = vadd.f32 %v9246_v38, %v309_v52  ;;  %v8343_v52 = vld [vmem:[#allocation9 + $0x1dc] sm:$0xf0] }
 0x112   :  { %491 = vmatmul.bf16.gmra.mxu1 %v406_v55  ;;  %699 = vmatmul.bf16.gmra.mxu3 %v614_v56  ;;  %v6668_v55 = vld [vmem:[#allocation9 + $0x5c0] sm:$0xf] }
 0x113   :  { %v331_v3 = vmax.f32 %v310_v0, 0.0  ;;  %v6925_v0 = vor.u32 %v8535_v62, %v6924_v61  ;;  %v6028_v61 = vld [vmem:[#allocation9 + $0xc0] sm:$0xf] }
 0x114   :  { %v8311_v62 = vld [vmem:[#allocation9 + $0xdc] sm:$0xf0] }
 0x115   :  { %v737_v7 = vrot.slane %v331_v3, 3  ;;  %v390_v23 = vrot.slane %v331_v3, 1  ;;  %v598_v27 = vrot.slane %v331_v3, 2  ;;  %v876_v44 = vrot.slane %v331_v3, 4  ;;  %4206 = vmatpush.bf16.msra.mxu1 %v6925_v0 }
 0x118   :  { %v311_v2 = vpop.f32.mrf.mxu0 }
 0x119   :  { %v312_v4 = vadd.f32 %v9246_v38, %v311_v2  ;;  %v8599_v2 = vld [vmem:[#allocation9 + $0x9dc] sm:$0xf0] }
 0x11b   :  { %v332_v5 = vmax.f32 %v312_v4, 0.0 }
 0x11d   :  { %v738_v8 = vrot.slane %v332_v5, 3  ;;  %v391_v20 = vrot.slane %v332_v5, 1  ;;  %v599_v22 = vrot.slane %v332_v5, 2  ;;  %v877_v42 = vrot.slane %v332_v5, 4  ;;  %v6124_v5 = vld [vmem:[#allocation9 + $0x180] sm:$0xf] }
 0x11f   :  { %v739_v11 = vsel %vm718_vm3, %v737_v7, %v738_v8  ;;  %v392_v33 = vsel %vm371_vm4, %v390_v23, %v391_v20  ;;  %v600_v35 = vsel %vm579_vm5, %v598_v27, %v599_v22  ;;  %v878_v9 = vsel %vm857_vm2, %v876_v44, %v877_v42  ;;  %v6636_v7 = vld [vmem:[#allocation9 + $0x580] sm:$0xf] }
 0x120   :  { %v314_v12 = vpop.f32.mrf.mxu0  ;;  %v8591_v20 = vld [vmem:[#allocation9 + $0x99c] sm:$0xf0] }
 0x121   :  { %v315_v13 = vadd.f32 %v9246_v38, %v314_v12  ;;  %v8463_v12 = vld [vmem:[#allocation9 + $0x59c] sm:$0xf0] }
 0x122   :  { %v6092_v22 = vld [vmem:[#allocation9 + $0x140] sm:$0xf] }
 0x123   :  { %v333_v16 = vmax.f32 %v315_v13, 0.0  ;;  %v6892_v13 = vld [vmem:[#allocation9 + $0x780] sm:$0xf] }
 0x124   :  { %v8327_v23 = vld [vmem:[#allocation9 + $0x15c] sm:$0xf0] }
 0x125   :  { %v338_v17 = vpack.c.bf16 %v333_v16, %v331_v3  ;;  %v393_v24 = vrot.slane %v333_v16, 1  ;;  %v601_v28 = vrot.slane %v333_v16, 2  ;;  %v740_v31 = vrot.slane %v333_v16, 3  ;;  %v8447_v42 = vld [vmem:[#allocation9 + $0x51c] sm:$0xf0] }
 0x126   :  { %v879_v43 = vrot.slane %v333_v16, 4  ;;  %v7181_v3 = vor.u32 %v8599_v2, %v7180_v1  ;;  %v8527_v16 = vld [vmem:[#allocation9 + $0x79c] sm:$0xf0]  ;;  %v6029_v1 = vor.u32 %v8311_v62, %v6028_v61 }
 0x127   :  { %573 = vmatmul.bf16.gmra.mxu2 %v338_v17  ;;  %v6637_v17 = vor.u32 %v8463_v12, %v6636_v7  ;;  %v8511_v44 = vld [vmem:[#allocation9 + $0x71c] sm:$0xf0] }
 0x128   :  { %v316_v18 = vpop.f32.mrf.mxu0  ;;  %4219 = vmatpush.bf16.msra.mxu2 %v7181_v3  ;;  %v8439_v2 = vld [vmem:[#allocation9 + $0x4dc] sm:$0xf0] }
 0x129   :  { %v317_v19 = vadd.f32 %v9246_v38, %v316_v18  ;;  %v6893_v18 = vor.u32 %v8527_v16, %v6892_v13  ;;  %v6796_v3 = vld [vmem:[#allocation9 + $0x6c0] sm:$0xf] }
 0x12a   :  { %v8567_v12 = vld [vmem:[#allocation9 + $0x8dc] sm:$0xf0] }
 0x12b   :  { %v334_v21 = vmax.f32 %v317_v19, 0.0  ;;  %v7148_v19 = vld [vmem:[#allocation9 + $0x980] sm:$0xf]  ;;  %4207 = vmatpush.bf16.msra.mxu1 %v6893_v18 }
 0x12c   :  { %v8303_v18 = vld [vmem:[#allocation9 + $0x9c] sm:$0xf0] }
 0x12d   :  { %v394_v29 = vrot.slane %v334_v21, 1  ;;  %v602_v30 = vrot.slane %v334_v21, 2  ;;  %v741_v32 = vrot.slane %v334_v21, 3  ;;  %v880_v41 = vrot.slane %v334_v21, 4  ;;  %v6444_v61 = vld [vmem:[#allocation9 + $0x400] sm:$0xf] }
 0x12e   :  { %v7149_v21 = vor.u32 %v8591_v20, %v7148_v19  ;;  %v6508_v19 = vld [vmem:[#allocation9 + $0x480] sm:$0xf] }
 0x12f   :  { %v395_v34 = vsel %vm371_vm4, %v393_v24, %v394_v29  ;;  %v603_v36 = vsel %vm579_vm5, %v601_v28, %v602_v30  ;;  %v742_v38 = vsel %vm718_vm3, %v740_v31, %v741_v32  ;;  %v881_v48 = vsel %vm857_vm2, %v879_v43, %v880_v41  ;;  %v6604_v24 = vld [vmem:[#allocation9 + $0x540] sm:$0xf] }
 0x130   :  { %v407_v37 = vpack.c.bf16 %v395_v34, %v392_v33  ;;  %v615_v39 = vpack.c.bf16 %v603_v36, %v600_v35  ;;  %v754_v40 = vpack.c.bf16 %v742_v38, %v739_v11  ;;  %v893_v49 = vpack.c.bf16 %v881_v48, %v878_v9  ;;  %4220 = vmatpush.bf16.msra.mxu2 %v7149_v21  ;;  %v8455_v29 = vld [vmem:[#allocation9 + $0x55c] sm:$0xf0] }
 0x131   :  { %v6125_v11 = vor.u32 %v8335_v6, %v6124_v5  ;;  %v6093_v28 = vor.u32 %v8327_v23, %v6092_v22  ;;  %v6860_v30 = vld [vmem:[#allocation9 + $0x740] sm:$0xf]  ;;  %v6605_v32 = vor.u32 %v8455_v29, %v6604_v24 }
 0x132   :  { %496 = vmatmul.bf16.gmra.mxu1 %v407_v37  ;;  %704 = vmatmul.bf16.gmra.mxu3 %v615_v39  ;;  %v8519_v31 = vld [vmem:[#allocation9 + $0x75c] sm:$0xf0] }
 0x133   :  { %v6861_v33 = vor.u32 %v8519_v31, %v6860_v30  ;;  %v7116_v34 = vld [vmem:[#allocation9 + $0x940] sm:$0xf] }
 0x134   :  { %v8583_v35 = vld [vmem:[#allocation9 + $0x95c] sm:$0xf0] }
 0x135   :  { %v7117_v36 = vor.u32 %v8583_v35, %v7116_v34  ;;  %4208 = vmatpush.bf16.msra.mxu1 %v6861_v33  ;;  %v6060_v37 = vld [vmem:[#allocation9 + $0x100] sm:$0xf] }
 0x136   :  { %v8319_v39 = vld [vmem:[#allocation9 + $0x11c] sm:$0xf0] }
 0x137   :  { %967 = vmatmul.bf16.vlgmr.msrb.gmra.mxu2 %v890_v14  ;;  %v6061_v41 = vor.u32 %v8319_v39, %v6060_v37  ;;  %v6828_v43 = vld [vmem:[#allocation9 + $0x700] sm:$0xf] }
 0x138   :  { %4221 = vmatpush.bf16.msra.mxu2 %v7117_v36  ;;  %v8503_v5 = vld [vmem:[#allocation9 + $0x6dc] sm:$0xf0] }
 0x139   :  { %v6797_v7 = vor.u32 %v8503_v5, %v6796_v3  ;;  %v8431_v21 = vld [vmem:[#allocation9 + $0x49c] sm:$0xf0] }
 0x13a   :  { %v6764_v22 = vld [vmem:[#allocation9 + $0x680] sm:$0xf]  ;;  %v6509_v29 = vor.u32 %v8431_v21, %v6508_v19 }
 0x13b   :  { %v8495_v23 = vld [vmem:[#allocation9 + $0x69c] sm:$0xf0] }
 0x13c   :  { %v6765_v30 = vor.u32 %v8495_v23, %v6764_v22  ;;  %v7020_v31 = vld [vmem:[#allocation9 + $0x880] sm:$0xf] }
 0x13d   :  { %v8295_v37 = vld [vmem:[#allocation9 + $0x5c] sm:$0xf0] }
 0x13e   :  { %v7948_v21 = vld [vmem:[#allocation9 + $0xfc0] sm:$0xf] }
 0x142   :  { %828 = vmatmul.bf16.vlgmr.msrb.gmra.mxu1 %v751_v15 }
 0x147   :  { %972 = vmatmul.bf16.gmra.mxu2 %v891_v58 }
 0x14a   :  { %v9341_v10 = vpop.f32.mrf.mxu2 }
 0x14f   :  { %v9343_v14 = vpop.f32.mrf.mxu1 }
 0x150   :  { %v560_v48 = vadd.f32 %v9341_v10, %v9343_v14  ;;  %v9375_v14 = vld [vmem:[#allocation7] ss:$0 sm:$0xff] }
 0x152   :  { %833 = vmatmul.bf16.gmra.mxu1 %v752_v59  ;;  %v9345_v15 = vpop.f32.mrf.mxu2 }
 0x155   :  { %v690_v8 = vpop.f32.mrf.mxu3 }
 0x157   :  { %977 = vmatmul.bf16.gmra.mxu2 %v892_v57  ;;  %v9347_v25 = vpop.f32.mrf.mxu1  ;;  %v6157_v57 = vor.u32 %v8343_v52, %v6156_v51  ;;  %v7084_v51 = vld [vmem:[#allocation9 + $0x900] sm:$0xf] }
 0x158   :  { %v8575_v52 = vld [vmem:[#allocation9 + $0x91c] sm:$0xf0]  ;;  %v562_v24 = vadd.f32 %v9345_v15, %v9347_v25 }
 0x159   :  { %4167 = vmatpush.bf16.msrb.mxu3 %v6157_v57  ;;  %v7085_v57 = vor.u32 %v8575_v52, %v7084_v51  ;;  %v8423_v15 = vld [vmem:[#allocation9 + $0x45c] sm:$0xf0] }
 0x15a   :  { %v6732_v25 = vld [vmem:[#allocation9 + $0x640] sm:$0xf] }
 0x15b   :  { %4222 = vmatpush.bf16.msra.mxu2 %v7085_v57  ;;  %v5932_v57 = vld [vmem:[#allocation9] sm:$0xf] }
 0x15d   :  { %4168 = vmatpush.bf16.msrb.mxu3 %v6125_v11  ;;  %v7052_v11 = vld [vmem:[#allocation9 + $0x8c0] sm:$0xf] }
 0x161   :  { %4169 = vmatpush.bf16.msrb.mxu3 %v6093_v28 }
 0x162   :  { %838 = vmatmul.bf16.gmra.mxu1 %v753_v60  ;;  %v8471_v60 = vld [vmem:[#allocation9 + $0x5dc] sm:$0xf0] }
 0x163   :  { %v6669_v63 = vor.u32 %v8471_v60, %v6668_v55  ;;  %v692_v55 = vpop.f32.mrf.mxu3  ;;  %v710_v60 = vadd.f32 %v690_v8, %v560_v48  ;;  %v7053_v8 = vor.u32 %v8567_v12, %v7052_v11  ;;  %v6988_v48 = vld [vmem:[#allocation9 + $0x840] sm:$0xf] }
 0x164   :  { %v711_v35 = vadd.f32 %v692_v55, %v562_v24  ;;  %v6412_v11 = vld [vmem:[#allocation9 + $0x3c0] sm:$0xf]  ;;  %v8339_v24 = vld [vmem:[#allocation9 + $0x1c4] sm:$0xf] }
 0x165   :  { %4193 = vmatpush.bf16.msrb.mxu0 %v6669_v63  ;;  %4170 = vmatpush.bf16.msrb.mxu3 %v6061_v41  ;;  %v6540_v63 = vld [vmem:[#allocation9 + $0x4c0] sm:$0xf] }
 0x166   :  { %v6541_v6 = vor.u32 %v8439_v2, %v6540_v63  ;;  %4223 = vmatpush.bf16.msra.mxu2 %v7053_v8  ;;  %v6476_v41 = vld [vmem:[#allocation9 + $0x440] sm:$0xf] }
 0x167   :  { %982 = vmatmul.bf16.gmra.mxu2 %v893_v49  ;;  %v6829_v49 = vor.u32 %v8511_v44, %v6828_v43  ;;  %v6477_v43 = vor.u32 %v8423_v15, %v6476_v41  ;;  %v8487_v44 = vld [vmem:[#allocation9 + $0x65c] sm:$0xf0]  ;;  %v8331_v15 = vld [vmem:[#allocation9 + $0x184] sm:$0xf] }
 0x168   :  { %v8415_v63 = vld [vmem:[#allocation9 + $0x41c] sm:$0xf0] }
 0x169   :  { %4194 = vmatpush.bf16.msrb.mxu0 %v6637_v17  ;;  %4209 = vmatpush.bf16.msra.mxu1 %v6829_v49  ;;  %v5996_v17 = vld [vmem:[#allocation9 + $0x80] sm:$0xf]  ;;  %v6445_v5 = vor.u32 %v8415_v63, %v6444_v61  ;;  %v6094_v63 = vld [vmem:[#allocation9 + $0x160] sm:$0xf0] }
 0x16a   :  { %v9349_v26 = vpop.f32.mrf.mxu2  ;;  %4171 = vmatpush.bf16.msrb.mxu3 %v6029_v1  ;;  %v5997_v20 = vor.u32 %v8303_v18, %v5996_v17  ;;  %v8551_v49 = vld [vmem:[#allocation9 + $0x85c] sm:$0xf0] }
 0x16b   :  { %v6989_v55 = vor.u32 %v8551_v49, %v6988_v48  ;;  %v8479_v1 = vld [vmem:[#allocation9 + $0x61c] sm:$0xf0] }
 0x16c   :  { %v8407_v8 = vld [vmem:[#allocation9 + $0x3dc] sm:$0xf0] }
 0x16d   :  { %4195 = vmatpush.bf16.msrb.mxu0 %v6605_v32  ;;  %4210 = vmatpush.bf16.msra.mxu1 %v6797_v7  ;;  %v8559_v32 = vld [vmem:[#allocation9 + $0x89c] sm:$0xf0]  ;;  %v6413_v19 = vor.u32 %v8407_v8, %v6412_v11 }
 0x16e   :  { %4172 = vmatpush.bf16.msrb.mxu3 %v5997_v20  ;;  %v7021_v34 = vor.u32 %v8559_v32, %v7020_v31  ;;  %v8543_v7 = vld [vmem:[#allocation9 + $0x81c] sm:$0xf0] }
 0x16f   :  { %v9351_v53 = vpop.f32.mrf.mxu1  ;;  %v8399_v32 = vld [vmem:[#allocation9 + $0x39c] sm:$0xf0] }
 0x170   :  { %4224 = vmatpush.bf16.msra.mxu2 %v7021_v34  ;;  %v565_v2 = vadd.f32 %v9349_v26, %v9351_v53  ;;  %v8791_v26 = vld [vmem:[#allocation9 + $0xfdc] sm:$0xf0] }
 0x171   :  { %4211 = vmatpush.bf16.msra.mxu1 %v6765_v30  ;;  %v7949_v23 = vor.u32 %v8791_v26, %v7948_v21  ;;  %v7628_v48 = vld [vmem:[#allocation9 + $0xd40] sm:$0xf] }
 0x172   :  { %843 = vmatmul.bf16.gmra.mxu1 %v754_v40  ;;  %v9353_v54 = vpop.f32.mrf.mxu2  ;;  %v6572_v40 = vld [vmem:[#allocation9 + $0x500] sm:$0xf] }
 0x173   :  { %v6573_v9 = vor.u32 %v8447_v42, %v6572_v40  ;;  %v8703_v11 = vld [vmem:[#allocation9 + $0xd1c] sm:$0xf0] }
 0x174   :  { %4225 = vmatpush.bf16.msra.mxu2 %v6989_v55  ;;  %v8711_v55 = vld [vmem:[#allocation9 + $0xd5c] sm:$0xf0] }
 0x175   :  { %4196 = vmatpush.bf16.msrb.mxu0 %v6573_v9  ;;  %v695_v33 = vpop.f32.mrf.mxu3  ;;  %v6733_v9 = vor.u32 %v8487_v44, %v6732_v25  ;;  %v6126_v25 = vld [vmem:[#allocation9 + $0x1a0] sm:$0xf0]  ;;  %v8391_v44 = vld [vmem:[#allocation9 + $0x35c] sm:$0xf0] }
 0x176   :  { %v712_v17 = vadd.f32 %v695_v33, %v565_v2  ;;  %v7660_v33 = vld [vmem:[#allocation9 + $0xd80] sm:$0xf] }
 0x177   :  { %v9355_v58 = vpop.f32.mrf.mxu1  ;;  %4212 = vmatpush.bf16.msra.mxu1 %v6733_v9  ;;  %v6284_v26 = vld [vmem:[#allocation9 + $0x2c0] sm:$0xf] }
 0x178   :  { %v567_v9 = vadd.f32 %v9353_v54, %v9355_v58  ;;  %v6316_v54 = vld [vmem:[#allocation9 + $0x300] sm:$0xf] }
 0x179   :  { %4197 = vmatpush.bf16.msrb.mxu0 %v6541_v6  ;;  %v6956_v6 = vld [vmem:[#allocation9 + $0x800] sm:$0xf] }
 0x17a   :  { %v6957_v12 = vor.u32 %v8543_v7, %v6956_v6  ;;  %v8383_v58 = vld [vmem:[#allocation9 + $0x31c] sm:$0xf0] }
 0x17b   :  { %v6317_v7 = vor.u32 %v8383_v58, %v6316_v54  ;;  %v5966_v54 = vld [vmem:[#allocation9 + $0x60] sm:$0xf0]  ;;  %v6188_v58 = vld [vmem:[#allocation9 + $0x200] sm:$0xf] }
 0x17c   :  { %4226 = vmatpush.bf16.msra.mxu2 %v6957_v12  ;;  %v7852_v12 = vld [vmem:[#allocation9 + $0xf00] sm:$0xf] }
 0x17d   :  { %4198 = vmatpush.bf16.msrb.mxu0 %v6509_v29  ;;  %v697_v53 = vpop.f32.mrf.mxu3  ;;  %v6380_v29 = vld [vmem:[#allocation9 + $0x380] sm:$0xf] }
 0x17e   :  { %v6381_v34 = vor.u32 %v8399_v32, %v6380_v29  ;;  %v8695_v29 = vld [vmem:[#allocation9 + $0xcdc] sm:$0xf0] }
 0x181   :  { %4199 = vmatpush.bf16.msrb.mxu0 %v6477_v43  ;;  %v6348_v43 = vld [vmem:[#allocation9 + $0x340] sm:$0xf] }
 0x185   :  { %4200 = vmatpush.bf16.msrb.mxu0 %v6445_v5 }
 0x18a   :  { %v9357_v59 = vpop.f32.mrf.mxu2 }
 0x18f   :  { %v9359_v45 = vpop.f32.mrf.mxu1 }
 0x192   :  { %v9361_v46 = vpop.f32.mrf.mxu2 }
 0x197   :  { %v9363_v47 = vpop.f32.mrf.mxu1 }
 0x1aa   :  { %v9365_v50 = vpop.f32.mrf.mxu2 }
 0x1af   :  { %v9367_v56 = vpop.f32.mrf.mxu1 }
 0x1b2   :  { %v9369_v4 = vpop.f32.mrf.mxu2 }
 0x1b7   :  { %v9371_v27 = vpop.f32.mrf.mxu1 }
 0x1ba   :  { %v968_v38 = vpop.f32.mrf.mxu2 }
 0x1bf   :  { %v829_v0 = vpop.f32.mrf.mxu1 }
 0x1c0   :  { %v849_v10 = vadd.f32 %v829_v0, %v710_v60  ;;  %v8287_v60 = vld [vmem:[#allocation9 + $0x1c] sm:$0xf0] }
 0x1c1   :  { %v5933_v62 = vor.u32 %v8287_v60, %v5932_v57  ;;  %v6700_v0 = vld [vmem:[#allocation9 + $0x600] sm:$0xf]  ;;  %v7629_v60 = vor.u32 %v8711_v55, %v7628_v48 }
 0x1c2   :  { %v988_v13 = vadd.f32 %v968_v38, %v849_v10  ;;  %v970_v16 = vpop.f32.mrf.mxu2  ;;  %v5964_v38 = vld [vmem:[#allocation9 + $0x40] sm:$0xf]  ;;  %v6701_v10 = vor.u32 %v8479_v1, %v6700_v0  ;;  %v713_v0 = vadd.f32 %v697_v53, %v567_v9  ;;  %v8299_v9 = vld [vmem:[#allocation9 + $0x84] sm:$0xf] }
 0x1c3   :  { %v5965_v40 = vor.u32 %v8295_v37, %v5964_v38  ;;  %v8783_v38 = vld [vmem:[#allocation9 + $0xf9c] sm:$0xf0] }
 0x1c4   :  { %v1000_v28 = vadd.f32 %v9375_v14, %v988_v13  ;;  %v7692_v13 = vld [vmem:[#allocation9 + $0xdc0] sm:$0xf]  ;;  %4213 = vmatpush.bf16.msra.mxu1 %v6701_v10 }
 0x1c5   :  { %4173 = vmatpush.bf16.msrb.mxu3 %v5965_v40  ;;  %v7884_v57 = vld [vmem:[#allocation9 + $0xf40] sm:$0xf] }
 0x1c6   :  { %v1008_v36 = vmax.f32 %v1000_v28, 0.0  ;;  %v6158_v28 = vld [vmem:[#allocation9 + $0x1e0] sm:$0xf0]  ;;  %v7596_v10 = vld [vmem:[#allocation9 + $0xd00] sm:$0xf] }
 0x1c7   :  { %v831_v39 = vpop.f32.mrf.mxu1  ;;  %v6161_v31 = vor.u32 %v8339_v24, %v6158_v28  ;;  %v7597_v8 = vor.u32 %v8703_v11, %v7596_v10  ;;  %v8375_v53 = vld [vmem:[#allocation9 + $0x2dc] sm:$0xf0] }
 0x1c8   :  { %1024 = vst [vmem:[#allocation1] ss:$9 sm:$0xff] %v1008_v36  ;;  %v850_v42 = vadd.f32 %v831_v39, %v711_v35  ;;  %4258 = vmatpush.bf16.msrb.mxu1 %v7949_v23  ;;  %v8719_v35 = vld [vmem:[#allocation9 + $0xd9c] sm:$0xf0]  ;;  %v570_v23 = vadd.f32 %v9357_v59, %v9359_v45  ;;  %v6285_v28 = vor.u32 %v8375_v53, %v6284_v26 }
 0x1c9   :  { %4174 = vmatpush.bf16.msrb.mxu3 %v5933_v62  ;;  %v7916_v36 = vld [vmem:[#allocation9 + $0xf80] sm:$0xf]  ;;  %4271 = vmatpush.bf16.msrb.mxu2 %v6161_v31  ;;  %v7661_v40 = vor.u32 %v8719_v35, %v7660_v33  ;;  %v8323_v62 = vld [vmem:[#allocation9 + $0x144] sm:$0xf] }
 0x1ca   :  { %v989_v51 = vadd.f32 %v970_v16, %v850_v42  ;;  %v973_v52 = vpop.f32.mrf.mxu2  ;;  %v8727_v16 = vld [vmem:[#allocation9 + $0xddc] sm:$0xf0]  ;;  %v7917_v41 = vor.u32 %v8783_v38, %v7916_v36  ;;  %v6129_v42 = vor.u32 %v8331_v15, %v6126_v25  ;;  %v6097_v2 = vor.u32 %v8323_v62, %v6094_v63  ;;  %v6030_v35 = vld [vmem:[#allocation9 + $0xe0] sm:$0xf0] }
 0x1cb   :  { %v7693_v20 = vor.u32 %v8727_v16, %v7692_v13  ;;  %v8767_v13 = vld [vmem:[#allocation9 + $0xf1c] sm:$0xf0]  ;;  %v8315_v16 = vld [vmem:[#allocation9 + $0x104] sm:$0xf] }
 0x1cc   :  { %v1001_v3 = vadd.f32 %v9375_v14, %v989_v51  ;;  %v6349_v51 = vor.u32 %v8391_v44, %v6348_v43  ;;  %4259 = vmatpush.bf16.msrb.mxu1 %v7917_v41  ;;  %v8759_v31 = vld [vmem:[#allocation9 + $0xedc] sm:$0xf0] }
 0x1cd   :  { %4180 = vmatpush.bf16.msra.mxu3 %v6413_v19  ;;  %4245 = vmatpush.bf16.msra.mxu0 %v7693_v20  ;;  %v7853_v19 = vor.u32 %v8767_v13, %v7852_v12  ;;  %v8367_v59 = vld [vmem:[#allocation9 + $0x29c] sm:$0xf0] }
 0x1ce   :  { %v1009_v18 = vmax.f32 %v1001_v3, 0.0  ;;  %4272 = vmatpush.bf16.msrb.mxu2 %v6129_v42  ;;  %v700_v3 = vpop.f32.mrf.mxu3  ;;  %v7532_v45 = vld [vmem:[#allocation9 + $0xc80] sm:$0xf] }
 0x1cf   :  { %v834_v22 = vpop.f32.mrf.mxu1  ;;  %v714_v36 = vadd.f32 %v700_v3, %v570_v23  ;;  %v8687_v25 = vld [vmem:[#allocation9 + $0xc9c] sm:$0xf0] }
 0x1d0   :  { %1026 = vst [vmem:[#allocation1 + $0x1] ss:$9 sm:$0xff] %v1009_v18  ;;  %v851_v30 = vadd.f32 %v834_v22, %v712_v17  ;;  %v6062_v17 = vld [vmem:[#allocation9 + $0x120] sm:$0xf0]  ;;  %v7564_v22 = vld [vmem:[#allocation9 + $0xcc0] sm:$0xf]  ;;  %v7533_v44 = vor.u32 %v8687_v25, %v7532_v45 }
 0x1d1   :  { %4181 = vmatpush.bf16.msra.mxu3 %v6381_v34  ;;  %4246 = vmatpush.bf16.msra.mxu0 %v7661_v40  ;;  %v6065_v20 = vor.u32 %v8315_v16, %v6062_v17  ;;  %v7565_v32 = vor.u32 %v8695_v29, %v7564_v22  ;;  %v8307_v34 = vld [vmem:[#allocation9 + $0xc4] sm:$0xf]  ;;  %v6252_v40 = vld [vmem:[#allocation9 + $0x280] sm:$0xf]  ;;  %v575_v29 = vadd.f32 %v9365_v50, %v9367_v56  ;;  %v9124_v25 = vmov 0  }
 0x1d2   :  { %v990_v37 = vadd.f32 %v973_v52, %v851_v30  ;;  %v975_v39 = vpop.f32.mrf.mxu2  ;;  %v8775_v52 = vld [vmem:[#allocation9 + $0xf5c] sm:$0xf0]  ;;  %4273 = vmatpush.bf16.msrb.mxu2 %v6097_v2  ;;  %v6253_v15 = vor.u32 %v8367_v59, %v6252_v40  ;;  %8875 = vset.pattern.permute.xlu0 %v9124_v25 }
 0x1d3   :  { %v7885_v61 = vor.u32 %v8775_v52, %v7884_v57  ;;  %v7820_v30 = vld [vmem:[#allocation9 + $0xec0] sm:$0xf] }
 0x1d4   :  { %v1002_v49 = vadd.f32 %v9375_v14, %v990_v37  ;;  %v7821_v33 = vor.u32 %v8759_v31, %v7820_v30  ;;  %v6033_v37 = vor.u32 %v8307_v34, %v6030_v35  ;;  %v7788_v42 = vld [vmem:[#allocation9 + $0xe80] sm:$0xf] }
 0x1d5   :  { %4182 = vmatpush.bf16.msra.mxu3 %v6349_v51  ;;  %4247 = vmatpush.bf16.msra.mxu0 %v7629_v60  ;;  %v8751_v48 = vld [vmem:[#allocation9 + $0xe9c] sm:$0xf0] }
 0x1d6   :  { %v1010_v1 = vmax.f32 %v1002_v49, 0.0  ;;  %4260 = vmatpush.bf16.msrb.mxu1 %v7885_v61  ;;  %4274 = vmatpush.bf16.msrb.mxu2 %v6065_v20  ;;  %v702_v43 = vpop.f32.mrf.mxu3  ;;  %v5998_v49 = vld [vmem:[#allocation9 + $0xa0] sm:$0xf0]  ;;  %v7789_v55 = vor.u32 %v8751_v48, %v7788_v42  ;;  %v6220_v52 = vld [vmem:[#allocation9 + $0x240] sm:$0xf] }
 0x1d7   :  { %v836_v5 = vpop.f32.mrf.mxu1  ;;  %v6001_v57 = vor.u32 %v8299_v9, %v5998_v49  ;;  %v8359_v60 = vld [vmem:[#allocation9 + $0x25c] sm:$0xf0]  ;;  %v5934_v20 = vld [vmem:[#allocation9 + $0x20] sm:$0xf0] }
 0x1d8   :  { %1028 = vst [vmem:[#allocation1 + $0x2] ss:$9 sm:$0xff] %v1010_v1  ;;  %v852_v6 = vadd.f32 %v836_v5, %v713_v0  ;;  %v7500_v61 = vld [vmem:[#allocation9 + $0xc40] sm:$0xf]  ;;  %v572_v1 = vadd.f32 %v9361_v46, %v9363_v47  ;;  %v6221_v3 = vor.u32 %v8359_v60, %v6220_v52  ;;  %v8291_v5 = vld [vmem:[#allocation9 + $0x44] sm:$0xf] }
 0x1d9   :  { %4183 = vmatpush.bf16.msra.mxu3 %v6317_v7  ;;  %4248 = vmatpush.bf16.msra.mxu0 %v7597_v8  ;;  %v8679_v62 = vld [vmem:[#allocation9 + $0xc5c] sm:$0xf0]  ;;  %v5969_v17 = vor.u32 %v8291_v5, %v5966_v54  ;;  %v6670_v48 = vld [vmem:[#allocation9 + $0x5e0] sm:$0xf0] }
 0x1da   :  { %v991_v18 = vadd.f32 %v975_v39, %v852_v6  ;;  %v978_v21 = vpop.f32.mrf.mxu2  ;;  %4261 = vmatpush.bf16.msrb.mxu1 %v7853_v19  ;;  %4275 = vmatpush.bf16.msrb.mxu2 %v6033_v37  ;;  %v7756_v63 = vld [vmem:[#allocation9 + $0xe40] sm:$0xf]  ;;  %v7501_v6 = vor.u32 %v8679_v62, %v7500_v61  ;;  %v715_v13 = vadd.f32 %v702_v43, %v572_v1  ;;  %v8283_v19 = vld [vmem:[#allocation9 + $0x4] sm:$0xf] }
 0x1db   :  { %v8743_v0 = vld [vmem:[#allocation9 + $0xe5c] sm:$0xf0]  ;;  %v577_v37 = vadd.f32 %v9369_v4, %v9371_v27  ;;  %v8531_v9 = vld [vmem:[#allocation9 + $0x7c4] sm:$0xf] }
 0x1dc   :  { %v1003_v24 = vadd.f32 %v9375_v14, %v991_v18  ;;  %v7757_v7 = vor.u32 %v8743_v0, %v7756_v63  ;;  %v8351_v11 = vld [vmem:[#allocation9 + $0x21c] sm:$0xf0]  ;;  %v6926_v49 = vld [vmem:[#allocation9 + $0x7e0] sm:$0xf0] }
 0x1dd   :  { %4184 = vmatpush.bf16.msra.mxu3 %v6285_v28  ;;  %4249 = vmatpush.bf16.msra.mxu0 %v7565_v32  ;;  %v7468_v12 = vld [vmem:[#allocation9 + $0xc00] sm:$0xf]  ;;  %v6189_v26 = vor.u32 %v8351_v11, %v6188_v58  ;;  %v5937_v28 = vor.u32 %v8283_v19, %v5934_v20  ;;  %v6929_v54 = vor.u32 %v8531_v9, %v6926_v49  ;;  %v6894_v11 = vld [vmem:[#allocation9 + $0x7a0] sm:$0xf0] }
 0x1de   :  { %v1011_v38 = vmax.f32 %v1003_v24, 0.0  ;;  %4262 = vmatpush.bf16.msrb.mxu1 %v7821_v33  ;;  %v8671_v8 = vld [vmem:[#allocation9 + $0xc1c] sm:$0xf0]  ;;  %4276 = vmatpush.bf16.msrb.mxu2 %v6001_v57  ;;  %v705_v53 = vpop.f32.mrf.mxu3  ;;  %v8451_v19 = vld [vmem:[#allocation9 + $0x544] sm:$0xf] }
 0x1df   :  { %v839_v39 = vpop.f32.mrf.mxu1  ;;  %v7724_v46 = vld [vmem:[#allocation9 + $0xe00] sm:$0xf]  ;;  %v7469_v22 = vor.u32 %v8671_v8, %v7468_v12  ;;  %v716_v31 = vadd.f32 %v705_v53, %v575_v29  ;;  %v8587_v12 = vld [vmem:[#allocation9 + $0x984] sm:$0xf] }
 0x1e0   :  { %1030 = vst [vmem:[#allocation1 + $0x3] ss:$9 sm:$0xff] %v1011_v38  ;;  %v853_v41 = vadd.f32 %v839_v39, %v714_v36  ;;  %v8735_v47 = vld [vmem:[#allocation9 + $0xe1c] sm:$0xf0]  ;;  %v7150_v8 = vld [vmem:[#allocation9 + $0x9a0] sm:$0xf0] }
 0x1e1   :  { %4185 = vmatpush.bf16.msra.mxu3 %v6253_v15  ;;  %4250 = vmatpush.bf16.msra.mxu0 %v7533_v44  ;;  %v7725_v23 = vor.u32 %v8735_v47, %v7724_v46  ;;  %v7436_v42 = vld [vmem:[#allocation9 + $0xbc0] sm:$0xf]  ;;  %v8467_v44 = vld [vmem:[#allocation9 + $0x5c4] sm:$0xf] }
 0x1e2   :  { %v992_v51 = vadd.f32 %v978_v21, %v853_v41  ;;  %v980_v10 = vpop.f32.mrf.mxu2  ;;  %4263 = vmatpush.bf16.msrb.mxu1 %v7789_v55  ;;  %4277 = vmatpush.bf16.msrb.mxu2 %v5969_v17  ;;  %v9401_v41 = vld [vmem:[%s9694_s1] sm:$0xff]  ;;  %v8663_v43 = vld [vmem:[#allocation9 + $0xbdc] sm:$0xf0]  ;;  %v7182_v55 = vld [vmem:[#allocation9 + $0x9e0] sm:$0xf0]  ;;  %v6673_v1 = vor.u32 %v8467_v44, %v6670_v48 }
 0x1e3   :  { %1579 = vperm.xlu0 %8875, %v9401_v41   ;;  %v7437_v61 = vor.u32 %v8663_v43, %v7436_v42  ;;  %v7372_v17 = vld [vmem:[#allocation9 + $0xb40] sm:$0xf]  ;;  %v6606_v20 = vld [vmem:[#allocation9 + $0x560] sm:$0xf0] }
 0x1e4   :  { %v1004_v2 = vadd.f32 %v9375_v14, %v992_v51  ;;  %v8595_v51 = vld [vmem:[#allocation9 + $0x9c4] sm:$0xf]  ;;  %v8647_v46 = vld [vmem:[#allocation9 + $0xb5c] sm:$0xf0] }
 0x1e5   :  { %4186 = vmatpush.bf16.msra.mxu3 %v6221_v3  ;;  %4251 = vmatpush.bf16.msra.mxu0 %v7501_v6  ;;  %v8655_v3 = vld [vmem:[#allocation9 + $0xb9c] sm:$0xf0]  ;;  %v7185_v58 = vor.u32 %v8595_v51, %v7182_v55  ;;  %v6638_v6 = vld [vmem:[#allocation9 + $0x5a0] sm:$0xf0] }
 0x1e6   :  { %v1012_v16 = vmax.f32 %v1004_v2, 0.0  ;;  %4264 = vmatpush.bf16.msrb.mxu1 %v7757_v7  ;;  %4278 = vmatpush.bf16.msrb.mxu2 %v5937_v28  ;;  %v707_v38 = vpop.f32.mrf.mxu3  ;;  %v7404_v2 = vld [vmem:[#allocation9 + $0xb80] sm:$0xf]  ;;  %v8523_v7 = vld [vmem:[#allocation9 + $0x784] sm:$0xf] }
 0x1e7   :  { %v841_v18 = vpop.f32.mrf.mxu1  ;;  %v717_v50 = vadd.f32 %v707_v38, %v577_v37  ;;  %v6897_v47 = vor.u32 %v8523_v7, %v6894_v11  ;;  %v8579_v53 = vld [vmem:[#allocation9 + $0x944] sm:$0xf]  ;;  %v7340_v28 = vld [vmem:[#allocation9 + $0xb00] sm:$0xf] }
 0x1e8   :  { %1032 = vst [vmem:[#allocation1 + $0x4] ss:$9 sm:$0xff] %v1012_v16  ;;  %v854_v21 = vadd.f32 %v841_v18, %v715_v13  ;;  %v7405_v13 = vor.u32 %v8655_v3, %v7404_v2  ;;  %v7153_v18 = vor.u32 %v8587_v12, %v7150_v8  ;;  %v8639_v29 = vld [vmem:[#allocation9 + $0xb1c] sm:$0xf0]  ;;  %v7086_v38 = vld [vmem:[#allocation9 + $0x920] sm:$0xf0] }
 0x1e9   :  { %4187 = vmatpush.bf16.msra.mxu3 %v6189_v26  ;;  %4252 = vmatpush.bf16.msra.mxu0 %v7469_v22  ;;  %v6862_v26 = vld [vmem:[#allocation9 + $0x760] sm:$0xf0]  ;;  %v7308_v37 = vld [vmem:[#allocation9 + $0xac0] sm:$0xf] }
 0x1ea   :  { %v993_v24 = vadd.f32 %v980_v10, %v854_v21  ;;  %4265 = vmatpush.bf16.msrb.mxu1 %v7725_v23  ;;  %v983_v33 = vpop.f32.mrf.mxu2  ;;  %v8459_v10 = vld [vmem:[#allocation9 + $0x584] sm:$0xf]  ;;  %v7373_v23 = vor.u32 %v8647_v46, %v7372_v17  ;;  %v7244_v11 = vld [vmem:[#allocation9 + $0xa40] sm:$0xf] }
 0x1eb   :  { %v6641_v16 = vor.u32 %v8459_v10, %v6638_v6  ;;  %v8515_v21 = vld [vmem:[#allocation9 + $0x744] sm:$0xf]  ;;  %v8615_v12 = vld [vmem:[#allocation9 + $0xa5c] sm:$0xf0] }
 0x1ec   :  { %v1005_v30 = vadd.f32 %v9375_v14, %v993_v24  ;;  %v7118_v22 = vld [vmem:[#allocation9 + $0x960] sm:$0xf0]  ;;  %v6609_v24 = vor.u32 %v8451_v19, %v6606_v20  ;;  %v7212_v20 = vld [vmem:[#allocation9 + $0xa00] sm:$0xf] }
 0x1ed   :  { %v6798_v42 = vld [vmem:[#allocation9 + $0x6e0] sm:$0xf0] }
 0x1ee   :  { %v1013_v32 = vmax.f32 %v1005_v30, 0.0  ;;  %v6865_v30 = vor.u32 %v8515_v21, %v6862_v26  ;;  %v8563_v44 = vld [vmem:[#allocation9 + $0x8c4] sm:$0xf]  ;;  %v8607_v21 = vld [vmem:[#allocation9 + $0xa1c] sm:$0xf0]  ;;  %v7245_v26 = vor.u32 %v8615_v12, %v7244_v11 }
 0x1ef   :  { %v844_v34 = vpop.f32.mrf.mxu1  ;;  %v7054_v48 = vld [vmem:[#allocation9 + $0x8e0] sm:$0xf0] }
 0x1f0   :  { %1034 = vst [vmem:[#allocation1 + $0x5] ss:$9 sm:$0xff] %v1013_v32  ;;  %v855_v35 = vadd.f32 %v844_v34, %v716_v31  ;;  %v7121_v31 = vor.u32 %v8579_v53, %v7118_v22  ;;  %v8443_v32 = vld [vmem:[#allocation9 + $0x504] sm:$0xf] }
 0x1f1   :  { %v8507_v34 = vld [vmem:[#allocation9 + $0x704] sm:$0xf] }
 0x1f2   :  { %v994_v36 = vadd.f32 %v983_v33, %v855_v35  ;;  %v985_v45 = vpop.f32.mrf.mxu2  ;;  %v6574_v33 = vld [vmem:[#allocation9 + $0x520] sm:$0xf0] }
 0x1f3   :  { %v6830_v35 = vld [vmem:[#allocation9 + $0x720] sm:$0xf0] }
 0x1f4   :  { %v1006_v39 = vadd.f32 %v9375_v14, %v994_v36  ;;  %v8571_v36 = vld [vmem:[#allocation9 + $0x904] sm:$0xf] }
 0x1f5   :  { %v7089_v25 = vor.u32 %v8571_v36, %v7086_v38  ;;  %v6510_v2 = vld [vmem:[#allocation9 + $0x4a0] sm:$0xf0] }
 0x1f6   :  { %v1014_v56 = vmax.f32 %v1006_v39, 0.0  ;;  %v8631_v39 = vld [vmem:[#allocation9 + $0xadc] sm:$0xf0]  ;;  %v8491_v3 = vld [vmem:[#allocation9 + $0x684] sm:$0xf] }
 0x1f7   :  { %v846_v40 = vpop.f32.mrf.mxu1  ;;  %v7309_v9 = vor.u32 %v8631_v39, %v7308_v37  ;;  %v7022_v10 = vld [vmem:[#allocation9 + $0x8a0] sm:$0xf0]  ;;  %v7213_v39 = vor.u32 %v8607_v21, %v7212_v20 }
 0x1f8   :  { %1036 = vst [vmem:[#allocation1 + $0x6] ss:$9 sm:$0xff] %v1014_v56  ;;  %v856_v59 = vadd.f32 %v846_v40, %v717_v50  ;;  %v7341_v50 = vor.u32 %v8639_v29, %v7340_v28  ;;  %v6577_v56 = vor.u32 %v8443_v32, %v6574_v33  ;;  %v8435_v40 = vld [vmem:[#allocation9 + $0x4c4] sm:$0xf] }
 0x1f9   :  { %v6478_v17 = vld [vmem:[#allocation9 + $0x460] sm:$0xf0] }
 0x1fa   :  { %v995_v15 = vadd.f32 %v985_v45, %v856_v59  ;;  %v6542_v59 = vld [vmem:[#allocation9 + $0x4e0] sm:$0xf0] }
 0x1fb   :  { %v8499_v45 = vld [vmem:[#allocation9 + $0x6c4] sm:$0xf]  ;;  %v6545_v55 = vor.u32 %v8435_v40, %v6542_v59  ;;  %v6164_v40 = vld [vmem:[#allocation9 + $0x1c8] sm:$0xf] }
 0x1fc   :  { %v1007_v4 = vadd.f32 %v9375_v14, %v995_v15  ;;  %v6833_v15 = vor.u32 %v8507_v34, %v6830_v35  ;;  %v8483_v46 = vld [vmem:[#allocation9 + $0x644] sm:$0xf]  ;;  %v9125_v35 = vmov 1   ;;  %v8344_v59 = vld [vmem:[#allocation9 + $0x1e4] sm:$0xf0] }
 0x1fd   :  { %v6990_v19 = vld [vmem:[#allocation9 + $0x860] sm:$0xf0]  ;;  %8876 = vset.pattern.permute.xlu0 %v9125_v35 }
 0x1fe   :  { %v1015_v27 = vmax.f32 %v1007_v4, 0.0  ;;  %v8411_v22 = vld [vmem:[#allocation9 + $0x404] sm:$0xf]  ;;  %5002 = vperm.xlu0 %8876, %v9401_v41  }
 0x1ff   :  { %v8475_v29 = vld [vmem:[#allocation9 + $0x604] sm:$0xf] }
 0x200   :  { %1038 = vst [vmem:[#allocation1 + $0x7] ss:$9 sm:$0xff] %v1015_v27  ;;  %v6958_v32 = vld [vmem:[#allocation9 + $0x820] sm:$0xf0] }
 0x201   :  { %v8403_v33 = vld [vmem:[#allocation9 + $0x3c4] sm:$0xf] }
 0x202   :  { %v6414_v34 = vld [vmem:[#allocation9 + $0x3e0] sm:$0xf0] }
 0x203   :  { %v8723_v36 = vld [vmem:[#allocation9 + $0xdc4] sm:$0xf] }
 0x204   :  { %v7694_v38 = vld [vmem:[#allocation9 + $0xde0] sm:$0xf0] }
 0x205   :  { %v8787_v37 = vld [vmem:[#allocation9 + $0xfc4] sm:$0xf] }
 0x206   :  { %v7662_v41 = vld [vmem:[#allocation9 + $0xda0] sm:$0xf0] }
 0x207   :  { %v1039_v57 = vld [vmem:[#allocation1] sm:$0xff]  ;;  %v1041_v52 = vld [vmem:[#allocation1 + $0x12] sm:$0xff]  ;;  %v1040_v4 = vld [vmem:[#allocation1 + $0x9] sm:$0xff] }
 0x208   :  { %v1042_v60 = vld [vmem:[#allocation1 + $0x1b] sm:$0xff]  ;;  %v9405_v62 = vpack.c.bf16 %v1039_v57, %v1039_v57  ;;  %v9407_v63 = vpack.c.bf16 %v1041_v52, %v1041_v52  ;;  %v1043_v14 = vld [vmem:[#allocation1 + $0x24] sm:$0xff]  ;;  %v9417_v49 = vpack.c.bf16 %v1040_v4, %v1040_v4  ;;  %v7697_v4 = vor.u32 %v8723_v36, %v7694_v38 }
 0x209   :  { %v9409_v0 = vpack.c.bf16 %v1042_v60, %v1042_v60  ;;  %v9411_v5 = vpack.c.bf16 %v1043_v14, %v1043_v14  ;;  %v1045_v27 = vld [vmem:[#allocation1 + $0x36] sm:$0xff]  ;;  %v1046_v43 = vld [vmem:[#allocation1 + $0x3f] sm:$0xff]  ;;  %v7057_v14 = vor.u32 %v8563_v44, %v7054_v48  ;;  %v6165_v48 = vor.u32 %v8344_v59, %v6164_v40 }
 0x20a   :  { %4175 = vmatmul.bf16.vlgmr.msrb.gmra.mxu3 %v9405_v62  ;;  %4201 = vmatmul.bf16.vlgmr.msrb.gmra.mxu0 %v9407_v63  ;;  %v9419_v51 = vpack.c.bf16 %v1045_v27, %v1045_v27  ;;  %v7276_v57 = vld [vmem:[#allocation9 + $0xa80] sm:$0xf]  ;;  %v9421_v60 = vpack.c.bf16 %v1046_v43, %v1046_v43  ;;  %v1044_v27 = vld [vmem:[#allocation1 + $0x2d] sm:$0xff]  ;;  %v6382_v43 = vld [vmem:[#allocation9 + $0x3a0] sm:$0xf0] }
 0x20b   :  { %4214 = vmatmul.bf16.vlgmr.msra.gmra.mxu1 %v9409_v0  ;;  %4227 = vmatmul.bf16.vlgmr.msra.gmra.mxu2 %v9411_v5  ;;  %v8623_v52 = vld [vmem:[#allocation9 + $0xa9c] sm:$0xf0]  ;;  %v8771_v11 = vld [vmem:[#allocation9 + $0xf44] sm:$0xf]  ;;  %v6036_v38 = vld [vmem:[#allocation9 + $0xc8] sm:$0xf] }
 0x20c   :  { %4232 = vmatpush.bf16.msrb.mxu3 %v7437_v61  ;;  %4297 = vmatpush.bf16.msrb.mxu0 %v6673_v1  ;;  %v6801_v61 = vor.u32 %v8499_v45, %v6798_v42  ;;  %v8427_v1 = vld [vmem:[#allocation9 + $0x484] sm:$0xf]  ;;  %v7277_v6 = vor.u32 %v8623_v52, %v7276_v57  ;;  %v6132_v52 = vld [vmem:[#allocation9 + $0x188] sm:$0xf] }
 0x20d   :  { %4310 = vmatpush.bf16.msra.mxu1 %v6929_v54  ;;  %4323 = vmatpush.bf16.msra.mxu2 %v7185_v58  ;;  %v6766_v54 = vld [vmem:[#allocation9 + $0x6a0] sm:$0xf0]  ;;  %v6513_v7 = vor.u32 %v8427_v1, %v6510_v2 }
 0x20e   :  { %v8555_v58 = vld [vmem:[#allocation9 + $0x884] sm:$0xf]  ;;  %v6769_v8 = vor.u32 %v8491_v3, %v6766_v54 }
 0x20f   :  { %v8395_v42 = vld [vmem:[#allocation9 + $0x384] sm:$0xf] }
 0x210   :  { %4233 = vmatpush.bf16.msrb.mxu3 %v7405_v13  ;;  %4298 = vmatpush.bf16.msrb.mxu0 %v6641_v16  ;;  %v7025_v13 = vor.u32 %v8555_v58, %v7022_v10  ;;  %v8419_v16 = vld [vmem:[#allocation9 + $0x444] sm:$0xf]  ;;  %v6385_v1 = vor.u32 %v8395_v42, %v6382_v43  ;;  %v6004_v42 = vld [vmem:[#allocation9 + $0x88] sm:$0xf] }
 0x211   :  { %4311 = vmatpush.bf16.msra.mxu1 %v6897_v47  ;;  %4324 = vmatpush.bf16.msra.mxu2 %v7153_v18  ;;  %v6734_v47 = vld [vmem:[#allocation9 + $0x660] sm:$0xf0]  ;;  %v6481_v53 = vor.u32 %v8419_v16, %v6478_v17  ;;  %v8304_v43 = vld [vmem:[#allocation9 + $0xa4] sm:$0xf0] }
 0x212   :  { %v8547_v18 = vld [vmem:[#allocation9 + $0x844] sm:$0xf] }
 0x213   :  { %v6993_v28 = vor.u32 %v8547_v18, %v6990_v19  ;;  %v7918_v57 = vld [vmem:[#allocation9 + $0xfa0] sm:$0xf0] }
 0x214   :  { %4234 = vmatpush.bf16.msrb.mxu3 %v7373_v23  ;;  %4299 = vmatpush.bf16.msrb.mxu0 %v6609_v24  ;;  %v6446_v23 = vld [vmem:[#allocation9 + $0x420] sm:$0xf0]  ;;  %v6737_v24 = vor.u32 %v8483_v46, %v6734_v47 }
 0x215   :  { %4312 = vmatpush.bf16.msra.mxu1 %v6865_v30  ;;  %4325 = vmatpush.bf16.msra.mxu2 %v7121_v31  ;;  %v6702_v30 = vld [vmem:[#allocation9 + $0x620] sm:$0xf0] }
 0x216   :  { %v8539_v31 = vld [vmem:[#allocation9 + $0x804] sm:$0xf]  ;;  %v6705_v45 = vor.u32 %v8475_v29, %v6702_v30 }
 0x217   :  { %v8387_v3 = vld [vmem:[#allocation9 + $0x344] sm:$0xf] }
 0x218   :  { %4235 = vmatpush.bf16.msrb.mxu3 %v7341_v50  ;;  %4300 = vmatpush.bf16.msrb.mxu0 %v6577_v56  ;;  %v6449_v50 = vor.u32 %v8411_v22, %v6446_v23  ;;  %v7950_v56 = vld [vmem:[#allocation9 + $0xfe0] sm:$0xf0]  ;;  %v6068_v22 = vld [vmem:[#allocation9 + $0x108] sm:$0xf] }
 0x219   :  { %4313 = vmatpush.bf16.msra.mxu1 %v6833_v15  ;;  %4326 = vmatpush.bf16.msra.mxu2 %v7089_v25  ;;  %v6961_v15 = vor.u32 %v8539_v31, %v6958_v32  ;;  %v6417_v25 = vor.u32 %v8403_v33, %v6414_v34  ;;  %v7953_v44 = vor.u32 %v8787_v37, %v7950_v56  ;;  %v6350_v54 = vld [vmem:[#allocation9 + $0x360] sm:$0xf0]  ;;  %v8320_v23 = vld [vmem:[#allocation9 + $0x124] sm:$0xf0] }
 0x21a   :  { %4188 = vmatmul.bf16.vlgmr.msra.gmra.mxu3 %v9417_v49  ;;  %4253 = vmatmul.bf16.vlgmr.msra.gmra.mxu0 %v9419_v51  ;;  %v7886_v12 = vld [vmem:[#allocation9 + $0xf60] sm:$0xf0]  ;;  %v6353_v16 = vor.u32 %v8387_v3, %v6350_v54  ;;  %v6069_v32 = vor.u32 %v8320_v23, %v6068_v22  ;;  %v8312_v37 = vld [vmem:[#allocation9 + $0xe4] sm:$0xf0] }
 0x21b   :  { %4266 = vmatmul.bf16.vlgmr.msrb.gmra.mxu1 %v9421_v60  ;;  %4279 = vmatmul.bf16.vlgmr.msrb.gmra.mxu2 %v9405_v62  ;;  %v8379_v46 = vld [vmem:[#allocation9 + $0x304] sm:$0xf]  ;;  %v7889_v18 = vor.u32 %v8771_v11, %v7886_v12  ;;  %v5972_v3 = vld [vmem:[#allocation9 + $0x48] sm:$0xf] }
 0x21c   :  { %4236 = vmatpush.bf16.msrb.mxu3 %v7309_v9  ;;  %4301 = vmatpush.bf16.msrb.mxu0 %v6545_v55  ;;  %v8715_v9 = vld [vmem:[#allocation9 + $0xd84] sm:$0xf]  ;;  %v8296_v54 = vld [vmem:[#allocation9 + $0x64] sm:$0xf0] }
 0x21d   :  { %4314 = vmatpush.bf16.msra.mxu1 %v6801_v61  ;;  %4327 = vmatpush.bf16.msra.mxu2 %v7057_v14  ;;  %v8779_v55 = vld [vmem:[#allocation9 + $0xf84] sm:$0xf]  ;;  %v8336_v61 = vld [vmem:[#allocation9 + $0x1a4] sm:$0xf0]  ;;  %v9428_v14 = vpack.c.bf16 %v1044_v27, %v1044_v27  ;;  %v7665_v2 = vor.u32 %v8715_v9, %v7662_v41 }
 0x21e   :  { %v7921_v58 = vor.u32 %v8779_v55, %v7918_v57  ;;  %v6133_v10 = vor.u32 %v8336_v61, %v6132_v52  ;;  %v6318_v47 = vld [vmem:[#allocation9 + $0x320] sm:$0xf0]  ;;  %v6005_v57 = vor.u32 %v8304_v43, %v6004_v42  ;;  %v8536_v23 = vld [vmem:[#allocation9 + $0x7e4] sm:$0xf0] }
 0x21f   :  { %v8699_v20 = vld [vmem:[#allocation9 + $0xd04] sm:$0xf]  ;;  %v6612_v42 = vld [vmem:[#allocation9 + $0x548] sm:$0xf] }
 0x220   :  { %4237 = vmatpush.bf16.msrb.mxu3 %v7277_v6  ;;  %4302 = vmatpush.bf16.msrb.mxu0 %v6513_v7  ;;  %v8707_v6 = vld [vmem:[#allocation9 + $0xd44] sm:$0xf]  ;;  %v8456_v43 = vld [vmem:[#allocation9 + $0x564] sm:$0xf0] }
 0x221   :  { %4315 = vmatpush.bf16.msra.mxu1 %v6769_v8  ;;  %4328 = vmatpush.bf16.msra.mxu2 %v7025_v13  ;;  %v7630_v7 = vld [vmem:[#allocation9 + $0xd60] sm:$0xf0]  ;;  %v6100_v8 = vld [vmem:[#allocation9 + $0x148] sm:$0xf] }
 0x222   :  { %v8328_v13 = vld [vmem:[#allocation9 + $0x164] sm:$0xf0]  ;;  %v7633_v17 = vor.u32 %v8707_v6, %v7630_v7  ;;  %v7598_v21 = vld [vmem:[#allocation9 + $0xd20] sm:$0xf0] }
 0x223   :  { %v6101_v19 = vor.u32 %v8328_v13, %v6100_v8  ;;  %v8371_v29 = vld [vmem:[#allocation9 + $0x2c4] sm:$0xf]  ;;  %v5973_v13 = vor.u32 %v8296_v54, %v5972_v3  ;;  %v6580_v3 = vld [vmem:[#allocation9 + $0x508] sm:$0xf] }
 0x224   :  { %4238 = vmatpush.bf16.msrb.mxu3 %v7245_v26  ;;  %4303 = vmatpush.bf16.msrb.mxu0 %v6481_v53  ;;  %v8763_v26 = vld [vmem:[#allocation9 + $0xf04] sm:$0xf]  ;;  %v8448_v54 = vld [vmem:[#allocation9 + $0x524] sm:$0xf0] }
 0x225   :  { %4316 = vmatpush.bf16.msra.mxu1 %v6737_v24  ;;  %4329 = vmatpush.bf16.msra.mxu2 %v6993_v28  ;;  %v7854_v53 = vld [vmem:[#allocation9 + $0xf20] sm:$0xf0]  ;;  %v6321_v24 = vor.u32 %v8379_v46, %v6318_v47  ;;  %v7601_v28 = vor.u32 %v8699_v20, %v7598_v21  ;;  %v5940_v46 = vld [vmem:[#allocation9 + $0x8] sm:$0xf] }
 0x226   :  { %v6286_v30 = vld [vmem:[#allocation9 + $0x2e0] sm:$0xf0]  ;;  %v7857_v31 = vor.u32 %v8763_v26, %v7854_v53  ;;  %v8288_v47 = vld [vmem:[#allocation9 + $0x24] sm:$0xf0] }
 0x227   :  { %v8691_v33 = vld [vmem:[#allocation9 + $0xcc4] sm:$0xf]  ;;  %v6676_v20 = vld [vmem:[#allocation9 + $0x5c8] sm:$0xf] }
 0x228   :  { %4239 = vmatpush.bf16.msrb.mxu3 %v7213_v39  ;;  %4304 = vmatpush.bf16.msrb.mxu0 %v6449_v50  ;;  %v7566_v34 = vld [vmem:[#allocation9 + $0xce0] sm:$0xf0]  ;;  %v6289_v39 = vor.u32 %v8371_v29, %v6286_v30  ;;  %v8472_v21 = vld [vmem:[#allocation9 + $0x5e4] sm:$0xf0]  ;;  %v5941_v30 = vor.u32 %v8288_v47, %v5940_v46 }
 0x229   :  { %4317 = vmatpush.bf16.msra.mxu1 %v6705_v45  ;;  %4330 = vmatpush.bf16.msra.mxu2 %v6961_v15  ;;  %v8755_v35 = vld [vmem:[#allocation9 + $0xec4] sm:$0xf]  ;;  %v7569_v50 = vor.u32 %v8691_v33, %v7566_v34  ;;  %v6037_v45 = vor.u32 %v8312_v37, %v6036_v38  ;;  %v6932_v26 = vld [vmem:[#allocation9 + $0x7c8] sm:$0xf] }
 0x22a   :  { %v7822_v36 = vld [vmem:[#allocation9 + $0xee0] sm:$0xf0]  ;;  %v6644_v38 = vld [vmem:[#allocation9 + $0x588] sm:$0xf] }
 0x22b   :  { %4240 = vmatmul.bf16.vlgmr.msrb.gmra.mxu3 %v9428_v14  ;;  %4305 = vmatmul.bf16.vlgmr.msrb.gmra.mxu0 %v9407_v63  ;;  %v8363_v56 = vld [vmem:[#allocation9 + $0x284] sm:$0xf]  ;;  %v7825_v59 = vor.u32 %v8755_v35, %v7822_v36  ;;  %v6933_v35 = vor.u32 %v8536_v23, %v6932_v26  ;;  %v8464_v37 = vld [vmem:[#allocation9 + $0x5a4] sm:$0xf0] }
 0x22c   :  { %4284 = vmatpush.bf16.msra.mxu3 %v6417_v25  ;;  %4349 = vmatpush.bf16.msra.mxu0 %v7697_v4  ;;  %v6254_v40 = vld [vmem:[#allocation9 + $0x2a0] sm:$0xf0]  ;;  %v6548_v46 = vld [vmem:[#allocation9 + $0x4c8] sm:$0xf] }
 0x22d   :  { %4362 = vmatpush.bf16.msrb.mxu1 %v7953_v44  ;;  %4375 = vmatpush.bf16.msrb.mxu2 %v6165_v48  ;;  %v8683_v15 = vld [vmem:[#allocation9 + $0xc84] sm:$0xf]  ;;  %v6257_v44 = vor.u32 %v8363_v56, %v6254_v40  ;;  %v7156_v56 = vld [vmem:[#allocation9 + $0x988] sm:$0xf] }
 0x22e   :  { %4318 = vmatmul.bf16.vlgmr.msra.gmra.mxu1 %v9409_v0  ;;  %4331 = vmatmul.bf16.vlgmr.msra.gmra.mxu2 %v9411_v5  ;;  %v7534_v25 = vld [vmem:[#allocation9 + $0xca0] sm:$0xf0]  ;;  %v8592_v40 = vld [vmem:[#allocation9 + $0x9a4] sm:$0xf0] }
 0x22f   :  { %v8747_v4 = vld [vmem:[#allocation9 + $0xe84] sm:$0xf]  ;;  %v7537_v48 = vor.u32 %v8683_v15, %v7534_v25  ;;  %v8440_v47 = vld [vmem:[#allocation9 + $0x4e4] sm:$0xf0] }
 0x230   :  { %4285 = vmatpush.bf16.msra.mxu3 %v6385_v1  ;;  %4350 = vmatpush.bf16.msra.mxu0 %v7665_v2  ;;  %v7790_v27 = vld [vmem:[#allocation9 + $0xea0] sm:$0xf0] }
 0x231   :  { %4363 = vmatpush.bf16.msrb.mxu1 %v7921_v58  ;;  %4376 = vmatpush.bf16.msrb.mxu2 %v6133_v10  ;;  %v8355_v9 = vld [vmem:[#allocation9 + $0x244] sm:$0xf]  ;;  %v7793_v55 = vor.u32 %v8747_v4, %v7790_v27  ;;  %v7157_v27 = vor.u32 %v8592_v40, %v7156_v56  ;;  %v6484_v56 = vld [vmem:[#allocation9 + $0x448] sm:$0xf] }
 0x232   :  { %v6222_v41 = vld [vmem:[#allocation9 + $0x260] sm:$0xf0]  ;;  %v8424_v40 = vld [vmem:[#allocation9 + $0x464] sm:$0xf0] }
 0x233   :  { %v8675_v52 = vld [vmem:[#allocation9 + $0xc44] sm:$0xf]  ;;  %v6225_v10 = vor.u32 %v8355_v9, %v6222_v41  ;;  %v7124_v9 = vld [vmem:[#allocation9 + $0x948] sm:$0xf] }
 0x234   :  { %4286 = vmatpush.bf16.msra.mxu3 %v6353_v16  ;;  %4351 = vmatpush.bf16.msra.mxu0 %v7633_v17  ;;  %v7502_v61 = vld [vmem:[#allocation9 + $0xc60] sm:$0xf0]  ;;  %v8584_v41 = vld [vmem:[#allocation9 + $0x964] sm:$0xf0] }
 0x235   :  { %4364 = vmatpush.bf16.msrb.mxu1 %v7889_v18  ;;  %4377 = vmatpush.bf16.msrb.mxu2 %v6101_v19  ;;  %v8739_v1 = vld [vmem:[#allocation9 + $0xe44] sm:$0xf]  ;;  %v7505_v6 = vor.u32 %v8675_v52, %v7502_v61 }
 0x236   :  { %v7758_v2 = vld [vmem:[#allocation9 + $0xe60] sm:$0xf0] }
 0x237   :  { %v8347_v58 = vld [vmem:[#allocation9 + $0x204] sm:$0xf]  ;;  %v7761_v8 = vor.u32 %v8739_v1, %v7758_v2  ;;  %v7125_v2 = vor.u32 %v8584_v41, %v7124_v9 }
 0x238   :  { %4287 = vmatpush.bf16.msra.mxu3 %v6321_v24  ;;  %4352 = vmatpush.bf16.msra.mxu0 %v7601_v28  ;;  %v6190_v7 = vld [vmem:[#allocation9 + $0x220] sm:$0xf0]  ;;  %v7188_v24 = vld [vmem:[#allocation9 + $0x9c8] sm:$0xf] }
 0x239   :  { %4365 = vmatpush.bf16.msrb.mxu1 %v7857_v31  ;;  %4378 = vmatpush.bf16.msrb.mxu2 %v6069_v32  ;;  %v8667_v11 = vld [vmem:[#allocation9 + $0xc04] sm:$0xf]  ;;  %v6193_v53 = vor.u32 %v8347_v58, %v6190_v7  ;;  %v8600_v28 = vld [vmem:[#allocation9 + $0x9e4] sm:$0xf0]  ;;  %v6677_v32 = vor.u32 %v8472_v21, %v6676_v20 }
 0x23a   :  { %v7470_v12 = vld [vmem:[#allocation9 + $0xc20] sm:$0xf0]  ;;  %v7189_v36 = vor.u32 %v8600_v28, %v7188_v24  ;;  %v6836_v58 = vld [vmem:[#allocation9 + $0x708] sm:$0xf] }
 0x23b   :  { %v8731_v16 = vld [vmem:[#allocation9 + $0xe04] sm:$0xf]  ;;  %v7473_v22 = vor.u32 %v8667_v11, %v7470_v12  ;;  %v8576_v7 = vld [vmem:[#allocation9 + $0x924] sm:$0xf0]  ;;  %v6581_v12 = vor.u32 %v8448_v54, %v6580_v3 }
 0x23c   :  { %4288 = vmatpush.bf16.msra.mxu3 %v6289_v39  ;;  %4353 = vmatpush.bf16.msra.mxu0 %v7569_v50  ;;  %v7726_v17 = vld [vmem:[#allocation9 + $0xe20] sm:$0xf0]  ;;  %v6900_v39 = vld [vmem:[#allocation9 + $0x788] sm:$0xf] }
 0x23d   :  { %4366 = vmatpush.bf16.msrb.mxu1 %v7825_v59  ;;  %4379 = vmatpush.bf16.msrb.mxu2 %v6037_v45  ;;  %v8659_v18 = vld [vmem:[#allocation9 + $0xbc4] sm:$0xf]  ;;  %v7729_v29 = vor.u32 %v8731_v16, %v7726_v17  ;;  %v8528_v50 = vld [vmem:[#allocation9 + $0x7a4] sm:$0xf0]  ;;  %v6645_v45 = vor.u32 %v8464_v37, %v6644_v38 }
 0x23e   :  { %v7438_v19 = vld [vmem:[#allocation9 + $0xbe0] sm:$0xf0]  ;;  %v6901_v4 = vor.u32 %v8528_v50, %v6900_v39  ;;  %v7060_v20 = vld [vmem:[#allocation9 + $0x8c8] sm:$0xf] }
 0x23f   :  { %v7441_v31 = vor.u32 %v8659_v18, %v7438_v19  ;;  %v8651_v33 = vld [vmem:[#allocation9 + $0xb84] sm:$0xf]  ;;  %v6804_v18 = vld [vmem:[#allocation9 + $0x6c8] sm:$0xf] }
 0x240   :  { %4289 = vmatpush.bf16.msra.mxu3 %v6257_v44  ;;  %4354 = vmatpush.bf16.msra.mxu0 %v7537_v48  ;;  %v7406_v34 = vld [vmem:[#allocation9 + $0xba0] sm:$0xf0]  ;;  %v6868_v44 = vld [vmem:[#allocation9 + $0x748] sm:$0xf] }
 0x241   :  { %4367 = vmatpush.bf16.msrb.mxu1 %v7793_v55  ;;  %4380 = vmatpush.bf16.msrb.mxu2 %v6005_v57  ;;  %v7409_v59 = vor.u32 %v8651_v33, %v7406_v34  ;;  %v8643_v15 = vld [vmem:[#allocation9 + $0xb44] sm:$0xf]  ;;  %v8520_v48 = vld [vmem:[#allocation9 + $0x764] sm:$0xf0]  ;;  %v6613_v57 = vor.u32 %v8456_v43, %v6612_v42  ;;  %v6485_v42 = vor.u32 %v8424_v40, %v6484_v56 }
 0x242   :  { %v7374_v25 = vld [vmem:[#allocation9 + $0xb60] sm:$0xf0]  ;;  %v6869_v1 = vor.u32 %v8520_v48, %v6868_v44  ;;  %v8504_v19 = vld [vmem:[#allocation9 + $0x6e4] sm:$0xf0] }
 0x243   :  { %v7377_v55 = vor.u32 %v8643_v15, %v7374_v25  ;;  %v8635_v52 = vld [vmem:[#allocation9 + $0xb04] sm:$0xf]  ;;  %v8568_v21 = vld [vmem:[#allocation9 + $0x8e4] sm:$0xf0]  ;;  %v6805_v24 = vor.u32 %v8504_v19, %v6804_v18 }
 0x244   :  { %4290 = vmatpush.bf16.msra.mxu3 %v6225_v10  ;;  %4355 = vmatpush.bf16.msra.mxu0 %v7505_v6  ;;  %v7342_v61 = vld [vmem:[#allocation9 + $0xb20] sm:$0xf0]  ;;  %v8512_v10 = vld [vmem:[#allocation9 + $0x724] sm:$0xf0]  ;;  %v7061_v28 = vor.u32 %v8568_v21, %v7060_v20 }
 0x245   :  { %4368 = vmatpush.bf16.msrb.mxu1 %v7761_v8  ;;  %4381 = vmatpush.bf16.msrb.mxu2 %v5973_v13  ;;  %v7092_v6 = vld [vmem:[#allocation9 + $0x908] sm:$0xf]  ;;  %v7345_v11 = vor.u32 %v8635_v52, %v7342_v61  ;;  %v8627_v8 = vld [vmem:[#allocation9 + $0xac4] sm:$0xf]  ;;  %v6837_v16 = vor.u32 %v8512_v10, %v6836_v58 }
 0x246   :  { %v7310_v13 = vld [vmem:[#allocation9 + $0xae0] sm:$0xf0]  ;;  %v7093_v17 = vor.u32 %v8576_v7, %v7092_v6  ;;  %v7028_v33 = vld [vmem:[#allocation9 + $0x888] sm:$0xf] }
 0x247   :  { %v7313_v26 = vor.u32 %v8627_v8, %v7310_v13  ;;  %v7278_v23 = vld [vmem:[#allocation9 + $0xaa0] sm:$0xf0]  ;;  %v8560_v34 = vld [vmem:[#allocation9 + $0x8a4] sm:$0xf0] }
 0x248   :  { %4291 = vmatpush.bf16.msra.mxu3 %v6193_v53  ;;  %4356 = vmatpush.bf16.msra.mxu0 %v7473_v22  ;;  %v6549_v53 = vor.u32 %v8440_v47, %v6548_v46  ;;  %v8619_v22 = vld [vmem:[#allocation9 + $0xa84] sm:$0xf]  ;;  %v7029_v50 = vor.u32 %v8560_v34, %v7028_v33  ;;  %v6996_v15 = vld [vmem:[#allocation9 + $0x848] sm:$0xf] }
 0x249   :  { %4369 = vmatpush.bf16.msrb.mxu1 %v7729_v29  ;;  %4382 = vmatpush.bf16.msrb.mxu2 %v5941_v30  ;;  %v6516_v29 = vld [vmem:[#allocation9 + $0x488] sm:$0xf]  ;;  %v8611_v38 = vld [vmem:[#allocation9 + $0xa44] sm:$0xf] }
 0x24a   :  { %v8432_v30 = vld [vmem:[#allocation9 + $0x4a4] sm:$0xf0]  ;;  %v7246_v37 = vld [vmem:[#allocation9 + $0xa60] sm:$0xf0] }
 0x24b   :  { %4292 = vmatmul.bf16.vlgmr.msra.gmra.mxu3 %v9417_v49  ;;  %4357 = vmatmul.bf16.vlgmr.msra.gmra.mxu0 %v9419_v51  ;;  %v8552_v25 = vld [vmem:[#allocation9 + $0x864] sm:$0xf0]  ;;  %v7214_v43 = vld [vmem:[#allocation9 + $0xa20] sm:$0xf0] }
 0x24c   :  { %4336 = vmatpush.bf16.msrb.mxu3 %v7441_v31  ;;  %4401 = vmatpush.bf16.msrb.mxu0 %v6677_v32  ;;  %v6772_v31 = vld [vmem:[#allocation9 + $0x688] sm:$0xf]  ;;  %v6997_v41 = vor.u32 %v8552_v25, %v6996_v15 }
 0x24d   :  { %4414 = vmatpush.bf16.msra.mxu1 %v6933_v35  ;;  %4427 = vmatpush.bf16.msra.mxu2 %v7189_v36  ;;  %v8496_v32 = vld [vmem:[#allocation9 + $0x6a4] sm:$0xf0]  ;;  %v7281_v35 = vor.u32 %v8619_v22, %v7278_v23  ;;  %v6517_v36 = vor.u32 %v8432_v30, %v6516_v29  ;;  %v8332_v22 = vld [vmem:[#allocation9 + $0x18c] sm:$0xf] }
 0x24e   :  { %4370 = vmatmul.bf16.vlgmr.msrb.gmra.mxu1 %v9421_v60  ;;  %4383 = vmatmul.bf16.vlgmr.msrb.gmra.mxu2 %v9405_v62  ;;  %v6773_v39 = vor.u32 %v8496_v32, %v6772_v31  ;;  %v6452_v44 = vld [vmem:[#allocation9 + $0x408] sm:$0xf]  ;;  %v6134_v23 = vld [vmem:[#allocation9 + $0x1a8] sm:$0xf0] }
 0x24f   :  { %v8416_v48 = vld [vmem:[#allocation9 + $0x424] sm:$0xf0]  ;;  %v6137_v32 = vor.u32 %v8332_v22, %v6134_v23 }
 0x250   :  { %4337 = vmatpush.bf16.msrb.mxu3 %v7409_v59  ;;  %4402 = vmatpush.bf16.msrb.mxu0 %v6645_v45  ;;  %v6740_v59 = vld [vmem:[#allocation9 + $0x648] sm:$0xf]  ;;  %v6453_v6 = vor.u32 %v8416_v48, %v6452_v44 }
 0x251   :  { %4415 = vmatpush.bf16.msra.mxu1 %v6901_v4  ;;  %4428 = vmatpush.bf16.msra.mxu2 %v7157_v27  ;;  %v8488_v45 = vld [vmem:[#allocation9 + $0x664] sm:$0xf0]  ;;  %v8603_v4 = vld [vmem:[#allocation9 + $0xa04] sm:$0xf]  ;;  %v7249_v27 = vor.u32 %v8611_v38, %v7246_v37  ;;  %v8324_v38 = vld [vmem:[#allocation9 + $0x14c] sm:$0xf] }
 0x252   :  { %v6741_v9 = vor.u32 %v8488_v45, %v6740_v59  ;;  %v6964_v52 = vld [vmem:[#allocation9 + $0x808] sm:$0xf]  ;;  %v7217_v10 = vor.u32 %v8603_v4, %v7214_v43  ;;  %v6102_v37 = vld [vmem:[#allocation9 + $0x168] sm:$0xf0] }
 0x253   :  { %v8544_v61 = vld [vmem:[#allocation9 + $0x824] sm:$0xf0]  ;;  %v6105_v45 = vor.u32 %v8324_v38, %v6102_v37  ;;  %v6070_v43 = vld [vmem:[#allocation9 + $0x128] sm:$0xf0] }
 0x254   :  { %4338 = vmatpush.bf16.msrb.mxu3 %v7377_v55  ;;  %4403 = vmatpush.bf16.msrb.mxu0 %v6613_v57  ;;  %v6708_v55 = vld [vmem:[#allocation9 + $0x608] sm:$0xf]  ;;  %v6965_v13 = vor.u32 %v8544_v61, %v6964_v52 }
 0x255   :  { %4416 = vmatpush.bf16.msra.mxu1 %v6869_v1  ;;  %4429 = vmatpush.bf16.msra.mxu2 %v7125_v2  ;;  %v8480_v57 = vld [vmem:[#allocation9 + $0x624] sm:$0xf0] }
 0x256   :  { %v6420_v1 = vld [vmem:[#allocation9 + $0x3c8] sm:$0xf]  ;;  %v6709_v8 = vor.u32 %v8480_v57, %v6708_v55 }
 0x257   :  { %v8408_v2 = vld [vmem:[#allocation9 + $0x3e4] sm:$0xf0] }
 0x258   :  { %4339 = vmatpush.bf16.msrb.mxu3 %v7345_v11  ;;  %4404 = vmatpush.bf16.msrb.mxu0 %v6581_v12  ;;  %v7700_v3 = vld [vmem:[#allocation9 + $0xdc8] sm:$0xf]  ;;  %v8340_v11 = vld [vmem:[#allocation9 + $0x1cc] sm:$0xf] }
 0x259   :  { %4417 = vmatpush.bf16.msra.mxu1 %v6837_v16  ;;  %4430 = vmatpush.bf16.msra.mxu2 %v7093_v17  ;;  %v8728_v54 = vld [vmem:[#allocation9 + $0xde4] sm:$0xf0]  ;;  %v6166_v12 = vld [vmem:[#allocation9 + $0x1e8] sm:$0xf0]  ;;  %v6421_v16 = vor.u32 %v8408_v2, %v6420_v1 }
 0x25a   :  { %v7956_v58 = vld [vmem:[#allocation9 + $0xfc8] sm:$0xf]  ;;  %v7701_v17 = vor.u32 %v8728_v54, %v7700_v3  ;;  %v6169_v19 = vor.u32 %v8340_v11, %v6166_v12  ;;  %v8308_v3 = vld [vmem:[#allocation9 + $0xcc] sm:$0xf] }
 0x25b   :  { %v8792_v7 = vld [vmem:[#allocation9 + $0xfe4] sm:$0xf0]  ;;  %v6038_v54 = vld [vmem:[#allocation9 + $0xe8] sm:$0xf0] }
 0x25c   :  { %4340 = vmatpush.bf16.msrb.mxu3 %v7313_v26  ;;  %4405 = vmatpush.bf16.msrb.mxu0 %v6549_v53  ;;  %v6388_v46 = vld [vmem:[#allocation9 + $0x388] sm:$0xf]  ;;  %v7957_v18 = vor.u32 %v8792_v7, %v7956_v58  ;;  %v6041_v12 = vor.u32 %v8308_v3, %v6038_v54  ;;  %v8460_v3 = vld [vmem:[#allocation9 + $0x58c] sm:$0xf] }
 0x25d   :  { %4418 = vmatpush.bf16.msra.mxu1 %v6805_v24  ;;  %4431 = vmatpush.bf16.msra.mxu2 %v7061_v28  ;;  %v8400_v47 = vld [vmem:[#allocation9 + $0x3a4] sm:$0xf0]  ;;  %v6646_v54 = vld [vmem:[#allocation9 + $0x5a8] sm:$0xf0] }
 0x25e   :  { %v7668_v20 = vld [vmem:[#allocation9 + $0xd88] sm:$0xf]  ;;  %v6389_v24 = vor.u32 %v8400_v47, %v6388_v46  ;;  %v8300_v46 = vld [vmem:[#allocation9 + $0x8c] sm:$0xf] }
 0x25f   :  { %v8720_v21 = vld [vmem:[#allocation9 + $0xda4] sm:$0xf0]  ;;  %v6006_v47 = vld [vmem:[#allocation9 + $0xa8] sm:$0xf0] }
 0x260   :  { %4341 = vmatpush.bf16.msrb.mxu3 %v7281_v35  ;;  %4406 = vmatpush.bf16.msrb.mxu0 %v6517_v36  ;;  %v7924_v26 = vld [vmem:[#allocation9 + $0xf88] sm:$0xf]  ;;  %v7669_v28 = vor.u32 %v8720_v21, %v7668_v20 }
 0x261   :  { %4419 = vmatpush.bf16.msra.mxu1 %v6773_v39  ;;  %4432 = vmatpush.bf16.msra.mxu2 %v7029_v50  ;;  %v8784_v53 = vld [vmem:[#allocation9 + $0xfa4] sm:$0xf0] }
 0x262   :  { %v6356_v29 = vld [vmem:[#allocation9 + $0x348] sm:$0xf]  ;;  %v7925_v31 = vor.u32 %v8784_v53, %v7924_v26  ;;  %v6009_v53 = vor.u32 %v8300_v46, %v6006_v47  ;;  %v8452_v46 = vld [vmem:[#allocation9 + $0x54c] sm:$0xf] }
 0x263   :  { %v8392_v30 = vld [vmem:[#allocation9 + $0x364] sm:$0xf0]  ;;  %v6614_v47 = vld [vmem:[#allocation9 + $0x568] sm:$0xf0] }
 0x264   :  { %4342 = vmatpush.bf16.msrb.mxu3 %v7249_v27  ;;  %4407 = vmatpush.bf16.msrb.mxu0 %v6485_v42  ;;  %v7636_v33 = vld [vmem:[#allocation9 + $0xd48] sm:$0xf]  ;;  %v6357_v39 = vor.u32 %v8392_v30, %v6356_v29  ;;  %v8316_v42 = vld [vmem:[#allocation9 + $0x10c] sm:$0xf] }
 0x265   :  { %4420 = vmatpush.bf16.msra.mxu1 %v6741_v9  ;;  %4433 = vmatpush.bf16.msra.mxu2 %v6997_v41  ;;  %v8712_v34 = vld [vmem:[#allocation9 + $0xd64] sm:$0xf0]  ;;  %v6073_v57 = vor.u32 %v8316_v42, %v6070_v43  ;;  %v8292_v29 = vld [vmem:[#allocation9 + $0x4c] sm:$0xf] }
 0x266   :  { %v7892_v35 = vld [vmem:[#allocation9 + $0xf48] sm:$0xf]  ;;  %v7637_v50 = vor.u32 %v8712_v34, %v7636_v33  ;;  %v5974_v30 = vld [vmem:[#allocation9 + $0x68] sm:$0xf0] }
 0x267   :  { %v8776_v36 = vld [vmem:[#allocation9 + $0xf64] sm:$0xf0]  ;;  %v5977_v37 = vor.u32 %v8292_v29, %v5974_v30  ;;  %v6934_v43 = vld [vmem:[#allocation9 + $0x7e8] sm:$0xf0] }
 0x268   :  { %4343 = vmatpush.bf16.msrb.mxu3 %v7217_v10  ;;  %4408 = vmatpush.bf16.msrb.mxu0 %v6453_v6  ;;  %v6324_v56 = vld [vmem:[#allocation9 + $0x308] sm:$0xf]  ;;  %v7893_v59 = vor.u32 %v8776_v36, %v7892_v35 }
 0x269   :  { %4421 = vmatpush.bf16.msra.mxu1 %v6709_v8  ;;  %4434 = vmatpush.bf16.msra.mxu2 %v6965_v13  ;;  %v8384_v40 = vld [vmem:[#allocation9 + $0x324] sm:$0xf0] }
 0x26a   :  { %v7604_v15 = vld [vmem:[#allocation9 + $0xd08] sm:$0xf]  ;;  %v6325_v44 = vor.u32 %v8384_v40, %v6324_v56  ;;  %v8284_v56 = vld [vmem:[#allocation9 + $0xc] sm:$0xf] }
 0x26b   :  { %4344 = vmatmul.bf16.vlgmr.msrb.gmra.mxu3 %v9428_v14  ;;  %4409 = vmatmul.bf16.vlgmr.msrb.gmra.mxu0 %v9407_v63  ;;  %v8704_v25 = vld [vmem:[#allocation9 + $0xd24] sm:$0xf0]  ;;  %v5942_v40 = vld [vmem:[#allocation9 + $0x28] sm:$0xf0] }
 0x26c   :  { %4388 = vmatpush.bf16.msra.mxu3 %v6421_v16  ;;  %4453 = vmatpush.bf16.msra.mxu0 %v7701_v17  ;;  %v7860_v4 = vld [vmem:[#allocation9 + $0xf08] sm:$0xf]  ;;  %v7605_v48 = vor.u32 %v8704_v25, %v7604_v15  ;;  %v8468_v15 = vld [vmem:[#allocation9 + $0x5cc] sm:$0xf] }
 0x26d   :  { %4466 = vmatpush.bf16.msrb.mxu1 %v7957_v18  ;;  %4479 = vmatpush.bf16.msrb.mxu2 %v6169_v19  ;;  %v8768_v27 = vld [vmem:[#allocation9 + $0xf24] sm:$0xf0]  ;;  %v6678_v25 = vld [vmem:[#allocation9 + $0x5e8] sm:$0xf0] }
 0x26e   :  { %4422 = vmatmul.bf16.vlgmr.msra.gmra.mxu1 %v9409_v0  ;;  %4435 = vmatmul.bf16.vlgmr.msra.gmra.mxu2 %v9411_v5  ;;  %v6292_v9 = vld [vmem:[#allocation9 + $0x2c8] sm:$0xf]  ;;  %v7861_v55 = vor.u32 %v8768_v27, %v7860_v4  ;;  %v8532_v4 = vld [vmem:[#allocation9 + $0x7cc] sm:$0xf] }
 0x26f   :  { %v8376_v41 = vld [vmem:[#allocation9 + $0x2e4] sm:$0xf0] }
 0x270   :  { %4389 = vmatpush.bf16.msra.mxu3 %v6389_v24  ;;  %4454 = vmatpush.bf16.msra.mxu0 %v7669_v28  ;;  %v7572_v52 = vld [vmem:[#allocation9 + $0xcc8] sm:$0xf]  ;;  %v6293_v58 = vor.u32 %v8376_v41, %v6292_v9  ;;  %v5945_v41 = vor.u32 %v8284_v56, %v5942_v40 }
 0x271   :  { %4467 = vmatpush.bf16.msrb.mxu1 %v7925_v31  ;;  %4480 = vmatpush.bf16.msrb.mxu2 %v6137_v32  ;;  %v8696_v61 = vld [vmem:[#allocation9 + $0xce4] sm:$0xf0] }
 0x272   :  { %v7828_v1 = vld [vmem:[#allocation9 + $0xec8] sm:$0xf]  ;;  %v7573_v10 = vor.u32 %v8696_v61, %v7572_v52 }
 0x273   :  { %v8760_v2 = vld [vmem:[#allocation9 + $0xee4] sm:$0xf0] }
 0x274   :  { %4390 = vmatpush.bf16.msra.mxu3 %v6357_v39  ;;  %4455 = vmatpush.bf16.msra.mxu0 %v7637_v50  ;;  %v6260_v6 = vld [vmem:[#allocation9 + $0x288] sm:$0xf]  ;;  %v7829_v11 = vor.u32 %v8760_v2, %v7828_v1  ;;  %v6937_v1 = vor.u32 %v8532_v4, %v6934_v43  ;;  %v7062_v43 = vld [vmem:[#allocation9 + $0x8e8] sm:$0xf0] }
 0x275   :  { %4468 = vmatpush.bf16.msrb.mxu1 %v7893_v59  ;;  %4481 = vmatpush.bf16.msrb.mxu2 %v6105_v45  ;;  %v8368_v7 = vld [vmem:[#allocation9 + $0x2a4] sm:$0xf0] }
 0x276   :  { %v7540_v8 = vld [vmem:[#allocation9 + $0xc88] sm:$0xf]  ;;  %v6261_v18 = vor.u32 %v8368_v7, %v6260_v6  ;;  %v8588_v6 = vld [vmem:[#allocation9 + $0x98c] sm:$0xf] }
 0x277   :  { %v8688_v13 = vld [vmem:[#allocation9 + $0xca4] sm:$0xf0]  ;;  %v7158_v7 = vld [vmem:[#allocation9 + $0x9a8] sm:$0xf0] }
 0x278   :  { %4391 = vmatpush.bf16.msra.mxu3 %v6325_v44  ;;  %4456 = vmatpush.bf16.msra.mxu0 %v7605_v48  ;;  %v7796_v16 = vld [vmem:[#allocation9 + $0xe88] sm:$0xf]  ;;  %v7541_v19 = vor.u32 %v8688_v13, %v7540_v8  ;;  %v8596_v44 = vld [vmem:[#allocation9 + $0x9cc] sm:$0xf] }
 0x279   :  { %4469 = vmatpush.bf16.msrb.mxu1 %v7861_v55  ;;  %4482 = vmatpush.bf16.msrb.mxu2 %v6073_v57  ;;  %v8752_v17 = vld [vmem:[#allocation9 + $0xea4] sm:$0xf0]  ;;  %v7190_v48 = vld [vmem:[#allocation9 + $0x9e8] sm:$0xf0]  ;;  %v6681_v57 = vor.u32 %v8468_v15, %v6678_v25 }
 0x27a   :  { %v6228_v20 = vld [vmem:[#allocation9 + $0x248] sm:$0xf]  ;;  %v7797_v26 = vor.u32 %v8752_v17, %v7796_v16  ;;  %v7193_v2 = vor.u32 %v8596_v44, %v7190_v48  ;;  %v7161_v17 = vor.u32 %v8588_v6, %v7158_v7  ;;  %v6550_v15 = vld [vmem:[#allocation9 + $0x4e8] sm:$0xf0] }
 0x27b   :  { %v8360_v21 = vld [vmem:[#allocation9 + $0x264] sm:$0xf0]  ;;  %v8500_v25 = vld [vmem:[#allocation9 + $0x6cc] sm:$0xf] }
 0x27c   :  { %4392 = vmatpush.bf16.msra.mxu3 %v6293_v58  ;;  %4457 = vmatpush.bf16.msra.mxu0 %v7573_v10  ;;  %v7508_v22 = vld [vmem:[#allocation9 + $0xc48] sm:$0xf]  ;;  %v6229_v32 = vor.u32 %v8360_v21, %v6228_v20  ;;  %v8524_v58 = vld [vmem:[#allocation9 + $0x78c] sm:$0xf] }
 0x27d   :  { %4470 = vmatpush.bf16.msrb.mxu1 %v7829_v11  ;;  %4483 = vmatpush.bf16.msrb.mxu2 %v6041_v12  ;;  %v8680_v23 = vld [vmem:[#allocation9 + $0xc64] sm:$0xf0]  ;;  %v6902_v10 = vld [vmem:[#allocation9 + $0x7a8] sm:$0xf0]  ;;  %v6649_v12 = vor.u32 %v8460_v3, %v6646_v54 }
 0x27e   :  { %v7764_v24 = vld [vmem:[#allocation9 + $0xe48] sm:$0xf]  ;;  %v7509_v33 = vor.u32 %v8680_v23, %v7508_v22  ;;  %v6905_v16 = vor.u32 %v8524_v58, %v6902_v10  ;;  %v8580_v20 = vld [vmem:[#allocation9 + $0x94c] sm:$0xf]  ;;  %v6617_v22 = vor.u32 %v8452_v46, %v6614_v47 }
 0x27f   :  { %v8744_v28 = vld [vmem:[#allocation9 + $0xe64] sm:$0xf0]  ;;  %v7126_v21 = vld [vmem:[#allocation9 + $0x968] sm:$0xf0] }
 0x280   :  { %v6196_v31 = vld [vmem:[#allocation9 + $0x208] sm:$0xf]  ;;  %4393 = vmatpush.bf16.msra.mxu3 %v6261_v18  ;;  %4458 = vmatpush.bf16.msra.mxu0 %v7541_v19  ;;  %v7765_v38 = vor.u32 %v8744_v28, %v7764_v24  ;;  %v8516_v18 = vld [vmem:[#allocation9 + $0x74c] sm:$0xf]  ;;  %v7129_v30 = vor.u32 %v8580_v20, %v7126_v21 }
 0x281   :  { %v8352_v34 = vld [vmem:[#allocation9 + $0x224] sm:$0xf0]  ;;  %4471 = vmatpush.bf16.msrb.mxu1 %v7797_v26  ;;  %4484 = vmatpush.bf16.msrb.mxu2 %v6009_v53  ;;  %v6870_v19 = vld [vmem:[#allocation9 + $0x768] sm:$0xf0] }
 0x282   :  { %v7476_v35 = vld [vmem:[#allocation9 + $0xc08] sm:$0xf]  ;;  %v6197_v27 = vor.u32 %v8352_v34, %v6196_v31  ;;  %v6873_v29 = vor.u32 %v8516_v18, %v6870_v19  ;;  %v8444_v31 = vld [vmem:[#allocation9 + $0x50c] sm:$0xf] }
 0x283   :  { %v8672_v36 = vld [vmem:[#allocation9 + $0xc24] sm:$0xf0]  ;;  %v6838_v34 = vld [vmem:[#allocation9 + $0x728] sm:$0xf0] }
 0x284   :  { %v7732_v39 = vld [vmem:[#allocation9 + $0xe08] sm:$0xf]  ;;  %4394 = vmatpush.bf16.msra.mxu3 %v6229_v32  ;;  %4459 = vmatpush.bf16.msra.mxu0 %v7509_v33  ;;  %v7477_v42 = vor.u32 %v8672_v36, %v7476_v35  ;;  %v6582_v32 = vld [vmem:[#allocation9 + $0x528] sm:$0xf0] }
 0x285   :  { %v8736_v50 = vld [vmem:[#allocation9 + $0xe24] sm:$0xf0]  ;;  %4472 = vmatpush.bf16.msrb.mxu1 %v7765_v38  ;;  %4485 = vmatpush.bf16.msrb.mxu2 %v5977_v37  ;;  %v8508_v33 = vld [vmem:[#allocation9 + $0x70c] sm:$0xf]  ;;  %v6585_v37 = vor.u32 %v8444_v31, %v6582_v32 }
 0x286   :  { %v7444_v59 = vld [vmem:[#allocation9 + $0xbc8] sm:$0xf]  ;;  %v7733_v9 = vor.u32 %v8736_v50, %v7732_v39  ;;  %v8572_v35 = vld [vmem:[#allocation9 + $0x90c] sm:$0xf]  ;;  %v6841_v56 = vor.u32 %v8508_v33, %v6838_v34 }
 0x287   :  { %v8664_v45 = vld [vmem:[#allocation9 + $0xbe4] sm:$0xf0]  ;;  %v9446_v26 = vpop.f32.mrf.mxu0  ;;  %v7094_v36 = vld [vmem:[#allocation9 + $0x928] sm:$0xf0] }
 0x288   :  { %v7445_v55 = vor.u32 %v8664_v45, %v7444_v59  ;;  %v7412_v52 = vld [vmem:[#allocation9 + $0xb88] sm:$0xf]  ;;  %4395 = vmatpush.bf16.msra.mxu3 %v6197_v27  ;;  %4460 = vmatpush.bf16.msra.mxu0 %v7477_v42  ;;  %v9448_v23 = vpop.f32.mrf.mxu1  ;;  %v7097_v40 = vor.u32 %v8572_v35, %v7094_v36  ;;  %v8436_v45 = vld [vmem:[#allocation9 + $0x4cc] sm:$0xf] }
 0x289   :  { %v8656_v61 = vld [vmem:[#allocation9 + $0xba4] sm:$0xf0]  ;;  %4473 = vmatpush.bf16.msrb.mxu1 %v7733_v9  ;;  %4486 = vmatpush.bf16.msrb.mxu2 %v5945_v41  ;;  %v6806_v27 = vld [vmem:[#allocation9 + $0x6e8] sm:$0xf0]  ;;  %v6553_v41 = vor.u32 %v8436_v45, %v6550_v15 }
 0x28a   :  { %v7413_v11 = vor.u32 %v8656_v61, %v7412_v52  ;;  %v7380_v8 = vld [vmem:[#allocation9 + $0xb48] sm:$0xf]  ;;  %v8564_v42 = vld [vmem:[#allocation9 + $0x8cc] sm:$0xf]  ;;  %v6809_v61 = vor.u32 %v8500_v25, %v6806_v27 }
 0x28b   :  { %v8648_v13 = vld [vmem:[#allocation9 + $0xb64] sm:$0xf0]  ;;  %4396 = vmatmul.bf16.vlgmr.msra.gmra.mxu3 %v9417_v49  ;;  %4461 = vmatmul.bf16.vlgmr.msra.gmra.mxu0 %v9419_v51  ;;  %v6518_v3 = vld [vmem:[#allocation9 + $0x4a8] sm:$0xf0] }
 0x28c   :  { %4440 = vmatpush.bf16.msrb.mxu3 %v7445_v55  ;;  %4505 = vmatpush.bf16.msrb.mxu0 %v6681_v57  ;;  %v7381_v53 = vor.u32 %v8648_v13, %v7380_v8  ;;  %v7348_v24 = vld [vmem:[#allocation9 + $0xb08] sm:$0xf]  ;;  %v8492_v54 = vld [vmem:[#allocation9 + $0x68c] sm:$0xf] }
 0x28d   :  { %4518 = vmatpush.bf16.msra.mxu1 %v6937_v1  ;;  %4531 = vmatpush.bf16.msra.mxu2 %v7193_v2  ;;  %v8640_v28 = vld [vmem:[#allocation9 + $0xb24] sm:$0xf0]  ;;  %v9450_v59 = vpop.f32.mrf.mxu3  ;;  %v7065_v1 = vor.u32 %v8564_v42, %v7062_v43  ;;  %v8428_v2 = vld [vmem:[#allocation9 + $0x48c] sm:$0xf] }
 0x28e   :  { %4474 = vmatmul.bf16.vlgmr.msrb.gmra.mxu1 %v9421_v60  ;;  %4487 = vmatmul.bf16.vlgmr.msrb.gmra.mxu2 %v9405_v62  ;;  %v7349_v38 = vor.u32 %v8640_v28, %v7348_v24  ;;  %v7316_v39 = vld [vmem:[#allocation9 + $0xac8] sm:$0xf]  ;;  %v9452_v4 = vpop.f32.mrf.mxu2  ;;  %v6774_v58 = vld [vmem:[#allocation9 + $0x6a8] sm:$0xf0] }
 0x28f   :  { %v8632_v50 = vld [vmem:[#allocation9 + $0xae4] sm:$0xf0]  ;;  %v4204_v44 = vpop.f32.mrf.mxu0  ;;  %v8556_v10 = vld [vmem:[#allocation9 + $0x88c] sm:$0xf] }
 0x290   :  { %4441 = vmatpush.bf16.msrb.mxu3 %v7413_v11  ;;  %4506 = vmatpush.bf16.msrb.mxu0 %v6649_v12  ;;  %v9454_v48 = vld [vmem:[#allocation10] ss:$2 sm:$0xff]  ;;  %v7317_v9 = vor.u32 %v8632_v50, %v7316_v39  ;;  %v4217_v55 = vpop.f32.mrf.mxu1  ;;  %v6521_v12 = vor.u32 %v8428_v2, %v6518_v3 }
 0x291   :  { %4519 = vmatpush.bf16.msra.mxu1 %v6905_v16  ;;  %4532 = vmatpush.bf16.msra.mxu2 %v7161_v17  ;;  %v7284_v57 = vld [vmem:[#allocation9 + $0xa88] sm:$0xf]  ;;  %v7030_v6 = vld [vmem:[#allocation9 + $0x8a8] sm:$0xf0]  ;;  %v1583_v7 = vperm.slane %v9454_v48, 0  ;;  %v9457_v16 = vpop.permute.xlu0 %1579  ;;  %v6777_v17 = vor.u32 %v8492_v54, %v6774_v58 }
 0x292   :  { %v8624_v52 = vld [vmem:[#allocation9 + $0xaa4] sm:$0xf0]  ;;  %v7033_v46 = vor.u32 %v8556_v10, %v7030_v6  ;;  %v8420_v18 = vld [vmem:[#allocation9 + $0x44c] sm:$0xf]  ;;  %v6172_v55 = vld [vmem:[#allocation9 + $0x1d0] sm:$0xf] }
 0x293   :  { %v7285_v11 = vor.u32 %v8624_v52, %v7284_v57  ;;  %v7252_v8 = vld [vmem:[#allocation9 + $0xa48] sm:$0xf]  ;;  %v6486_v19 = vld [vmem:[#allocation9 + $0x468] sm:$0xf0]  ;;  %v8345_v57 = vld [vmem:[#allocation9 + $0x1ec] sm:$0xf0] }
 0x294   :  { %4442 = vmatpush.bf16.msrb.mxu3 %v7381_v53  ;;  %4507 = vmatpush.bf16.msrb.mxu0 %v6617_v22  ;;  %v8616_v13 = vld [vmem:[#allocation9 + $0xa64] sm:$0xf0]  ;;  %v8484_v20 = vld [vmem:[#allocation9 + $0x64c] sm:$0xf]  ;;  %v6489_v32 = vor.u32 %v8420_v18, %v6486_v19  ;;  %v6140_v18 = vld [vmem:[#allocation9 + $0x190] sm:$0xf] }
 0x295   :  { %4520 = vmatpush.bf16.msra.mxu1 %v6873_v29  ;;  %4533 = vmatpush.bf16.msra.mxu2 %v7129_v30  ;;  %v4178_v47 = vpop.f32.mrf.mxu3  ;;  %v6742_v53 = vld [vmem:[#allocation9 + $0x668] sm:$0xf0]  ;;  %v7220_v29 = vld [vmem:[#allocation9 + $0xa08] sm:$0xf]  ;;  %v1599_v30 = vmul.f32 %v1583_v7, %v9457_v16  ;;  %v7253_v31 = vor.u32 %v8616_v13, %v7252_v8  ;;  %v6173_v7 = vor.u32 %v8345_v57, %v6172_v55  ;;  %v8337_v19 = vld [vmem:[#allocation9 + $0x1ac] sm:$0xf0] }
 0x296   :  { %v4230_v21 = vpop.f32.mrf.mxu2  ;;  %v8548_v22 = vld [vmem:[#allocation9 + $0x84c] sm:$0xf]  ;;  %v8608_v34 = vld [vmem:[#allocation9 + $0xa24] sm:$0xf0] }
 0x297   :  { %v6998_v24 = vld [vmem:[#allocation9 + $0x868] sm:$0xf0]  ;;  %v9459_v28 = vpop.f32.mrf.mxu0  ;;  %v4177_v43 = vadd.f32 %v9450_v59, %v1599_v30  ;;  %v7221_v44 = vor.u32 %v8608_v34, %v7220_v29  ;;  %v6141_v30 = vor.u32 %v8337_v19, %v6140_v18 }
 0x298   :  { %4443 = vmatpush.bf16.msrb.mxu3 %v7349_v38  ;;  %4508 = vmatpush.bf16.msrb.mxu0 %v6585_v37  ;;  %v9462_v33 = vpop.f32.mrf.mxu1  ;;  %v8412_v35 = vld [vmem:[#allocation9 + $0x40c] sm:$0xf]  ;;  %v6745_v38 = vor.u32 %v8484_v20, %v6742_v53  ;;  %v7001_v37 = vor.u32 %v8548_v22, %v6998_v24 }
 0x299   :  { %4521 = vmatpush.bf16.msra.mxu1 %v6841_v56  ;;  %4534 = vmatpush.bf16.msra.mxu2 %v7097_v40  ;;  %v6454_v36 = vld [vmem:[#allocation9 + $0x428] sm:$0xf0] }
 0x29a   :  { %v8476_v39 = vld [vmem:[#allocation9 + $0x60c] sm:$0xf] }
 0x29b   :  { %v6710_v50 = vld [vmem:[#allocation9 + $0x628] sm:$0xf0] }
 0x29c   :  { %4444 = vmatpush.bf16.msrb.mxu3 %v7317_v9  ;;  %4509 = vmatpush.bf16.msrb.mxu0 %v6553_v41  ;;  %v8540_v56 = vld [vmem:[#allocation9 + $0x80c] sm:$0xf]  ;;  %v6457_v9 = vor.u32 %v8412_v35, %v6454_v36  ;;  %v6713_v52 = vor.u32 %v8476_v39, %v6710_v50  ;;  %v6108_v35 = vld [vmem:[#allocation9 + $0x150] sm:$0xf] }
 0x29d   :  { %4522 = vmatpush.bf16.msra.mxu1 %v6809_v61  ;;  %4535 = vmatpush.bf16.msra.mxu2 %v7065_v1  ;;  %v6966_v40 = vld [vmem:[#allocation9 + $0x828] sm:$0xf0]  ;;  %v4189_v1 = vpop.f32.mrf.mxu3  ;;  %v8329_v36 = vld [vmem:[#allocation9 + $0x16c] sm:$0xf0] }
 0x29e   :  { %v8404_v45 = vld [vmem:[#allocation9 + $0x3cc] sm:$0xf]  ;;  %v6969_v61 = vor.u32 %v8540_v56, %v6966_v40  ;;  %v4190_v54 = vadd.f32 %v4189_v1, %v4177_v43  ;;  %v9465_v58 = vpop.f32.mrf.mxu2  ;;  %v6076_v43 = vld [vmem:[#allocation9 + $0x110] sm:$0xf] }
 0x29f   :  { %v6422_v15 = vld [vmem:[#allocation9 + $0x3e8] sm:$0xf0] }
 0x2a0   :  { %4445 = vmatpush.bf16.msrb.mxu3 %v7285_v11  ;;  %4510 = vmatpush.bf16.msrb.mxu0 %v6521_v12  ;;  %v8724_v25 = vld [vmem:[#allocation9 + $0xdcc] sm:$0xf]  ;;  %v6425_v2 = vor.u32 %v8404_v45, %v6422_v15  ;;  %v4256_v11 = vpop.f32.mrf.mxu0  ;;  %v6109_v15 = vor.u32 %v8329_v36, %v6108_v35 }
 0x2a1   :  { %4523 = vmatpush.bf16.msra.mxu1 %v6777_v17  ;;  %4536 = vmatpush.bf16.msra.mxu2 %v7033_v46  ;;  %v7702_v27 = vld [vmem:[#allocation9 + $0xde8] sm:$0xf0]  ;;  %v4203_v17 = vadd.f32 %v9446_v26, %v4190_v54  ;;  %v4269_v46 = vpop.f32.mrf.mxu1 }
 0x2a2   :  { %v8788_v42 = vld [vmem:[#allocation9 + $0xfcc] sm:$0xf]  ;;  %v7705_v3 = vor.u32 %v8724_v25, %v7702_v27 }
 0x2a3   :  { %v7958_v41 = vld [vmem:[#allocation9 + $0xfe8] sm:$0xf0]  ;;  %v4216_v24 = vadd.f32 %v9448_v23, %v4203_v17 }
 0x2a4   :  { %4446 = vmatpush.bf16.msrb.mxu3 %v7253_v31  ;;  %4511 = vmatpush.bf16.msrb.mxu0 %v6489_v32  ;;  %v8396_v10 = vld [vmem:[#allocation9 + $0x38c] sm:$0xf]  ;;  %v7961_v59 = vor.u32 %v8788_v42, %v7958_v41 }
 0x2a5   :  { %4524 = vmatpush.bf16.msra.mxu1 %v6745_v38  ;;  %4537 = vmatpush.bf16.msra.mxu2 %v7001_v37  ;;  %v6390_v6 = vld [vmem:[#allocation9 + $0x3a8] sm:$0xf0]  ;;  %v4229_v38 = vadd.f32 %v9452_v4, %v4216_v24  ;;  %v4191_v23 = vpop.f32.mrf.mxu3  ;;  %v6012_v24 = vld [vmem:[#allocation9 + $0x90] sm:$0xf] }
 0x2a6   :  { %v8716_v12 = vld [vmem:[#allocation9 + $0xd8c] sm:$0xf]  ;;  %v6393_v20 = vor.u32 %v8396_v10, %v6390_v6  ;;  %v4282_v50 = vpop.f32.mrf.mxu2 }
 0x2a7   :  { %v7670_v8 = vld [vmem:[#allocation9 + $0xda8] sm:$0xf0] }
 0x2a8   :  { %v8780_v13 = vld [vmem:[#allocation9 + $0xf8c] sm:$0xf]  ;;  %4447 = vmatpush.bf16.msrb.mxu3 %v7221_v44  ;;  %4512 = vmatpush.bf16.msrb.mxu0 %v6457_v9  ;;  %v7673_v21 = vor.u32 %v8716_v12, %v7670_v8  ;;  %v8321_v44 = vld [vmem:[#allocation9 + $0x12c] sm:$0xf0]  ;;  %v9474_v9 = vpop.f32.mrf.mxu0 }
 0x2a9   :  { %v7926_v47 = vld [vmem:[#allocation9 + $0xfa8] sm:$0xf0]  ;;  %4525 = vmatpush.bf16.msra.mxu1 %v6713_v52  ;;  %4538 = vmatpush.bf16.msra.mxu2 %v6969_v61 }
 0x2aa   :  { %v8388_v53 = vld [vmem:[#allocation9 + $0x34c] sm:$0xf]  ;;  %v7929_v29 = vor.u32 %v8780_v13, %v7926_v47 }
 0x2ab   :  { %v6358_v22 = vld [vmem:[#allocation9 + $0x368] sm:$0xf0]  ;;  %4448 = vmatmul.bf16.vlgmr.msrb.gmra.mxu3 %v9428_v14  ;;  %4513 = vmatmul.bf16.vlgmr.msrb.gmra.mxu0 %v9407_v63  ;;  %v9476_v41 = vpop.f32.mrf.mxu1 }
 0x2ac   :  { %4492 = vmatpush.bf16.msra.mxu3 %v6425_v2  ;;  %4557 = vmatpush.bf16.msra.mxu0 %v7705_v3  ;;  %v8708_v31 = vld [vmem:[#allocation9 + $0xd4c] sm:$0xf]  ;;  %v6361_v37 = vor.u32 %v8388_v53, %v6358_v22  ;;  %v6077_v2 = vor.u32 %v8321_v44, %v6076_v43 }
 0x2ad   :  { %4570 = vmatpush.bf16.msrb.mxu1 %v7961_v59  ;;  %4583 = vmatpush.bf16.msrb.mxu2 %v6173_v7  ;;  %v7638_v26 = vld [vmem:[#allocation9 + $0xd68] sm:$0xf0]  ;;  %v6044_v59 = vld [vmem:[#allocation9 + $0xd0] sm:$0xf] }
 0x2ae   :  { %v8772_v32 = vld [vmem:[#allocation9 + $0xf4c] sm:$0xf]  ;;  %4526 = vmatmul.bf16.vlgmr.msra.gmra.mxu1 %v9409_v0  ;;  %4539 = vmatmul.bf16.vlgmr.msra.gmra.mxu2 %v9411_v5  ;;  %v7641_v39 = vor.u32 %v8708_v31, %v7638_v26  ;;  %v8313_v7 = vld [vmem:[#allocation9 + $0xec] sm:$0xf0]  ;;  %v4241_v47 = vpop.f32.mrf.mxu3 }
 0x2af   :  { %v7894_v34 = vld [vmem:[#allocation9 + $0xf68] sm:$0xf0]  ;;  %v6045_v46 = vor.u32 %v8313_v7, %v6044_v59  ;;  %v6940_v59 = vld [vmem:[#allocation9 + $0x7d0] sm:$0xf] }
 0x2b0   :  { %4493 = vmatpush.bf16.msra.mxu3 %v6393_v20  ;;  %4558 = vmatpush.bf16.msra.mxu0 %v7673_v21  ;;  %v8380_v56 = vld [vmem:[#allocation9 + $0x30c] sm:$0xf]  ;;  %v7897_v45 = vor.u32 %v8772_v32, %v7894_v34  ;;  %v4242_v21 = vadd.f32 %v4241_v47, %v4229_v38 }
 0x2b1   :  { %v6326_v40 = vld [vmem:[#allocation9 + $0x328] sm:$0xf0]  ;;  %4571 = vmatpush.bf16.msrb.mxu1 %v7929_v29  ;;  %4584 = vmatpush.bf16.msrb.mxu2 %v6141_v30  ;;  %v9478_v53 = vpop.f32.mrf.mxu2  ;;  %v8305_v29 = vld [vmem:[#allocation9 + $0xac] sm:$0xf0]  ;;  %v4308_v30 = vpop.f32.mrf.mxu0 }
 0x2b2   :  { %v8700_v25 = vld [vmem:[#allocation9 + $0xd0c] sm:$0xf]  ;;  %v6329_v55 = vor.u32 %v8380_v56, %v6326_v40  ;;  %v4255_v31 = vadd.f32 %v9459_v28, %v4242_v21  ;;  %v6908_v30 = vld [vmem:[#allocation9 + $0x790] sm:$0xf] }
 0x2b3   :  { %v7606_v27 = vld [vmem:[#allocation9 + $0xd28] sm:$0xf0]  ;;  %v4321_v26 = vpop.f32.mrf.mxu1 }
 0x2b4   :  { %v8764_v42 = vld [vmem:[#allocation9 + $0xf0c] sm:$0xf]  ;;  %4494 = vmatpush.bf16.msra.mxu3 %v6361_v37  ;;  %4559 = vmatpush.bf16.msra.mxu0 %v7641_v39  ;;  %v7609_v57 = vor.u32 %v8700_v25, %v7606_v27  ;;  %v6013_v37 = vor.u32 %v8305_v29, %v6012_v24  ;;  %v9482_v56 = vadd.f32 %v9462_v33, %v4255_v31  ;;  %v5948_v33 = vld [vmem:[#allocation9 + $0x10] sm:$0xf] }
 0x2b5   :  { %v7862_v4 = vld [vmem:[#allocation9 + $0xf28] sm:$0xf0]  ;;  %4572 = vmatpush.bf16.msrb.mxu1 %v7897_v45  ;;  %4585 = vmatpush.bf16.msrb.mxu2 %v6109_v15  ;;  %v5980_v45 = vld [vmem:[#allocation9 + $0x50] sm:$0xf] }
 0x2b6   :  { %v8372_v52 = vld [vmem:[#allocation9 + $0x2cc] sm:$0xf]  ;;  %v7865_v1 = vor.u32 %v8764_v42, %v7862_v4  ;;  %v8297_v15 = vld [vmem:[#allocation9 + $0x6c] sm:$0xf0] }
 0x2b7   :  { %v6294_v61 = vld [vmem:[#allocation9 + $0x2e8] sm:$0xf0]  ;;  %v6652_v24 = vld [vmem:[#allocation9 + $0x590] sm:$0xf] }
 0x2b8   :  { %v8692_v3 = vld [vmem:[#allocation9 + $0xccc] sm:$0xf]  ;;  %4495 = vmatpush.bf16.msra.mxu3 %v6329_v55  ;;  %4560 = vmatpush.bf16.msra.mxu0 %v7609_v57  ;;  %v6297_v11 = vor.u32 %v8372_v52, %v6294_v61  ;;  %v5981_v55 = vor.u32 %v8297_v15, %v5980_v45  ;;  %v4243_v57 = vpop.f32.mrf.mxu3  ;;  %v8465_v29 = vld [vmem:[#allocation9 + $0x5ac] sm:$0xf0] }
 0x2b9   :  { %v7574_v54 = vld [vmem:[#allocation9 + $0xce8] sm:$0xf0]  ;;  %4573 = vmatpush.bf16.msrb.mxu1 %v7865_v1  ;;  %4586 = vmatpush.bf16.msrb.mxu2 %v6077_v2  ;;  %v4334_v1 = vpop.f32.mrf.mxu2  ;;  %v8289_v2 = vld [vmem:[#allocation9 + $0x2c] sm:$0xf0] }
 0x2ba   :  { %v8756_v10 = vld [vmem:[#allocation9 + $0xecc] sm:$0xf]  ;;  %v7577_v12 = vor.u32 %v8692_v3, %v7574_v54  ;;  %v8529_v31 = vld [vmem:[#allocation9 + $0x7ac] sm:$0xf0] }
 0x2bb   :  { %v7830_v6 = vld [vmem:[#allocation9 + $0xee8] sm:$0xf0]  ;;  %v7164_v26 = vld [vmem:[#allocation9 + $0x990] sm:$0xf] }
 0x2bc   :  { %v8364_v8 = vld [vmem:[#allocation9 + $0x28c] sm:$0xf]  ;;  %v7833_v17 = vor.u32 %v8756_v10, %v7830_v6  ;;  %4496 = vmatpush.bf16.msra.mxu3 %v6297_v11  ;;  %4561 = vmatpush.bf16.msra.mxu0 %v7577_v12  ;;  %v6684_v10 = vld [vmem:[#allocation9 + $0x5d0] sm:$0xf] }
 0x2bd   :  { %v6262_v13 = vld [vmem:[#allocation9 + $0x2a8] sm:$0xf0]  ;;  %4587 = vmatpush.bf16.msrb.mxu2 %v6045_v46  ;;  %v8473_v6 = vld [vmem:[#allocation9 + $0x5ec] sm:$0xf0]  ;;  %v5949_v46 = vor.u32 %v8289_v2, %v5948_v33 }
 0x2be   :  { %v8684_v18 = vld [vmem:[#allocation9 + $0xc8c] sm:$0xf]  ;;  %v6265_v32 = vor.u32 %v8364_v8, %v6262_v13  ;;  %4574 = vmatpush.bf16.msrb.mxu1 %v7833_v17  ;;  %v8537_v12 = vld [vmem:[#allocation9 + $0x7ec] sm:$0xf0] }
 0x2bf   :  { %v7542_v19 = vld [vmem:[#allocation9 + $0xca8] sm:$0xf0]  ;;  %v7196_v8 = vld [vmem:[#allocation9 + $0x9d0] sm:$0xf]  ;;  %v6941_v21 = vor.u32 %v8537_v12, %v6940_v59 }
 0x2c0   :  { %v8748_v20 = vld [vmem:[#allocation9 + $0xe8c] sm:$0xf]  ;;  %v7545_v34 = vor.u32 %v8684_v18, %v7542_v19  ;;  %4497 = vmatpush.bf16.msra.mxu3 %v6265_v32  ;;  %v8601_v13 = vld [vmem:[#allocation9 + $0x9ec] sm:$0xf0]  ;;  %v6685_v18 = vor.u32 %v8473_v6, %v6684_v10 }
 0x2c1   :  { %v7798_v22 = vld [vmem:[#allocation9 + $0xea8] sm:$0xf0]  ;;  %4588 = vmatpush.bf16.msrb.mxu2 %v6013_v37  ;;  %v8593_v32 = vld [vmem:[#allocation9 + $0x9ac] sm:$0xf0]  ;;  %v6909_v37 = vor.u32 %v8529_v31, %v6908_v30 }
 0x2c2   :  { %v8356_v35 = vld [vmem:[#allocation9 + $0x24c] sm:$0xf]  ;;  %v7801_v23 = vor.u32 %v8748_v20, %v7798_v22  ;;  %4562 = vmatpush.bf16.msra.mxu0 %v7545_v34  ;;  %v7197_v22 = vor.u32 %v8601_v13, %v7196_v8  ;;  %v8521_v45 = vld [vmem:[#allocation9 + $0x76c] sm:$0xf0] }
 0x2c3   :  { %v6230_v36 = vld [vmem:[#allocation9 + $0x268] sm:$0xf0]  ;;  %v7132_v15 = vld [vmem:[#allocation9 + $0x950] sm:$0xf] }
 0x2c4   :  { %v8676_v38 = vld [vmem:[#allocation9 + $0xc4c] sm:$0xf]  ;;  %v6233_v28 = vor.u32 %v8356_v35, %v6230_v36  ;;  %4575 = vmatpush.bf16.msrb.mxu1 %v7801_v23  ;;  %v6653_v35 = vor.u32 %v8465_v29, %v6652_v24  ;;  %v6588_v57 = vld [vmem:[#allocation9 + $0x510] sm:$0xf] }
 0x2c5   :  { %v7510_v39 = vld [vmem:[#allocation9 + $0xc68] sm:$0xf0]  ;;  %4589 = vmatpush.bf16.msrb.mxu2 %v5981_v55  ;;  %v8513_v33 = vld [vmem:[#allocation9 + $0x72c] sm:$0xf0] }
 0x2c6   :  { %v8740_v50 = vld [vmem:[#allocation9 + $0xe4c] sm:$0xf]  ;;  %v7513_v27 = vor.u32 %v8676_v38, %v7510_v39  ;;  %4498 = vmatpush.bf16.msra.mxu3 %v6233_v28  ;;  %v7165_v38 = vor.u32 %v8593_v32, %v7164_v26  ;;  %v6620_v39 = vld [vmem:[#allocation9 + $0x550] sm:$0xf]  ;;  %v1584_v28 = vperm.slane %v9454_v48, 1 }
 0x2c7   :  { %v7766_v40 = vld [vmem:[#allocation9 + $0xe68] sm:$0xf0]  ;;  %v7100_v1 = vld [vmem:[#allocation9 + $0x910] sm:$0xf] }
 0x2c8   :  { %v8348_v25 = vld [vmem:[#allocation9 + $0x20c] sm:$0xf]  ;;  %v7769_v44 = vor.u32 %v8740_v50, %v7766_v40  ;;  %4563 = vmatpush.bf16.msra.mxu0 %v7513_v27  ;;  %v8457_v50 = vld [vmem:[#allocation9 + $0x56c] sm:$0xf0]  ;;  %v1600_v48 = vmul.f32 %v1584_v28, %v9457_v16 }
 0x2c9   :  { %v6198_v42 = vld [vmem:[#allocation9 + $0x228] sm:$0xf0]  ;;  %4590 = vmatpush.bf16.msrb.mxu2 %v5949_v46  ;;  %v6876_v40 = vld [vmem:[#allocation9 + $0x750] sm:$0xf] }
 0x2ca   :  { %v8668_v4 = vld [vmem:[#allocation9 + $0xc0c] sm:$0xf]  ;;  %v6201_v7 = vor.u32 %v8348_v25, %v6198_v42  ;;  %4576 = vmatpush.bf16.msrb.mxu1 %v7769_v44  ;;  %v8585_v25 = vld [vmem:[#allocation9 + $0x96c] sm:$0xf0]  ;;  %v6621_v42 = vor.u32 %v8457_v50, %v6620_v39  ;;  %v6877_v44 = vor.u32 %v8521_v45, %v6876_v40 }
 0x2cb   :  { %v7478_v43 = vld [vmem:[#allocation9 + $0xc28] sm:$0xf0]  ;;  %v7133_v55 = vor.u32 %v8585_v25, %v7132_v15  ;;  %v8577_v2 = vld [vmem:[#allocation9 + $0x92c] sm:$0xf0] }
 0x2cc   :  { %v8732_v52 = vld [vmem:[#allocation9 + $0xe0c] sm:$0xf]  ;;  %v7481_v11 = vor.u32 %v8668_v4, %v7478_v43  ;;  %4499 = vmatpush.bf16.msra.mxu3 %v6201_v7  ;;  %4591 = vmatmul.bf16.vlgmr.msrb.gmra.mxu2 %v9405_v62  ;;  %v7101_v12 = vor.u32 %v8577_v2, %v7100_v1  ;;  %v6556_v8 = vld [vmem:[#allocation9 + $0x4d0] sm:$0xf] }
 0x2cd   :  { %v7734_v61 = vld [vmem:[#allocation9 + $0xe28] sm:$0xf0]  ;;  %4635 = vmatpush.bf16.msra.mxu2 %v7197_v22  ;;  %v8441_v13 = vld [vmem:[#allocation9 + $0x4ec] sm:$0xf0] }
 0x2ce   :  { %v8660_v3 = vld [vmem:[#allocation9 + $0xbcc] sm:$0xf]  ;;  %v7737_v17 = vor.u32 %v8732_v52, %v7734_v61  ;;  %4564 = vmatpush.bf16.msra.mxu0 %v7481_v11  ;;  %v8449_v52 = vld [vmem:[#allocation9 + $0x52c] sm:$0xf0]  ;;  %v4293_v31 = vpop.f32.mrf.mxu3 }
 0x2cf   :  { %v7446_v54 = vld [vmem:[#allocation9 + $0xbe8] sm:$0xf0]  ;;  %4500 = vmatmul.bf16.vlgmr.msra.gmra.mxu3 %v9417_v49  ;;  %v6844_v61 = vld [vmem:[#allocation9 + $0x710] sm:$0xf]  ;;  %v6589_v6 = vor.u32 %v8449_v52, %v6588_v57 }
 0x2d0   :  { %v7449_v47 = vor.u32 %v8660_v3, %v7446_v54  ;;  %v8652_v19 = vld [vmem:[#allocation9 + $0xb8c] sm:$0xf]  ;;  %4577 = vmatpush.bf16.msrb.mxu1 %v7737_v17  ;;  %v9489_v3 = vpop.f32.mrf.mxu0  ;;  %v9492_v54 = vpop.f32.mrf.mxu1  ;;  %v6845_v11 = vor.u32 %v8513_v33, %v6844_v61  ;;  %v6812_v17 = vld [vmem:[#allocation9 + $0x6d0] sm:$0xf] }
 0x2d1   :  { %v7414_v20 = vld [vmem:[#allocation9 + $0xba8] sm:$0xf0]  ;;  %4565 = vmatmul.bf16.vlgmr.msra.gmra.mxu0 %v9419_v51  ;;  %4636 = vmatpush.bf16.msra.mxu2 %v7165_v38  ;;  %v8505_v46 = vld [vmem:[#allocation9 + $0x6ec] sm:$0xf0] }
 0x2d2   :  { %4544 = vmatpush.bf16.msrb.mxu3 %v7449_v47  ;;  %4609 = vmatpush.bf16.msrb.mxu0 %v6685_v18  ;;  %v7417_v34 = vor.u32 %v8652_v19, %v7414_v20  ;;  %v8644_v36 = vld [vmem:[#allocation9 + $0xb4c] sm:$0xf]  ;;  %v7068_v47 = vld [vmem:[#allocation9 + $0x8d0] sm:$0xf]  ;;  %v4281_v19 = vadd.f32 %v9465_v58, %v1600_v48  ;;  %v6813_v29 = vor.u32 %v8505_v46, %v6812_v17 }
 0x2d3   :  { %v7382_v23 = vld [vmem:[#allocation9 + $0xb68] sm:$0xf0]  ;;  %4578 = vmatmul.bf16.vlgmr.msrb.gmra.mxu1 %v9421_v60  ;;  %v8569_v18 = vld [vmem:[#allocation9 + $0x8ec] sm:$0xf0] }
 0x2d4   :  { %4622 = vmatpush.bf16.msra.mxu1 %v6941_v21  ;;  %v7385_v27 = vor.u32 %v8644_v36, %v7382_v23  ;;  %v8636_v4 = vld [vmem:[#allocation9 + $0xb0c] sm:$0xf]  ;;  %v6557_v21 = vor.u32 %v8441_v13, %v6556_v8  ;;  %v7069_v30 = vor.u32 %v8569_v18, %v7068_v47  ;;  %v6524_v26 = vld [vmem:[#allocation9 + $0x490] sm:$0xf]  ;;  %v9495_v36 = vpop.f32.mrf.mxu2 }
 0x2d5   :  { %v7350_v43 = vld [vmem:[#allocation9 + $0xb28] sm:$0xf0]  ;;  %4637 = vmatpush.bf16.msra.mxu2 %v7133_v55  ;;  %v8433_v32 = vld [vmem:[#allocation9 + $0x4ac] sm:$0xf0] }
 0x2d6   :  { %4545 = vmatpush.bf16.msrb.mxu3 %v7417_v34  ;;  %4610 = vmatpush.bf16.msrb.mxu0 %v6653_v35  ;;  %v7353_v10 = vor.u32 %v8636_v4, %v7350_v43  ;;  %v8628_v59 = vld [vmem:[#allocation9 + $0xacc] sm:$0xf]  ;;  %v6780_v34 = vld [vmem:[#allocation9 + $0x690] sm:$0xf]  ;;  %v4294_v35 = vadd.f32 %v4293_v31, %v4281_v19  ;;  %v6525_v45 = vor.u32 %v8433_v32, %v6524_v26 }
 0x2d7   :  { %v7318_v7 = vld [vmem:[#allocation9 + $0xae8] sm:$0xf0]  ;;  %v8497_v23 = vld [vmem:[#allocation9 + $0x6ac] sm:$0xf0] }
 0x2d8   :  { %4623 = vmatpush.bf16.msra.mxu1 %v6909_v37  ;;  %v7321_v20 = vor.u32 %v8628_v59, %v7318_v7  ;;  %v8620_v22 = vld [vmem:[#allocation9 + $0xa8c] sm:$0xf]  ;;  %v7036_v37 = vld [vmem:[#allocation9 + $0x890] sm:$0xf]  ;;  %v4360_v38 = vpop.f32.mrf.mxu0  ;;  %v4307_v39 = vadd.f32 %v9474_v9, %v4294_v35  ;;  %v4373_v50 = vpop.f32.mrf.mxu1  ;;  %v6781_v28 = vor.u32 %v8497_v23, %v6780_v34 }
 0x2d9   :  { %v7286_v24 = vld [vmem:[#allocation9 + $0xaa8] sm:$0xf0]  ;;  %4638 = vmatpush.bf16.msra.mxu2 %v7101_v12  ;;  %v8561_v58 = vld [vmem:[#allocation9 + $0x8ac] sm:$0xf0]  ;;  %v4295_v7 = vpop.f32.mrf.mxu3  ;;  %v8333_v50 = vld [vmem:[#allocation9 + $0x194] sm:$0xf] }
 0x2da   :  { %4546 = vmatpush.bf16.msrb.mxu3 %v7385_v27  ;;  %4611 = vmatpush.bf16.msrb.mxu0 %v6621_v42  ;;  %v7289_v40 = vor.u32 %v8620_v22, %v7286_v24  ;;  %v8612_v15 = vld [vmem:[#allocation9 + $0xa4c] sm:$0xf]  ;;  %v7037_v27 = vor.u32 %v8561_v58, %v7036_v37  ;;  %v6492_v42 = vld [vmem:[#allocation9 + $0x450] sm:$0xf]  ;;  %v4320_v52 = vadd.f32 %v9476_v41, %v4307_v39  ;;  %v8341_v22 = vld [vmem:[#allocation9 + $0x1d4] sm:$0xf] }
 0x2db   :  { %v7254_v25 = vld [vmem:[#allocation9 + $0xa68] sm:$0xf0]  ;;  %v8425_v4 = vld [vmem:[#allocation9 + $0x46c] sm:$0xf0]  ;;  %v6174_v24 = vld [vmem:[#allocation9 + $0x1f0] sm:$0xf0] }
 0x2dc   :  { %4624 = vmatpush.bf16.msra.mxu1 %v6877_v44  ;;  %v6748_v43 = vld [vmem:[#allocation9 + $0x650] sm:$0xf]  ;;  %v8604_v61 = vld [vmem:[#allocation9 + $0xa0c] sm:$0xf]  ;;  %v7257_v9 = vor.u32 %v8612_v15, %v7254_v25  ;;  %v6493_v33 = vor.u32 %v8425_v4, %v6492_v42  ;;  %v4386_v41 = vpop.f32.mrf.mxu2  ;;  %v6177_v23 = vor.u32 %v8341_v22, %v6174_v24 }
 0x2dd   :  { %4639 = vmatpush.bf16.msra.mxu2 %v7069_v30  ;;  %v8489_v44 = vld [vmem:[#allocation9 + $0x66c] sm:$0xf0]  ;;  %v7222_v1 = vld [vmem:[#allocation9 + $0xa28] sm:$0xf0] }
 0x2de   :  { %4547 = vmatpush.bf16.msrb.mxu3 %v7353_v10  ;;  %4612 = vmatpush.bf16.msrb.mxu0 %v6589_v6  ;;  %v7004_v55 = vld [vmem:[#allocation9 + $0x850] sm:$0xf]  ;;  %v9500_v10 = vadd.f32 %v9478_v53, %v4320_v52  ;;  %v6749_v6 = vor.u32 %v8489_v44, %v6748_v43  ;;  %v6110_v52 = vld [vmem:[#allocation9 + $0x170] sm:$0xf0] }
 0x2df   :  { %v8553_v57 = vld [vmem:[#allocation9 + $0x86c] sm:$0xf0] }
 0x2e0   :  { %4625 = vmatpush.bf16.msra.mxu1 %v6845_v11  ;;  %v6460_v2 = vld [vmem:[#allocation9 + $0x410] sm:$0xf]  ;;  %v7005_v59 = vor.u32 %v8553_v57, %v7004_v55  ;;  %v8325_v57 = vld [vmem:[#allocation9 + $0x154] sm:$0xf] }
 0x2e1   :  { %v8417_v48 = vld [vmem:[#allocation9 + $0x42c] sm:$0xf0]  ;;  %4640 = vmatpush.bf16.msra.mxu2 %v7037_v27 }
 0x2e2   :  { %4548 = vmatpush.bf16.msrb.mxu3 %v7321_v20  ;;  %4613 = vmatpush.bf16.msrb.mxu0 %v6557_v21  ;;  %v6716_v11 = vld [vmem:[#allocation9 + $0x610] sm:$0xf]  ;;  %v7225_v20 = vor.u32 %v8604_v61, %v7222_v1  ;;  %v6461_v53 = vor.u32 %v8417_v48, %v6460_v2  ;;  %v6113_v48 = vor.u32 %v8325_v57, %v6110_v52 }
 0x2e3   :  { %v8481_v12 = vld [vmem:[#allocation9 + $0x62c] sm:$0xf0] }
 0x2e4   :  { %4626 = vmatpush.bf16.msra.mxu1 %v6813_v29  ;;  %v6972_v8 = vld [vmem:[#allocation9 + $0x810] sm:$0xf]  ;;  %v6717_v29 = vor.u32 %v8481_v12, %v6716_v11  ;;  %v8317_v12 = vld [vmem:[#allocation9 + $0x114] sm:$0xf] }
 0x2e5   :  { %v8545_v13 = vld [vmem:[#allocation9 + $0x82c] sm:$0xf0]  ;;  %4641 = vmatpush.bf16.msra.mxu2 %v7005_v59 }
 0x2e6   :  { %4549 = vmatpush.bf16.msrb.mxu3 %v7289_v40  ;;  %4614 = vmatpush.bf16.msrb.mxu0 %v6525_v45  ;;  %v6428_v17 = vld [vmem:[#allocation9 + $0x3d0] sm:$0xf]  ;;  %v6973_v30 = vor.u32 %v8545_v13, %v6972_v8  ;;  %v6142_v40 = vld [vmem:[#allocation9 + $0x1b0] sm:$0xf0] }
 0x2e7   :  { %v8409_v46 = vld [vmem:[#allocation9 + $0x3ec] sm:$0xf0]  ;;  %v6145_v42 = vor.u32 %v8333_v50, %v6142_v40  ;;  %v6078_v8 = vld [vmem:[#allocation9 + $0x130] sm:$0xf0] }
 0x2e8   :  { %4627 = vmatpush.bf16.msra.mxu1 %v6781_v28  ;;  %v7708_v47 = vld [vmem:[#allocation9 + $0xdd0] sm:$0xf]  ;;  %v6429_v31 = vor.u32 %v8409_v46, %v6428_v17  ;;  %v9506_v41 = vpop.f32.mrf.mxu0 }
 0x2e9   :  { %v8729_v18 = vld [vmem:[#allocation9 + $0xdec] sm:$0xf0]  ;;  %4642 = vmatpush.bf16.msra.mxu2 %v6973_v30  ;;  %v6046_v30 = vld [vmem:[#allocation9 + $0xf0] sm:$0xf0] }
 0x2ea   :  { %v7964_v19 = vld [vmem:[#allocation9 + $0xfd0] sm:$0xf]  ;;  %4550 = vmatpush.bf16.msrb.mxu3 %v7257_v9  ;;  %4615 = vmatpush.bf16.msrb.mxu0 %v6493_v33  ;;  %v7709_v26 = vor.u32 %v8729_v18, %v7708_v47 }
 0x2eb   :  { %v8793_v21 = vld [vmem:[#allocation9 + $0xfec] sm:$0xf0]  ;;  %v9508_v13 = vpop.f32.mrf.mxu1 }
 0x2ec   :  { %4628 = vmatpush.bf16.msra.mxu1 %v6749_v6  ;;  %v6396_v32 = vld [vmem:[#allocation9 + $0x390] sm:$0xf]  ;;  %v7965_v35 = vor.u32 %v8793_v21, %v7964_v19  ;;  %4643 = vmatmul.bf16.vlgmr.msra.gmra.mxu2 %v9411_v5 }
 0x2ed   :  { %v8401_v34 = vld [vmem:[#allocation9 + $0x3ac] sm:$0xf0]  ;;  %4687 = vmatpush.bf16.msrb.mxu2 %v6177_v23 }
 0x2ee   :  { %v7676_v37 = vld [vmem:[#allocation9 + $0xd90] sm:$0xf]  ;;  %4551 = vmatpush.bf16.msrb.mxu3 %v7225_v20  ;;  %4616 = vmatpush.bf16.msrb.mxu0 %v6461_v53  ;;  %v6397_v45 = vor.u32 %v8401_v34, %v6396_v32  ;;  %v6081_v20 = vor.u32 %v8317_v12, %v6078_v8 }
 0x2ef   :  { %v8721_v58 = vld [vmem:[#allocation9 + $0xdac] sm:$0xf0] }
 0x2f0   :  { %v7932_v38 = vld [vmem:[#allocation9 + $0xf90] sm:$0xf]  ;;  %4629 = vmatpush.bf16.msra.mxu1 %v6717_v29  ;;  %v7677_v15 = vor.u32 %v8721_v58, %v7676_v37  ;;  %v8309_v29 = vld [vmem:[#allocation9 + $0xd4] sm:$0xf]  ;;  %v4345_v37 = vpop.f32.mrf.mxu3 }
 0x2f1   :  { %v8785_v39 = vld [vmem:[#allocation9 + $0xfac] sm:$0xf0]  ;;  %4552 = vmatmul.bf16.vlgmr.msrb.gmra.mxu3 %v9428_v14  ;;  %4617 = vmatmul.bf16.vlgmr.msrb.gmra.mxu0 %v9407_v63  ;;  %v6049_v23 = vor.u32 %v8309_v29, %v6046_v30  ;;  %v4346_v50 = vadd.f32 %v4345_v37, %v9500_v10  ;;  %v9511_v40 = vpop.f32.mrf.mxu2  ;;  %v8533_v29 = vld [vmem:[#allocation9 + $0x7d4] sm:$0xf] }
 0x2f2   :  { %4596 = vmatpush.bf16.msra.mxu3 %v6429_v31  ;;  %4661 = vmatpush.bf16.msra.mxu0 %v7709_v26  ;;  %v6364_v25 = vld [vmem:[#allocation9 + $0x350] sm:$0xf]  ;;  %v7933_v27 = vor.u32 %v8785_v39, %v7932_v38 }
 0x2f3   :  { %v8393_v28 = vld [vmem:[#allocation9 + $0x36c] sm:$0xf0]  ;;  %4630 = vmatmul.bf16.vlgmr.msra.gmra.mxu1 %v9409_v0  ;;  %4688 = vmatpush.bf16.msrb.mxu2 %v6145_v42  ;;  %v4425_v42 = vpop.f32.mrf.mxu1 }
 0x2f4   :  { %4674 = vmatpush.bf16.msrb.mxu1 %v7965_v35  ;;  %v7644_v4 = vld [vmem:[#allocation9 + $0xd50] sm:$0xf]  ;;  %v6365_v61 = vor.u32 %v8393_v28, %v6364_v25  ;;  %v6014_v25 = vld [vmem:[#allocation9 + $0xb0] sm:$0xf0]  ;;  %v4412_v28 = vpop.f32.mrf.mxu0 }
 0x2f5   :  { %v8713_v43 = vld [vmem:[#allocation9 + $0xd6c] sm:$0xf0]  ;;  %v8525_v28 = vld [vmem:[#allocation9 + $0x794] sm:$0xf] }
 0x2f6   :  { %v7900_v44 = vld [vmem:[#allocation9 + $0xf50] sm:$0xf]  ;;  %4597 = vmatpush.bf16.msra.mxu3 %v6397_v45  ;;  %4662 = vmatpush.bf16.msra.mxu0 %v7677_v15  ;;  %v7645_v9 = vor.u32 %v8713_v43, %v7644_v4  ;;  %v8301_v15 = vld [vmem:[#allocation9 + $0x94] sm:$0xf] }
 0x2f7   :  { %v8777_v55 = vld [vmem:[#allocation9 + $0xf6c] sm:$0xf0]  ;;  %4689 = vmatpush.bf16.msrb.mxu2 %v6113_v48  ;;  %v6017_v52 = vor.u32 %v8301_v15, %v6014_v25  ;;  %v5982_v48 = vld [vmem:[#allocation9 + $0x70] sm:$0xf0] }
 0x2f8   :  { %v6332_v33 = vld [vmem:[#allocation9 + $0x310] sm:$0xf]  ;;  %4675 = vmatpush.bf16.msrb.mxu1 %v7933_v27  ;;  %v7901_v2 = vor.u32 %v8777_v55, %v7900_v44  ;;  %v4359_v27 = vadd.f32 %v9489_v3, %v4346_v50  ;;  %v8461_v15 = vld [vmem:[#allocation9 + $0x594] sm:$0xf] }
 0x2f9   :  { %v8385_v1 = vld [vmem:[#allocation9 + $0x32c] sm:$0xf0]  ;;  %v6654_v25 = vld [vmem:[#allocation9 + $0x5b0] sm:$0xf0] }
 0x2fa   :  { %v7612_v6 = vld [vmem:[#allocation9 + $0xd10] sm:$0xf]  ;;  %4598 = vmatpush.bf16.msra.mxu3 %v6365_v61  ;;  %4663 = vmatpush.bf16.msra.mxu0 %v7645_v9  ;;  %v6333_v17 = vor.u32 %v8385_v1, %v6332_v33  ;;  %v9515_v33 = vadd.f32 %v9492_v54, %v4359_v27  ;;  %v8285_v54 = vld [vmem:[#allocation9 + $0x14] sm:$0xf] }
 0x2fb   :  { %v8705_v59 = vld [vmem:[#allocation9 + $0xd2c] sm:$0xf0]  ;;  %4690 = vmatpush.bf16.msrb.mxu2 %v6081_v20  ;;  %v5950_v20 = vld [vmem:[#allocation9 + $0x30] sm:$0xf0] }
 0x2fc   :  { %v7868_v7 = vld [vmem:[#allocation9 + $0xf10] sm:$0xf]  ;;  %v7613_v46 = vor.u32 %v8705_v59, %v7612_v6  ;;  %4676 = vmatpush.bf16.msrb.mxu1 %v7901_v2  ;;  %v8293_v2 = vld [vmem:[#allocation9 + $0x54] sm:$0xf] }
 0x2fd   :  { %v8769_v11 = vld [vmem:[#allocation9 + $0xf2c] sm:$0xf0]  ;;  %v6910_v27 = vld [vmem:[#allocation9 + $0x7b0] sm:$0xf0] }
 0x2fe   :  { %v6300_v47 = vld [vmem:[#allocation9 + $0x2d0] sm:$0xf]  ;;  %v7869_v19 = vor.u32 %v8769_v11, %v7868_v7  ;;  %4599 = vmatpush.bf16.msra.mxu3 %v6333_v17  ;;  %4664 = vmatpush.bf16.msra.mxu0 %v7613_v46  ;;  %v5985_v17 = vor.u32 %v8293_v2, %v5982_v48  ;;  %v4347_v46 = vpop.f32.mrf.mxu3  ;;  %v8589_v42 = vld [vmem:[#allocation9 + $0x994] sm:$0xf] }
 0x2ff   :  { %v8377_v18 = vld [vmem:[#allocation9 + $0x2ec] sm:$0xf0]  ;;  %4691 = vmatpush.bf16.msrb.mxu2 %v6049_v23  ;;  %v5953_v23 = vor.u32 %v8285_v54, %v5950_v20  ;;  %v6878_v2 = vld [vmem:[#allocation9 + $0x770] sm:$0xf0] }
 0x300   :  { %v7580_v53 = vld [vmem:[#allocation9 + $0xcd0] sm:$0xf]  ;;  %v6301_v31 = vor.u32 %v8377_v18, %v6300_v47  ;;  %4677 = vmatpush.bf16.msrb.mxu1 %v7869_v19  ;;  %v4438_v19 = vpop.f32.mrf.mxu2  ;;  %v8581_v48 = vld [vmem:[#allocation9 + $0x954] sm:$0xf] }
 0x301   :  { %v8697_v21 = vld [vmem:[#allocation9 + $0xcec] sm:$0xf0]  ;;  %v8509_v54 = vld [vmem:[#allocation9 + $0x714] sm:$0xf] }
 0x302   :  { %v7836_v22 = vld [vmem:[#allocation9 + $0xed0] sm:$0xf]  ;;  %v7581_v26 = vor.u32 %v8697_v21, %v7580_v53  ;;  %4600 = vmatpush.bf16.msra.mxu3 %v6301_v31  ;;  %v6846_v19 = vld [vmem:[#allocation9 + $0x730] sm:$0xf0] }
 0x303   :  { %v8761_v24 = vld [vmem:[#allocation9 + $0xeec] sm:$0xf0]  ;;  %4692 = vmatpush.bf16.msrb.mxu2 %v6017_v52  ;;  %v6913_v52 = vor.u32 %v8525_v28, %v6910_v27  ;;  %v8573_v20 = vld [vmem:[#allocation9 + $0x914] sm:$0xf] }
 0x304   :  { %v6268_v32 = vld [vmem:[#allocation9 + $0x290] sm:$0xf]  ;;  %v7837_v35 = vor.u32 %v8761_v24, %v7836_v22  ;;  %4665 = vmatpush.bf16.msra.mxu0 %v7581_v26  ;;  %v8469_v22 = vld [vmem:[#allocation9 + $0x5d4] sm:$0xf] }
 0x305   :  { %v8369_v34 = vld [vmem:[#allocation9 + $0x2ac] sm:$0xf0]  ;;  %v6686_v24 = vld [vmem:[#allocation9 + $0x5f0] sm:$0xf0] }
 0x306   :  { %v7548_v58 = vld [vmem:[#allocation9 + $0xc90] sm:$0xf]  ;;  %v6269_v4 = vor.u32 %v8369_v34, %v6268_v32  ;;  %4678 = vmatpush.bf16.msrb.mxu1 %v7837_v35  ;;  %v6942_v26 = vld [vmem:[#allocation9 + $0x7f0] sm:$0xf0] }
 0x307   :  { %v8689_v38 = vld [vmem:[#allocation9 + $0xcac] sm:$0xf0]  ;;  %v8597_v32 = vld [vmem:[#allocation9 + $0x9d4] sm:$0xf]  ;;  %4693 = vmatpush.bf16.msrb.mxu2 %v5985_v17  ;;  %v6945_v50 = vor.u32 %v8533_v29, %v6942_v26 }
 0x308   :  { %v7804_v39 = vld [vmem:[#allocation9 + $0xe90] sm:$0xf]  ;;  %v7549_v43 = vor.u32 %v8689_v38, %v7548_v58  ;;  %4601 = vmatpush.bf16.msra.mxu3 %v6269_v4  ;;  %v7198_v34 = vld [vmem:[#allocation9 + $0x9f0] sm:$0xf0]  ;;  %v6689_v58 = vor.u32 %v8469_v22, %v6686_v24 }
 0x309   :  { %v8753_v45 = vld [vmem:[#allocation9 + $0xeac] sm:$0xf0]  ;;  %v7166_v4 = vld [vmem:[#allocation9 + $0x9b0] sm:$0xf0] }
 0x30a   :  { %v6236_v44 = vld [vmem:[#allocation9 + $0x250] sm:$0xf]  ;;  %v7805_v57 = vor.u32 %v8753_v45, %v7804_v39  ;;  %4666 = vmatpush.bf16.msra.mxu0 %v7549_v43  ;;  %v7201_v45 = vor.u32 %v8597_v32, %v7198_v34  ;;  %v6849_v32 = vor.u32 %v8509_v54, %v6846_v19  ;;  %v7006_v54 = vld [vmem:[#allocation9 + $0x870] sm:$0xf0] }
 0x30b   :  { %v8361_v55 = vld [vmem:[#allocation9 + $0x26c] sm:$0xf0]  ;;  %4694 = vmatpush.bf16.msrb.mxu2 %v5953_v23  ;;  %v9527_v24 = vpop.f32.mrf.mxu1  ;;  %v6558_v23 = vld [vmem:[#allocation9 + $0x4f0] sm:$0xf0] }
 0x30c   :  { %v7516_v10 = vld [vmem:[#allocation9 + $0xc50] sm:$0xf]  ;;  %v6237_v3 = vor.u32 %v8361_v55, %v6236_v44  ;;  %4679 = vmatpush.bf16.msrb.mxu1 %v7805_v57  ;;  %v6657_v44 = vor.u32 %v8461_v15, %v6654_v25 }
 0x30d   :  { %v8681_v61 = vld [vmem:[#allocation9 + $0xc6c] sm:$0xf0] }
 0x30e   :  { %v7772_v9 = vld [vmem:[#allocation9 + $0xe50] sm:$0xf]  ;;  %v7517_v59 = vor.u32 %v8681_v61, %v7516_v10  ;;  %4602 = vmatpush.bf16.msra.mxu3 %v6237_v3  ;;  %v7169_v10 = vor.u32 %v8589_v42, %v7166_v4  ;;  %v8453_v61 = vld [vmem:[#allocation9 + $0x554] sm:$0xf]  ;;  %4695 = vmatmul.bf16.vlgmr.msrb.gmra.mxu2 %v9405_v62  ;;  %v9521_v3 = vld [vmem:[#allocation10] ss:$2 sm:$0xff]  ;;  %v4397_v4 = vpop.f32.mrf.mxu3 }
 0x30f   :  { %v8745_v1 = vld [vmem:[#allocation9 + $0xe6c] sm:$0xf0]  ;;  %4739 = vmatpush.bf16.msra.mxu2 %v7201_v45 }
 0x310   :  { %v6204_v6 = vld [vmem:[#allocation9 + $0x210] sm:$0xf]  ;;  %v7773_v8 = vor.u32 %v8745_v1, %v7772_v9  ;;  %4667 = vmatpush.bf16.msra.mxu0 %v7517_v59  ;;  %v6622_v9 = vld [vmem:[#allocation9 + $0x570] sm:$0xf0]  ;;  %v1585_v59 = vperm.slane %v9521_v3, 2 }
 0x311   :  { %v8353_v7 = vld [vmem:[#allocation9 + $0x22c] sm:$0xf0]  ;;  %v8517_v1 = vld [vmem:[#allocation9 + $0x754] sm:$0xf] }
 0x312   :  { %v7484_v11 = vld [vmem:[#allocation9 + $0xc10] sm:$0xf]  ;;  %v6205_v30 = vor.u32 %v8353_v7, %v6204_v6  ;;  %4680 = vmatpush.bf16.msrb.mxu1 %v7773_v8  ;;  %v7134_v6 = vld [vmem:[#allocation9 + $0x970] sm:$0xf0]  ;;  %v6881_v17 = vor.u32 %v8517_v1, %v6878_v2  ;;  %v1601_v22 = vmul.f32 %v1585_v59, %v9457_v16 }
 0x313   :  { %v8673_v12 = vld [vmem:[#allocation9 + $0xc2c] sm:$0xf0]  ;;  %4740 = vmatpush.bf16.msra.mxu2 %v7169_v10  ;;  %v7137_v46 = vor.u32 %v8581_v48, %v7134_v6  ;;  %v6782_v10 = vld [vmem:[#allocation9 + $0x6b0] sm:$0xf0]  ;;  %v4477_v2 = vpop.f32.mrf.mxu1 }
 0x314   :  { %v7740_v47 = vld [vmem:[#allocation9 + $0xe10] sm:$0xf]  ;;  %v7485_v31 = vor.u32 %v8673_v12, %v7484_v11  ;;  %4603 = vmatpush.bf16.msra.mxu3 %v6205_v30  ;;  %v6625_v11 = vor.u32 %v8453_v61, %v6622_v9  ;;  %v8557_v61 = vld [vmem:[#allocation9 + $0x894] sm:$0xf] }
 0x315   :  { %v8737_v18 = vld [vmem:[#allocation9 + $0xe2c] sm:$0xf0]  ;;  %v8781_v2 = vld [vmem:[#allocation9 + $0xf94] sm:$0xf] }
 0x316   :  { %v7452_v53 = vld [vmem:[#allocation9 + $0xbd0] sm:$0xf]  ;;  %v7741_v35 = vor.u32 %v8737_v18, %v7740_v47  ;;  %4668 = vmatpush.bf16.msra.mxu0 %v7485_v31  ;;  %v8445_v47 = vld [vmem:[#allocation9 + $0x514] sm:$0xf] }
 0x317   :  { %v8665_v21 = vld [vmem:[#allocation9 + $0xbec] sm:$0xf0]  ;;  %4604 = vmatmul.bf16.vlgmr.msra.gmra.mxu3 %v9417_v49  ;;  %v6590_v18 = vld [vmem:[#allocation9 + $0x530] sm:$0xf0]  ;;  %4741 = vmatpush.bf16.msra.mxu2 %v7137_v46 }
 0x318   :  { %v7453_v37 = vor.u32 %v8665_v21, %v7452_v53  ;;  %v7420_v38 = vld [vmem:[#allocation9 + $0xb90] sm:$0xf]  ;;  %4681 = vmatpush.bf16.msrb.mxu1 %v7741_v35  ;;  %v7102_v53 = vld [vmem:[#allocation9 + $0x930] sm:$0xf0]  ;;  %v9524_v21 = vpop.f32.mrf.mxu0  ;;  %v6593_v30 = vor.u32 %v8445_v47, %v6590_v18 }
 0x319   :  { %v8657_v39 = vld [vmem:[#allocation9 + $0xbac] sm:$0xf0]  ;;  %4669 = vmatmul.bf16.vlgmr.msra.gmra.mxu0 %v9419_v51  ;;  %v7105_v34 = vor.u32 %v8573_v20, %v7102_v53  ;;  %v8437_v35 = vld [vmem:[#allocation9 + $0x4d4] sm:$0xf] }
 0x31a   :  { %4648 = vmatpush.bf16.msrb.mxu3 %v7453_v37  ;;  %4713 = vmatpush.bf16.msrb.mxu0 %v6689_v58  ;;  %v7421_v43 = vor.u32 %v8657_v39, %v7420_v38  ;;  %v7388_v55 = vld [vmem:[#allocation9 + $0xb50] sm:$0xf]  ;;  %v8501_v37 = vld [vmem:[#allocation9 + $0x6d4] sm:$0xf]  ;;  %v6561_v15 = vor.u32 %v8437_v35, %v6558_v23 }
 0x31b   :  { %v8649_v57 = vld [vmem:[#allocation9 + $0xb6c] sm:$0xf0]  ;;  %4682 = vmatmul.bf16.vlgmr.msrb.gmra.mxu1 %v9421_v60  ;;  %v6814_v58 = vld [vmem:[#allocation9 + $0x6f0] sm:$0xf0]  ;;  %4742 = vmatpush.bf16.msra.mxu2 %v7105_v34  ;;  %v4399_v34 = vpop.f32.mrf.mxu3 }
 0x31c   :  { %4726 = vmatpush.bf16.msra.mxu1 %v6945_v50  ;;  %v7389_v7 = vor.u32 %v8649_v57, %v7388_v55  ;;  %v7356_v12 = vld [vmem:[#allocation9 + $0xb10] sm:$0xf]  ;;  %v8565_v38 = vld [vmem:[#allocation9 + $0x8d4] sm:$0xf]  ;;  %v4385_v50 = vadd.f32 %v9495_v36, %v1601_v22  ;;  %v6817_v27 = vor.u32 %v8501_v37, %v6814_v58 }
 0x31d   :  { %v8641_v8 = vld [vmem:[#allocation9 + $0xb2c] sm:$0xf0]  ;;  %v7070_v39 = vld [vmem:[#allocation9 + $0x8f0] sm:$0xf0] }
 0x31e   :  { %4649 = vmatpush.bf16.msrb.mxu3 %v7421_v43  ;;  %4714 = vmatpush.bf16.msrb.mxu0 %v6657_v44  ;;  %v7357_v29 = vor.u32 %v8641_v8, %v7356_v12  ;;  %v7324_v31 = vld [vmem:[#allocation9 + $0xad0] sm:$0xf]  ;;  %v7073_v42 = vor.u32 %v8565_v38, %v7070_v39  ;;  %v8429_v43 = vld [vmem:[#allocation9 + $0x494] sm:$0xf]  ;;  %v4398_v57 = vadd.f32 %v4397_v4, %v4385_v50 }
 0x31f   :  { %v8633_v26 = vld [vmem:[#allocation9 + $0xaec] sm:$0xf0]  ;;  %v6526_v44 = vld [vmem:[#allocation9 + $0x4b0] sm:$0xf0] }
 0x320   :  { %4727 = vmatpush.bf16.msra.mxu1 %v6913_v52  ;;  %v7325_v45 = vor.u32 %v8633_v26, %v7324_v31  ;;  %v7292_v25 = vld [vmem:[#allocation9 + $0xa90] sm:$0xf]  ;;  %v8493_v55 = vld [vmem:[#allocation9 + $0x694] sm:$0xf]  ;;  %v9530_v52 = vpop.f32.mrf.mxu2  ;;  %v4464_v9 = vpop.f32.mrf.mxu0  ;;  %v4411_v1 = vadd.f32 %v9506_v41, %v4398_v57  ;;  %v6529_v6 = vor.u32 %v8429_v43, %v6526_v44  ;;  %4743 = vmatpush.bf16.msra.mxu2 %v7073_v42  ;;  %v8346_v42 = vld [vmem:[#allocation9 + $0x1f4] sm:$0xf0] }
 0x321   :  { %v8625_v28 = vld [vmem:[#allocation9 + $0xaac] sm:$0xf0]  ;;  %v7038_v36 = vld [vmem:[#allocation9 + $0x8b0] sm:$0xf0] }
 0x322   :  { %4650 = vmatpush.bf16.msrb.mxu3 %v7389_v7  ;;  %4715 = vmatpush.bf16.msrb.mxu0 %v6625_v11  ;;  %v7293_v48 = vor.u32 %v8625_v28, %v7292_v25  ;;  %v7260_v59 = vld [vmem:[#allocation9 + $0xa50] sm:$0xf]  ;;  %v6785_v11 = vor.u32 %v8493_v55, %v6782_v10  ;;  %v7041_v12 = vor.u32 %v8557_v61, %v7038_v36  ;;  %v8421_v8 = vld [vmem:[#allocation9 + $0x454] sm:$0xf] }
 0x323   :  { %v8617_v7 = vld [vmem:[#allocation9 + $0xa6c] sm:$0xf0]  ;;  %v8485_v46 = vld [vmem:[#allocation9 + $0x654] sm:$0xf]  ;;  %v4424_v19 = vadd.f32 %v9508_v13, %v4411_v1 }
 0x324   :  { %4728 = vmatpush.bf16.msra.mxu1 %v6881_v17  ;;  %v6494_v17 = vld [vmem:[#allocation9 + $0x470] sm:$0xf0]  ;;  %v7228_v20 = vld [vmem:[#allocation9 + $0xa10] sm:$0xf]  ;;  %v7261_v41 = vor.u32 %v8617_v7, %v7260_v59  ;;  %4744 = vmatpush.bf16.msra.mxu2 %v7041_v12  ;;  %v8338_v59 = vld [vmem:[#allocation9 + $0x1b4] sm:$0xf0] }
 0x325   :  { %v6750_v47 = vld [vmem:[#allocation9 + $0x670] sm:$0xf0]  ;;  %v6497_v53 = vor.u32 %v8421_v8, %v6494_v17  ;;  %v8609_v22 = vld [vmem:[#allocation9 + $0xa2c] sm:$0xf0]  ;;  %v9535_v31 = vadd.f32 %v9511_v40, %v4424_v19 }
 0x326   :  { %4651 = vmatpush.bf16.msrb.mxu3 %v7357_v29  ;;  %4716 = vmatpush.bf16.msrb.mxu0 %v6593_v30  ;;  %v8549_v18 = vld [vmem:[#allocation9 + $0x854] sm:$0xf]  ;;  %v6753_v26 = vor.u32 %v8485_v46, %v6750_v47  ;;  %v7229_v25 = vor.u32 %v8609_v22, %v7228_v20  ;;  %v6116_v20 = vld [vmem:[#allocation9 + $0x158] sm:$0xf] }
 0x327   :  { %v8413_v29 = vld [vmem:[#allocation9 + $0x414] sm:$0xf] }
 0x328   :  { %4729 = vmatpush.bf16.msra.mxu1 %v6849_v32  ;;  %v6462_v30 = vld [vmem:[#allocation9 + $0x430] sm:$0xf0]  ;;  %v7009_v32 = vor.u32 %v8549_v18, %v7006_v54  ;;  %v4490_v13 = vpop.f32.mrf.mxu2 }
 0x329   :  { %v8477_v35 = vld [vmem:[#allocation9 + $0x614] sm:$0xf]  ;;  %v6465_v40 = vor.u32 %v8413_v29, %v6462_v30  ;;  %v6084_v13 = vld [vmem:[#allocation9 + $0x118] sm:$0xf] }
 0x32a   :  { %4652 = vmatpush.bf16.msrb.mxu3 %v7325_v45  ;;  %4717 = vmatpush.bf16.msrb.mxu0 %v6561_v15  ;;  %v6718_v23 = vld [vmem:[#allocation9 + $0x630] sm:$0xf0] }
 0x32b   :  { %v8541_v37 = vld [vmem:[#allocation9 + $0x814] sm:$0xf]  ;;  %4745 = vmatpush.bf16.msra.mxu2 %v7009_v32  ;;  %v6721_v4 = vor.u32 %v8477_v35, %v6718_v23 }
 0x32c   :  { %4730 = vmatpush.bf16.msra.mxu1 %v6817_v27  ;;  %v6974_v58 = vld [vmem:[#allocation9 + $0x830] sm:$0xf0]  ;;  %v6180_v27 = vld [vmem:[#allocation9 + $0x1d8] sm:$0xf] }
 0x32d   :  { %v8405_v38 = vld [vmem:[#allocation9 + $0x3d4] sm:$0xf]  ;;  %v6977_v43 = vor.u32 %v8541_v37, %v6974_v58  ;;  %v6181_v36 = vor.u32 %v8346_v42, %v6180_v27  ;;  %v8322_v58 = vld [vmem:[#allocation9 + $0x134] sm:$0xf0] }
 0x32e   :  { %4653 = vmatpush.bf16.msrb.mxu3 %v7293_v48  ;;  %4718 = vmatpush.bf16.msrb.mxu0 %v6529_v6  ;;  %v6430_v39 = vld [vmem:[#allocation9 + $0x3f0] sm:$0xf0]  ;;  %v6148_v6 = vld [vmem:[#allocation9 + $0x198] sm:$0xf] }
 0x32f   :  { %v8725_v50 = vld [vmem:[#allocation9 + $0xdd4] sm:$0xf]  ;;  %v6433_v44 = vor.u32 %v8405_v38, %v6430_v39  ;;  %4746 = vmatpush.bf16.msra.mxu2 %v6977_v43  ;;  %v6149_v46 = vor.u32 %v8338_v59, %v6148_v6  ;;  %v9541_v38 = vpop.f32.mrf.mxu0  ;;  %v9543_v39 = vpop.f32.mrf.mxu1 }
 0x330   :  { %4731 = vmatpush.bf16.msra.mxu1 %v6785_v11  ;;  %v7710_v45 = vld [vmem:[#allocation9 + $0xdf0] sm:$0xf0] }
 0x331   :  { %v8789_v15 = vld [vmem:[#allocation9 + $0xfd4] sm:$0xf]  ;;  %v7713_v55 = vor.u32 %v8725_v50, %v7710_v45 }
 0x332   :  { %4654 = vmatpush.bf16.msrb.mxu3 %v7261_v41  ;;  %4719 = vmatpush.bf16.msrb.mxu0 %v6497_v53  ;;  %v7966_v28 = vld [vmem:[#allocation9 + $0xff0] sm:$0xf0]  ;;  %v8330_v41 = vld [vmem:[#allocation9 + $0x174] sm:$0xf0] }
 0x333   :  { %v8397_v57 = vld [vmem:[#allocation9 + $0x394] sm:$0xf]  ;;  %v7969_v61 = vor.u32 %v8789_v15, %v7966_v28  ;;  %4791 = vmatpush.bf16.msrb.mxu2 %v6181_v36  ;;  %v6117_v32 = vor.u32 %v8330_v41, %v6116_v20  ;;  %v6085_v28 = vor.u32 %v8322_v58, %v6084_v13 }
 0x334   :  { %4732 = vmatpush.bf16.msra.mxu1 %v6753_v26  ;;  %v6398_v10 = vld [vmem:[#allocation9 + $0x3b0] sm:$0xf0]  ;;  %4747 = vmatmul.bf16.vlgmr.msra.gmra.mxu2 %v9411_v5 }
 0x335   :  { %v8717_v9 = vld [vmem:[#allocation9 + $0xd94] sm:$0xf]  ;;  %v6401_v7 = vor.u32 %v8397_v57, %v6398_v10 }
 0x336   :  { %v7678_v1 = vld [vmem:[#allocation9 + $0xdb0] sm:$0xf0]  ;;  %4655 = vmatpush.bf16.msrb.mxu3 %v7229_v25  ;;  %4720 = vmatpush.bf16.msrb.mxu0 %v6465_v40 }
 0x337   :  { %v7934_v48 = vld [vmem:[#allocation9 + $0xfb0] sm:$0xf0]  ;;  %v7681_v11 = vor.u32 %v8717_v9, %v7678_v1  ;;  %4792 = vmatpush.bf16.msrb.mxu2 %v6149_v46  ;;  %v4516_v46 = vpop.f32.mrf.mxu0 }
 0x338   :  { %4733 = vmatpush.bf16.msra.mxu1 %v6721_v4  ;;  %v8389_v12 = vld [vmem:[#allocation9 + $0x354] sm:$0xf]  ;;  %v7937_v17 = vor.u32 %v8781_v2, %v7934_v48  ;;  %v4449_v2 = vpop.f32.mrf.mxu3  ;;  %v6660_v46 = vld [vmem:[#allocation9 + $0x598] sm:$0xf] }
 0x339   :  { %v6366_v8 = vld [vmem:[#allocation9 + $0x370] sm:$0xf0]  ;;  %4656 = vmatmul.bf16.vlgmr.msrb.gmra.mxu3 %v9428_v14  ;;  %4721 = vmatmul.bf16.vlgmr.msrb.gmra.mxu0 %v9407_v63 }
 0x33a   :  { %4700 = vmatpush.bf16.msra.mxu3 %v6433_v44  ;;  %4765 = vmatpush.bf16.msra.mxu0 %v7713_v55  ;;  %v8709_v47 = vld [vmem:[#allocation9 + $0xd54] sm:$0xf]  ;;  %v6369_v53 = vor.u32 %v8389_v12, %v6366_v8  ;;  %v6052_v44 = vld [vmem:[#allocation9 + $0xd8] sm:$0xf] }
 0x33b   :  { %v7646_v18 = vld [vmem:[#allocation9 + $0xd70] sm:$0xf0]  ;;  %4734 = vmatmul.bf16.vlgmr.msra.gmra.mxu1 %v9409_v0  ;;  %4793 = vmatpush.bf16.msrb.mxu2 %v6117_v32  ;;  %v8314_v55 = vld [vmem:[#allocation9 + $0xf4] sm:$0xf0] }
 0x33c   :  { %4778 = vmatpush.bf16.msrb.mxu1 %v7969_v61  ;;  %v8773_v54 = vld [vmem:[#allocation9 + $0xf54] sm:$0xf]  ;;  %v7649_v22 = vor.u32 %v8709_v47, %v7646_v18  ;;  %v6053_v1 = vor.u32 %v8314_v55, %v6052_v44  ;;  %v6020_v8 = vld [vmem:[#allocation9 + $0x98] sm:$0xf]  ;;  %v4529_v18 = vpop.f32.mrf.mxu1 }
 0x33d   :  { %v7902_v19 = vld [vmem:[#allocation9 + $0xf70] sm:$0xf0]  ;;  %v6692_v44 = vld [vmem:[#allocation9 + $0x5d8] sm:$0xf] }
 0x33e   :  { %4701 = vmatpush.bf16.msra.mxu3 %v6401_v7  ;;  %4766 = vmatpush.bf16.msra.mxu0 %v7681_v11  ;;  %v8381_v29 = vld [vmem:[#allocation9 + $0x314] sm:$0xf]  ;;  %v7905_v26 = vor.u32 %v8773_v54, %v7902_v19  ;;  %v4450_v7 = vadd.f32 %v4449_v2, %v9535_v31  ;;  %v9546_v11 = vpop.f32.mrf.mxu2  ;;  %v8474_v55 = vld [vmem:[#allocation9 + $0x5f4] sm:$0xf0] }
 0x33f   :  { %v6334_v30 = vld [vmem:[#allocation9 + $0x330] sm:$0xf0]  ;;  %4794 = vmatpush.bf16.msrb.mxu2 %v6085_v28  ;;  %v6916_v18 = vld [vmem:[#allocation9 + $0x798] sm:$0xf] }
 0x340   :  { %4779 = vmatpush.bf16.msrb.mxu1 %v7937_v17  ;;  %v8701_v34 = vld [vmem:[#allocation9 + $0xd14] sm:$0xf]  ;;  %v6337_v50 = vor.u32 %v8381_v29, %v6334_v30  ;;  %v8306_v17 = vld [vmem:[#allocation9 + $0xb4] sm:$0xf0]  ;;  %v4463_v47 = vadd.f32 %v9524_v21, %v4450_v7 }
 0x341   :  { %v7614_v35 = vld [vmem:[#allocation9 + $0xd30] sm:$0xf0] }
 0x342   :  { %v8765_v23 = vld [vmem:[#allocation9 + $0xf14] sm:$0xf]  ;;  %4702 = vmatpush.bf16.msra.mxu3 %v6369_v53  ;;  %4767 = vmatpush.bf16.msra.mxu0 %v7649_v22  ;;  %v7617_v45 = vor.u32 %v8701_v34, %v7614_v35  ;;  %v6021_v22 = vor.u32 %v8306_v17, %v6020_v8  ;;  %v5988_v34 = vld [vmem:[#allocation9 + $0x58] sm:$0xf] }
 0x343   :  { %v7870_v37 = vld [vmem:[#allocation9 + $0xf30] sm:$0xf0]  ;;  %4795 = vmatpush.bf16.msrb.mxu2 %v6053_v1  ;;  %v8298_v35 = vld [vmem:[#allocation9 + $0x74] sm:$0xf0] }
 0x344   :  { %v8373_v15 = vld [vmem:[#allocation9 + $0x2d4] sm:$0xf]  ;;  %4780 = vmatpush.bf16.msrb.mxu1 %v7905_v26  ;;  %v7873_v40 = vor.u32 %v8765_v23, %v7870_v37  ;;  %v9550_v26 = vadd.f32 %v9527_v24, %v4463_v47  ;;  %v5956_v24 = vld [vmem:[#allocation9 + $0x18] sm:$0xf] }
 0x345   :  { %v6302_v25 = vld [vmem:[#allocation9 + $0x2f0] sm:$0xf0]  ;;  %v8602_v1 = vld [vmem:[#allocation9 + $0x9f4] sm:$0xf0] }
 0x346   :  { %v8693_v27 = vld [vmem:[#allocation9 + $0xcd4] sm:$0xf]  ;;  %4703 = vmatpush.bf16.msra.mxu3 %v6337_v50  ;;  %4768 = vmatpush.bf16.msra.mxu0 %v7617_v45  ;;  %v6305_v57 = vor.u32 %v8373_v15, %v6302_v25  ;;  %v5989_v15 = vor.u32 %v8298_v35, %v5988_v34  ;;  %v4451_v25 = vpop.f32.mrf.mxu3  ;;  %v8466_v47 = vld [vmem:[#allocation9 + $0x5b4] sm:$0xf0] }
 0x347   :  { %v7582_v42 = vld [vmem:[#allocation9 + $0xcf0] sm:$0xf0]  ;;  %4796 = vmatpush.bf16.msrb.mxu2 %v6021_v22  ;;  %v8458_v34 = vld [vmem:[#allocation9 + $0x574] sm:$0xf0] }
 0x348   :  { %v8757_v4 = vld [vmem:[#allocation9 + $0xed4] sm:$0xf]  ;;  %v7585_v10 = vor.u32 %v8693_v27, %v7582_v42  ;;  %4781 = vmatpush.bf16.msrb.mxu1 %v7873_v40  ;;  %v4542_v27 = vpop.f32.mrf.mxu2  ;;  %v8290_v42 = vld [vmem:[#allocation9 + $0x34] sm:$0xf0] }
 0x349   :  { %v7838_v43 = vld [vmem:[#allocation9 + $0xef0] sm:$0xf0]  ;;  %v6884_v35 = vld [vmem:[#allocation9 + $0x758] sm:$0xf] }
 0x34a   :  { %v8365_v61 = vld [vmem:[#allocation9 + $0x294] sm:$0xf]  ;;  %v7841_v9 = vor.u32 %v8757_v4, %v7838_v43  ;;  %4704 = vmatpush.bf16.msra.mxu3 %v6305_v57  ;;  %4769 = vmatpush.bf16.msra.mxu0 %v7585_v10  ;;  %v6948_v57 = vld [vmem:[#allocation9 + $0x7d8] sm:$0xf] }
 0x34b   :  { %v6270_v36 = vld [vmem:[#allocation9 + $0x2b0] sm:$0xf0]  ;;  %4797 = vmatpush.bf16.msrb.mxu2 %v5989_v15  ;;  %v6852_v27 = vld [vmem:[#allocation9 + $0x718] sm:$0xf] }
 0x34c   :  { %v8685_v48 = vld [vmem:[#allocation9 + $0xc94] sm:$0xf]  ;;  %v6273_v54 = vor.u32 %v8365_v61, %v6270_v36  ;;  %4782 = vmatpush.bf16.msrb.mxu1 %v7841_v9  ;;  %v8538_v36 = vld [vmem:[#allocation9 + $0x7f4] sm:$0xf0] }
 0x34d   :  { %v7550_v6 = vld [vmem:[#allocation9 + $0xcb0] sm:$0xf0]  ;;  %v7204_v9 = vld [vmem:[#allocation9 + $0x9d8] sm:$0xf]  ;;  %v6949_v8 = vor.u32 %v8538_v36, %v6948_v57 }
 0x34e   :  { %v8749_v59 = vld [vmem:[#allocation9 + $0xe94] sm:$0xf]  ;;  %v7553_v19 = vor.u32 %v8685_v48, %v7550_v6  ;;  %4705 = vmatpush.bf16.msra.mxu3 %v6273_v54  ;;  %v5957_v48 = vor.u32 %v8290_v42, %v5956_v24  ;;  %v7205_v17 = vor.u32 %v8602_v1, %v7204_v9  ;;  %v8530_v54 = vld [vmem:[#allocation9 + $0x7b4] sm:$0xf0] }
 0x34f   :  { %v7806_v12 = vld [vmem:[#allocation9 + $0xeb0] sm:$0xf0]  ;;  %v8450_v24 = vld [vmem:[#allocation9 + $0x534] sm:$0xf0] }
 0x350   :  { %v8357_v20 = vld [vmem:[#allocation9 + $0x254] sm:$0xf]  ;;  %v7809_v53 = vor.u32 %v8749_v59, %v7806_v12  ;;  %4770 = vmatpush.bf16.msra.mxu0 %v7553_v19  ;;  %v6693_v59 = vor.u32 %v8474_v55, %v6692_v44  ;;  %v7172_v19 = vld [vmem:[#allocation9 + $0x998] sm:$0xf]  ;;  %4798 = vmatpush.bf16.msrb.mxu2 %v5957_v48  ;;  %v9557_v44 = vpop.f32.mrf.mxu0  ;;  %v9560_v55 = vpop.f32.mrf.mxu1 }
 0x351   :  { %v6238_v41 = vld [vmem:[#allocation9 + $0x270] sm:$0xf0]  ;;  %v8514_v42 = vld [vmem:[#allocation9 + $0x734] sm:$0xf0] }
 0x352   :  { %v8677_v31 = vld [vmem:[#allocation9 + $0xc54] sm:$0xf]  ;;  %v6241_v21 = vor.u32 %v8357_v20, %v6238_v41  ;;  %4783 = vmatpush.bf16.msrb.mxu1 %v7809_v53  ;;  %v8594_v20 = vld [vmem:[#allocation9 + $0x9b4] sm:$0xf0]  ;;  %v6661_v53 = vor.u32 %v8466_v47, %v6660_v46  ;;  %v6853_v9 = vor.u32 %v8514_v42, %v6852_v27 }
 0x353   :  { %v7518_v29 = vld [vmem:[#allocation9 + $0xc70] sm:$0xf0]  ;;  %4799 = vmatmul.bf16.vlgmr.msrb.gmra.mxu2 %v9405_v62  ;;  %v8442_v48 = vld [vmem:[#allocation9 + $0x4f4] sm:$0xf0] }
 0x354   :  { %v8741_v30 = vld [vmem:[#allocation9 + $0xe54] sm:$0xf]  ;;  %v7521_v37 = vor.u32 %v8677_v31, %v7518_v29  ;;  %4706 = vmatpush.bf16.msra.mxu3 %v6241_v21  ;;  %4843 = vmatpush.bf16.msra.mxu2 %v7205_v17  ;;  %v6917_v29 = vor.u32 %v8530_v54, %v6916_v18  ;;  %v7140_v21 = vld [vmem:[#allocation9 + $0x958] sm:$0xf] }
 0x355   :  { %v7774_v32 = vld [vmem:[#allocation9 + $0xe70] sm:$0xf0]  ;;  %v8554_v27 = vld [vmem:[#allocation9 + $0x874] sm:$0xf0] }
 0x356   :  { %v8349_v23 = vld [vmem:[#allocation9 + $0x214] sm:$0xf]  ;;  %v7777_v45 = vor.u32 %v8741_v30, %v7774_v32  ;;  %4771 = vmatpush.bf16.msra.mxu0 %v7521_v37  ;;  %v7173_v30 = vor.u32 %v8594_v20, %v7172_v19  ;;  %v6628_v32 = vld [vmem:[#allocation9 + $0x558] sm:$0xf]  ;;  %v4501_v20 = vpop.f32.mrf.mxu3 }
 0x357   :  { %v6206_v13 = vld [vmem:[#allocation9 + $0x230] sm:$0xf0]  ;;  %v8586_v37 = vld [vmem:[#allocation9 + $0x974] sm:$0xf0] }
 0x358   :  { %v8669_v58 = vld [vmem:[#allocation9 + $0xc14] sm:$0xf]  ;;  %v6209_v10 = vor.u32 %v8349_v23, %v6206_v13  ;;  %4784 = vmatpush.bf16.msrb.mxu1 %v7777_v45  ;;  %v8522_v23 = vld [vmem:[#allocation9 + $0x774] sm:$0xf0]  ;;  %v1586_v13 = vperm.slane %v9521_v3, 3  ;;  %4844 = vmatpush.bf16.msra.mxu2 %v7173_v30 }
 0x359   :  { %v7486_v50 = vld [vmem:[#allocation9 + $0xc30] sm:$0xf0]  ;;  %v6885_v25 = vor.u32 %v8522_v23, %v6884_v35  ;;  %v8498_v30 = vld [vmem:[#allocation9 + $0x6b4] sm:$0xf0]  ;;  %v4581_v23 = vpop.f32.mrf.mxu1 }
 0x35a   :  { %v8733_v40 = vld [vmem:[#allocation9 + $0xe14] sm:$0xf]  ;;  %v7489_v61 = vor.u32 %v8669_v58, %v7486_v50  ;;  %4707 = vmatpush.bf16.msra.mxu3 %v6209_v10  ;;  %v6629_v50 = vor.u32 %v8458_v34, %v6628_v32  ;;  %v1602_v3 = vmul.f32 %v1586_v13, %v9457_v16  ;;  %v7044_v32 = vld [vmem:[#allocation9 + $0x898] sm:$0xf]  ;;  %v4568_v34 = vpop.f32.mrf.mxu0 }
 0x35b   :  { %v7742_v28 = vld [vmem:[#allocation9 + $0xe30] sm:$0xf0]  ;;  %v7684_v34 = vld [vmem:[#allocation9 + $0xd98] sm:$0xf] }
 0x35c   :  { %v8661_v4 = vld [vmem:[#allocation9 + $0xbd4] sm:$0xf]  ;;  %v7745_v2 = vor.u32 %v8733_v40, %v7742_v28  ;;  %4772 = vmatpush.bf16.msra.mxu0 %v7489_v61  ;;  %v7141_v40 = vor.u32 %v8586_v37, %v7140_v21  ;;  %v6596_v28 = vld [vmem:[#allocation9 + $0x518] sm:$0xf] }
 0x35d   :  { %v7454_v43 = vld [vmem:[#allocation9 + $0xbf0] sm:$0xf0]  ;;  %4708 = vmatmul.bf16.vlgmr.msra.gmra.mxu3 %v9417_v49  ;;  %v6597_v10 = vor.u32 %v8450_v24, %v6596_v28  ;;  %v8490_v28 = vld [vmem:[#allocation9 + $0x674] sm:$0xf0] }
 0x35e   :  { %v7457_v6 = vor.u32 %v8661_v4, %v7454_v43  ;;  %v8653_v7 = vld [vmem:[#allocation9 + $0xb94] sm:$0xf]  ;;  %4785 = vmatpush.bf16.msrb.mxu1 %v7745_v2  ;;  %v7108_v4 = vld [vmem:[#allocation9 + $0x918] sm:$0xf]  ;;  %4845 = vmatpush.bf16.msra.mxu2 %v7141_v40 }
 0x35f   :  { %v7422_v12 = vld [vmem:[#allocation9 + $0xbb0] sm:$0xf0]  ;;  %4773 = vmatmul.bf16.vlgmr.msra.gmra.mxu0 %v9419_v51  ;;  %v8578_v43 = vld [vmem:[#allocation9 + $0x934] sm:$0xf0] }
 0x360   :  { %4752 = vmatpush.bf16.msrb.mxu3 %v7457_v6  ;;  %4817 = vmatpush.bf16.msrb.mxu0 %v6693_v59  ;;  %v7425_v41 = vor.u32 %v8653_v7, %v7422_v12  ;;  %v8645_v22 = vld [vmem:[#allocation9 + $0xb54] sm:$0xf]  ;;  %v7109_v1 = vor.u32 %v8578_v43, %v7108_v4  ;;  %v6564_v2 = vld [vmem:[#allocation9 + $0x4d8] sm:$0xf] }
 0x361   :  { %v7390_v31 = vld [vmem:[#allocation9 + $0xb70] sm:$0xf0]  ;;  %4786 = vmatmul.bf16.vlgmr.msrb.gmra.mxu1 %v9421_v60  ;;  %v6820_v6 = vld [vmem:[#allocation9 + $0x6d8] sm:$0xf]  ;;  %v6565_v46 = vor.u32 %v8442_v48, %v6564_v2 }
 0x362   :  { %4830 = vmatpush.bf16.msra.mxu1 %v6949_v8  ;;  %v7393_v58 = vor.u32 %v8645_v22, %v7390_v31  ;;  %v8637_v45 = vld [vmem:[#allocation9 + $0xb14] sm:$0xf]  ;;  %v8506_v59 = vld [vmem:[#allocation9 + $0x6f4] sm:$0xf0]  ;;  %v4489_v8 = vadd.f32 %v9530_v52, %v1602_v3  ;;  %4846 = vmatpush.bf16.msra.mxu2 %v7109_v1  ;;  %v4503_v1 = vpop.f32.mrf.mxu3 }
 0x363   :  { %v7358_v15 = vld [vmem:[#allocation9 + $0xb30] sm:$0xf0]  ;;  %v7076_v7 = vld [vmem:[#allocation9 + $0x8d8] sm:$0xf]  ;;  %v6821_v54 = vor.u32 %v8506_v59, %v6820_v6 }
 0x364   :  { %4753 = vmatpush.bf16.msrb.mxu3 %v7425_v41  ;;  %4818 = vmatpush.bf16.msrb.mxu0 %v6661_v53  ;;  %v7361_v57 = vor.u32 %v8637_v45, %v7358_v15  ;;  %v8629_v61 = vld [vmem:[#allocation9 + $0xad4] sm:$0xf]  ;;  %v8570_v12 = vld [vmem:[#allocation9 + $0x8f4] sm:$0xf0]  ;;  %v4502_v31 = vadd.f32 %v4501_v20, %v4489_v8 }
 0x365   :  { %v7326_v36 = vld [vmem:[#allocation9 + $0xaf0] sm:$0xf0]  ;;  %v7077_v19 = vor.u32 %v8570_v12, %v7076_v7  ;;  %v6532_v41 = vld [vmem:[#allocation9 + $0x498] sm:$0xf] }
 0x366   :  { %4831 = vmatpush.bf16.msra.mxu1 %v6917_v29  ;;  %v7329_v17 = vor.u32 %v8629_v61, %v7326_v36  ;;  %v8621_v47 = vld [vmem:[#allocation9 + $0xa94] sm:$0xf]  ;;  %v8434_v53 = vld [vmem:[#allocation9 + $0x4b4] sm:$0xf0]  ;;  %v9563_v29 = vpop.f32.mrf.mxu2  ;;  %v4515_v35 = vadd.f32 %v9541_v38, %v4502_v31 }
 0x367   :  { %v7294_v18 = vld [vmem:[#allocation9 + $0xab0] sm:$0xf0]  ;;  %v6788_v22 = vld [vmem:[#allocation9 + $0x698] sm:$0xf]  ;;  %v6533_v37 = vor.u32 %v8434_v53, %v6532_v41  ;;  %4847 = vmatpush.bf16.msra.mxu2 %v7077_v19  ;;  %v6182_v19 = vld [vmem:[#allocation9 + $0x1f8] sm:$0xf0] }
 0x368   :  { %4754 = vmatpush.bf16.msrb.mxu3 %v7393_v58  ;;  %4819 = vmatpush.bf16.msrb.mxu0 %v6629_v50  ;;  %v8562_v52 = vld [vmem:[#allocation9 + $0x8b4] sm:$0xf0]  ;;  %v7297_v21 = vor.u32 %v8621_v47, %v7294_v18  ;;  %v8613_v13 = vld [vmem:[#allocation9 + $0xa54] sm:$0xf]  ;;  %v6789_v50 = vor.u32 %v8498_v30, %v6788_v22  ;;  %v4528_v42 = vadd.f32 %v9543_v39, %v4515_v35 }
 0x369   :  { %v7262_v58 = vld [vmem:[#allocation9 + $0xa70] sm:$0xf0]  ;;  %v7045_v45 = vor.u32 %v8562_v52, %v7044_v32  ;;  %v6500_v15 = vld [vmem:[#allocation9 + $0x458] sm:$0xf] }
 0x36a   :  { %4832 = vmatpush.bf16.msra.mxu1 %v6885_v25  ;;  %v8426_v25 = vld [vmem:[#allocation9 + $0x474] sm:$0xf0]  ;;  %v8605_v4 = vld [vmem:[#allocation9 + $0xa14] sm:$0xf]  ;;  %v7265_v38 = vor.u32 %v8613_v13, %v7262_v58  ;;  %v9568_v61 = vadd.f32 %v9546_v11, %v4528_v42  ;;  %v6150_v13 = vld [vmem:[#allocation9 + $0x1b8] sm:$0xf0] }
 0x36b   :  { %v6756_v40 = vld [vmem:[#allocation9 + $0x658] sm:$0xf]  ;;  %v6501_v43 = vor.u32 %v8426_v25, %v6500_v15  ;;  %v7230_v3 = vld [vmem:[#allocation9 + $0xa30] sm:$0xf0]  ;;  %4848 = vmatpush.bf16.msra.mxu2 %v7045_v45 }
 0x36c   :  { %4755 = vmatpush.bf16.msrb.mxu3 %v7361_v57  ;;  %4820 = vmatpush.bf16.msrb.mxu0 %v6597_v10  ;;  %v7012_v24 = vld [vmem:[#allocation9 + $0x858] sm:$0xf]  ;;  %v6757_v36 = vor.u32 %v8490_v28, %v6756_v40  ;;  %v7233_v47 = vor.u32 %v8605_v4, %v7230_v3  ;;  %v8326_v4 = vld [vmem:[#allocation9 + $0x15c] sm:$0xf] }
 0x36d   :  { %v6468_v57 = vld [vmem:[#allocation9 + $0x418] sm:$0xf] }
 0x36e   :  { %4833 = vmatpush.bf16.msra.mxu1 %v6853_v9  ;;  %v8418_v10 = vld [vmem:[#allocation9 + $0x434] sm:$0xf0]  ;;  %v7013_v9 = vor.u32 %v8554_v27, %v7012_v24  ;;  %v4594_v39 = vpop.f32.mrf.mxu2 }
 0x36f   :  { %v6724_v2 = vld [vmem:[#allocation9 + $0x618] sm:$0xf]  ;;  %v6469_v11 = vor.u32 %v8418_v10, %v6468_v57  ;;  %v8318_v39 = vld [vmem:[#allocation9 + $0x11c] sm:$0xf] }
 0x370   :  { %4756 = vmatpush.bf16.msrb.mxu3 %v7329_v17  ;;  %4821 = vmatpush.bf16.msrb.mxu0 %v6565_v46  ;;  %v8482_v48 = vld [vmem:[#allocation9 + $0x634] sm:$0xf0] }
 0x371   :  { %v6980_v6 = vld [vmem:[#allocation9 + $0x818] sm:$0xf]  ;;  %4849 = vmatpush.bf16.msra.mxu2 %v7013_v9  ;;  %v6725_v20 = vor.u32 %v8482_v48, %v6724_v2 }
 0x372   :  { %4834 = vmatpush.bf16.msra.mxu1 %v6821_v54  ;;  %v8546_v59 = vld [vmem:[#allocation9 + $0x834] sm:$0xf0]  ;;  %v8342_v54 = vld [vmem:[#allocation9 + $0x1dc] sm:$0xf] }
 0x373   :  { %v6436_v7 = vld [vmem:[#allocation9 + $0x3d8] sm:$0xf]  ;;  %v6981_v41 = vor.u32 %v8546_v59, %v6980_v6  ;;  %v6185_v52 = vor.u32 %v8342_v54, %v6182_v19  ;;  %v6086_v59 = vld [vmem:[#allocation9 + $0x138] sm:$0xf0] }
 0x374   :  { %4757 = vmatpush.bf16.msrb.mxu3 %v7297_v21  ;;  %4822 = vmatpush.bf16.msrb.mxu0 %v6533_v37  ;;  %v8410_v12 = vld [vmem:[#allocation9 + $0x3f4] sm:$0xf0]  ;;  %v8334_v37 = vld [vmem:[#allocation9 + $0x19c] sm:$0xf] }
 0x375   :  { %v7716_v8 = vld [vmem:[#allocation9 + $0xdd8] sm:$0xf]  ;;  %v6437_v53 = vor.u32 %v8410_v12, %v6436_v7  ;;  %4850 = vmatpush.bf16.msra.mxu2 %v6981_v41  ;;  %v6153_v40 = vor.u32 %v8334_v37, %v6150_v13  ;;  %v9574_v7 = vpop.f32.mrf.mxu0  ;;  %v9576_v12 = vpop.f32.mrf.mxu1 }
 0x376   :  { %4835 = vmatpush.bf16.msra.mxu1 %v6789_v50  ;;  %v8730_v17 = vld [vmem:[#allocation9 + $0xdf4] sm:$0xf0] }
 0x377   :  { %v7972_v46 = vld [vmem:[#allocation9 + $0xfd8] sm:$0xf]  ;;  %v7717_v22 = vor.u32 %v8730_v17, %v7716_v8 }
 0x378   :  { %4758 = vmatpush.bf16.msrb.mxu3 %v7265_v38  ;;  %4823 = vmatpush.bf16.msrb.mxu0 %v6501_v43  ;;  %v8794_v18 = vld [vmem:[#allocation9 + $0xff4] sm:$0xf0]  ;;  %v6118_v38 = vld [vmem:[#allocation9 + $0x178] sm:$0xf0] }
 0x379   :  { %v6404_v31 = vld [vmem:[#allocation9 + $0x398] sm:$0xf]  ;;  %v7973_v32 = vor.u32 %v8794_v18, %v7972_v46  ;;  %4895 = vmatpush.bf16.msrb.mxu2 %v6185_v52  ;;  %v6121_v9 = vor.u32 %v8326_v4, %v6118_v38  ;;  %v6089_v18 = vor.u32 %v8318_v39, %v6086_v59 }
 0x37a   :  { %4836 = vmatpush.bf16.msra.mxu1 %v6757_v36  ;;  %v8402_v30 = vld [vmem:[#allocation9 + $0x3b4] sm:$0xf0]  ;;  %4851 = vmatmul.bf16.vlgmr.msra.gmra.mxu2 %v9411_v5 }
 0x37b   :  { %v8722_v35 = vld [vmem:[#allocation9 + $0xdb4] sm:$0xf0]  ;;  %v6405_v58 = vor.u32 %v8402_v30, %v6404_v31 }
 0x37c   :  { %v7940_v23 = vld [vmem:[#allocation9 + $0xf98] sm:$0xf]  ;;  %4759 = vmatpush.bf16.msrb.mxu3 %v7233_v47  ;;  %4824 = vmatpush.bf16.msrb.mxu0 %v6469_v11  ;;  %v7685_v50 = vor.u32 %v8722_v35, %v7684_v34 }
 0x37d   :  { %v8786_v21 = vld [vmem:[#allocation9 + $0xfb4] sm:$0xf0]  ;;  %4896 = vmatpush.bf16.msrb.mxu2 %v6153_v40  ;;  %v4620_v40 = vpop.f32.mrf.mxu0 }
 0x37e   :  { %4837 = vmatpush.bf16.msra.mxu1 %v6725_v20  ;;  %v6372_v45 = vld [vmem:[#allocation9 + $0x358] sm:$0xf]  ;;  %v7941_v25 = vor.u32 %v8786_v21, %v7940_v23  ;;  %v4553_v23 = vpop.f32.mrf.mxu3  ;;  %v8462_v40 = vld [vmem:[#allocation9 + $0x59c] sm:$0xf] }
 0x37f   :  { %v8394_v15 = vld [vmem:[#allocation9 + $0x374] sm:$0xf0]  ;;  %4760 = vmatmul.bf16.vlgmr.msrb.gmra.mxu3 %v9428_v14  ;;  %4825 = vmatmul.bf16.vlgmr.msrb.gmra.mxu0 %v9407_v63 }
 0x380   :  { %4804 = vmatpush.bf16.msra.mxu3 %v6437_v53  ;;  %4869 = vmatpush.bf16.msra.mxu0 %v7717_v22  ;;  %v7652_v28 = vld [vmem:[#allocation9 + $0xd58] sm:$0xf]  ;;  %v6373_v43 = vor.u32 %v8394_v15, %v6372_v45  ;;  %v8310_v53 = vld [vmem:[#allocation9 + $0xdc] sm:$0xf] }
 0x381   :  { %v8714_v24 = vld [vmem:[#allocation9 + $0xd74] sm:$0xf0]  ;;  %4838 = vmatmul.bf16.vlgmr.msra.gmra.mxu1 %v9409_v0  ;;  %4897 = vmatpush.bf16.msrb.mxu2 %v6121_v9  ;;  %v6054_v22 = vld [vmem:[#allocation9 + $0xf8] sm:$0xf0] }
 0x382   :  { %4882 = vmatpush.bf16.msrb.mxu1 %v7973_v32  ;;  %v7908_v27 = vld [vmem:[#allocation9 + $0xf58] sm:$0xf]  ;;  %v7653_v3 = vor.u32 %v8714_v24, %v7652_v28  ;;  %v6057_v35 = vor.u32 %v8310_v53, %v6054_v22  ;;  %v8302_v15 = vld [vmem:[#allocation9 + $0x9c] sm:$0xf]  ;;  %v4633_v24 = vpop.f32.mrf.mxu1 }
 0x383   :  { %v8778_v42 = vld [vmem:[#allocation9 + $0xf74] sm:$0xf0]  ;;  %v8470_v53 = vld [vmem:[#allocation9 + $0x5dc] sm:$0xf] }
 0x384   :  { %4805 = vmatpush.bf16.msra.mxu3 %v6405_v58  ;;  %4870 = vmatpush.bf16.msra.mxu0 %v7685_v50  ;;  %v6340_v57 = vld [vmem:[#allocation9 + $0x318] sm:$0xf]  ;;  %v7909_v36 = vor.u32 %v8778_v42, %v7908_v27  ;;  %v4554_v58 = vadd.f32 %v4553_v23, %v9568_v61  ;;  %v9579_v50 = vpop.f32.mrf.mxu2  ;;  %v6694_v22 = vld [vmem:[#allocation9 + $0x5f8] sm:$0xf0] }
 0x385   :  { %v8386_v10 = vld [vmem:[#allocation9 + $0x334] sm:$0xf0]  ;;  %4898 = vmatpush.bf16.msrb.mxu2 %v6089_v18  ;;  %v8526_v24 = vld [vmem:[#allocation9 + $0x79c] sm:$0xf] }
 0x386   :  { %4883 = vmatpush.bf16.msrb.mxu1 %v7941_v25  ;;  %v7620_v1 = vld [vmem:[#allocation9 + $0xd18] sm:$0xf]  ;;  %v6341_v8 = vor.u32 %v8386_v10, %v6340_v57  ;;  %v6022_v25 = vld [vmem:[#allocation9 + $0xb8] sm:$0xf0]  ;;  %v4567_v28 = vadd.f32 %v9557_v44, %v4554_v58 }
 0x387   :  { %v8706_v2 = vld [vmem:[#allocation9 + $0xd34] sm:$0xf0] }
 0x388   :  { %v7876_v48 = vld [vmem:[#allocation9 + $0xf18] sm:$0xf]  ;;  %4806 = vmatpush.bf16.msra.mxu3 %v6373_v43  ;;  %4871 = vmatpush.bf16.msra.mxu0 %v7653_v3  ;;  %v7621_v17 = vor.u32 %v8706_v2, %v7620_v1  ;;  %v6025_v3 = vor.u32 %v8302_v15, %v6022_v25  ;;  %v8294_v1 = vld [vmem:[#allocation9 + $0x5c] sm:$0xf] }
 0x389   :  { %v8770_v6 = vld [vmem:[#allocation9 + $0xf34] sm:$0xf0]  ;;  %4899 = vmatpush.bf16.msrb.mxu2 %v6057_v35  ;;  %v5990_v2 = vld [vmem:[#allocation9 + $0x78] sm:$0xf0] }
 0x38a   :  { %v6308_v46 = vld [vmem:[#allocation9 + $0x2d8] sm:$0xf]  ;;  %4884 = vmatpush.bf16.msrb.mxu1 %v7909_v36  ;;  %v7877_v11 = vor.u32 %v8770_v6, %v7876_v48  ;;  %v9583_v36 = vadd.f32 %v9560_v55, %v4567_v28  ;;  %v8286_v55 = vld [vmem:[#allocation9 + $0x1c] sm:$0xf] }
 0x38b   :  { %v8378_v47 = vld [vmem:[#allocation9 + $0x2f4] sm:$0xf0]  ;;  %v7206_v35 = vld [vmem:[#allocation9 + $0x9f8] sm:$0xf0] }
 0x38c   :  { %v7588_v54 = vld [vmem:[#allocation9 + $0xcd8] sm:$0xf]  ;;  %4807 = vmatpush.bf16.msra.mxu3 %v6341_v8  ;;  %4872 = vmatpush.bf16.msra.mxu0 %v7621_v17  ;;  %v6309_v31 = vor.u32 %v8378_v47, %v6308_v46  ;;  %v5993_v46 = vor.u32 %v8294_v1, %v5990_v2  ;;  %v4555_v47 = vpop.f32.mrf.mxu3  ;;  %v6662_v28 = vld [vmem:[#allocation9 + $0x5b8] sm:$0xf0] }
 0x38d   :  { %v8698_v19 = vld [vmem:[#allocation9 + $0xcf4] sm:$0xf0]  ;;  %4900 = vmatpush.bf16.msrb.mxu2 %v6025_v3  ;;  %v6630_v1 = vld [vmem:[#allocation9 + $0x578] sm:$0xf0] }
 0x38e   :  { %v7844_v20 = vld [vmem:[#allocation9 + $0xed8] sm:$0xf]  ;;  %v7589_v30 = vor.u32 %v8698_v19, %v7588_v54  ;;  %4885 = vmatpush.bf16.msrb.mxu1 %v7877_v11  ;;  %v4646_v54 = vpop.f32.mrf.mxu2  ;;  %v5958_v19 = vld [vmem:[#allocation9 + $0x38] sm:$0xf0] }
 0x38f   :  { %v8762_v41 = vld [vmem:[#allocation9 + $0xef4] sm:$0xf0]  ;;  %v8518_v2 = vld [vmem:[#allocation9 + $0x75c] sm:$0xf] }
 0x390   :  { %v6276_v32 = vld [vmem:[#allocation9 + $0x298] sm:$0xf]  ;;  %v7845_v34 = vor.u32 %v8762_v41, %v7844_v20  ;;  %4808 = vmatpush.bf16.msra.mxu3 %v6309_v31  ;;  %4873 = vmatpush.bf16.msra.mxu0 %v7589_v30  ;;  %v8534_v31 = vld [vmem:[#allocation9 + $0x7dc] sm:$0xf] }
 0x391   :  { %v8370_v52 = vld [vmem:[#allocation9 + $0x2b4] sm:$0xf0]  ;;  %4901 = vmatpush.bf16.msrb.mxu2 %v5993_v46  ;;  %v6598_v54 = vld [vmem:[#allocation9 + $0x538] sm:$0xf0] }
 0x392   :  { %v7556_v21 = vld [vmem:[#allocation9 + $0xc98] sm:$0xf]  ;;  %v6277_v27 = vor.u32 %v8370_v52, %v6276_v32  ;;  %4886 = vmatpush.bf16.msrb.mxu1 %v7845_v34  ;;  %v6950_v52 = vld [vmem:[#allocation9 + $0x7f8] sm:$0xf0] }
 0x393   :  { %v8690_v37 = vld [vmem:[#allocation9 + $0xcb4] sm:$0xf0]  ;;  %v8598_v34 = vld [vmem:[#allocation9 + $0x9dc] sm:$0xf]  ;;  %v6953_v15 = vor.u32 %v8534_v31, %v6950_v52 }
 0x394   :  { %v7812_v13 = vld [vmem:[#allocation9 + $0xe98] sm:$0xf]  ;;  %v7557_v42 = vor.u32 %v8690_v37, %v7556_v21  ;;  %4809 = vmatpush.bf16.msra.mxu3 %v6277_v27  ;;  %v5961_v21 = vor.u32 %v8286_v55, %v5958_v19  ;;  %v7209_v25 = vor.u32 %v8598_v34, %v7206_v35  ;;  %v6918_v27 = vld [vmem:[#allocation9 + $0x7b8] sm:$0xf0] }
 0x395   :  { %v8754_v45 = vld [vmem:[#allocation9 + $0xeb4] sm:$0xf0]  ;;  %v8446_v55 = vld [vmem:[#allocation9 + $0x51c] sm:$0xf] }
 0x396   :  { %v6244_v4 = vld [vmem:[#allocation9 + $0x258] sm:$0xf]  ;;  %v7813_v43 = vor.u32 %v8754_v45, %v7812_v13  ;;  %4874 = vmatpush.bf16.msra.mxu0 %v7557_v42  ;;  %v6697_v13 = vor.u32 %v8470_v53, %v6694_v22  ;;  %v8590_v42 = vld [vmem:[#allocation9 + $0x99c] sm:$0xf]  ;;  %4902 = vmatpush.bf16.msrb.mxu2 %v5961_v21  ;;  %v9592_v53 = vpop.f32.mrf.mxu0 }
 0x397   :  { %v8362_v38 = vld [vmem:[#allocation9 + $0x274] sm:$0xf0]  ;;  %v8510_v19 = vld [vmem:[#allocation9 + $0x71c] sm:$0xf] }
 0x398   :  { %v7524_v61 = vld [vmem:[#allocation9 + $0xc58] sm:$0xf]  ;;  %v6245_v44 = vor.u32 %v8362_v38, %v6244_v4  ;;  %4887 = vmatpush.bf16.msrb.mxu1 %v7813_v43  ;;  %v7174_v4 = vld [vmem:[#allocation9 + $0x9b8] sm:$0xf0]  ;;  %v6665_v43 = vor.u32 %v8462_v40, %v6662_v28  ;;  %v9595_v31 = vpop.f32.mrf.mxu1 }
 0x399   :  { %v8682_v57 = vld [vmem:[#allocation9 + $0xc74] sm:$0xf0]  ;;  %4903 = vmatmul.bf16.vlgmr.msrb.gmra.mxu2 %v9405_v62  ;;  %v7110_v62 = vld [vmem:[#allocation9 + $0x938] sm:$0xf0] }
 0x39a   :  { %v7780_v10 = vld [vmem:[#allocation9 + $0xe58] sm:$0xf]  ;;  %v7525_v6 = vor.u32 %v8682_v57, %v7524_v61  ;;  %4810 = vmatpush.bf16.msra.mxu3 %v6245_v44  ;;  %4947 = vmatpush.bf16.msra.mxu2 %v7209_v25  ;;  %v6921_v57 = vor.u32 %v8526_v24, %v6918_v27  ;;  %v8582_v44 = vld [vmem:[#allocation9 + $0x95c] sm:$0xf] }
 0x39b   :  { %v8746_v9 = vld [vmem:[#allocation9 + $0xe74] sm:$0xf0]  ;;  %v8438_v21 = vld [vmem:[#allocation9 + $0x4dc] sm:$0xf] }
 0x39c   :  { %v6212_v48 = vld [vmem:[#allocation9 + $0x218] sm:$0xf]  ;;  %v7781_v17 = vor.u32 %v8746_v9, %v7780_v10  ;;  %4875 = vmatpush.bf16.msra.mxu0 %v7525_v6  ;;  %v7177_v10 = vor.u32 %v8590_v42, %v7174_v4  ;;  %v8454_v9 = vld [vmem:[#allocation9 + $0x55c] sm:$0xf] }
 0x39d   :  { %v8354_v39 = vld [vmem:[#allocation9 + $0x234] sm:$0xf0]  ;;  %v7142_v6 = vld [vmem:[#allocation9 + $0x978] sm:$0xf0] }
 0x39e   :  { %v7492_v59 = vld [vmem:[#allocation9 + $0xc18] sm:$0xf]  ;;  %v6213_v30 = vor.u32 %v8354_v39, %v6212_v48  ;;  %4888 = vmatpush.bf16.msrb.mxu1 %v7781_v17  ;;  %v6886_v48 = vld [vmem:[#allocation9 + $0x778] sm:$0xf0]  ;;  %v9589_v39 = vld [vmem:[#allocation10] ss:$2 sm:$0xff]  ;;  %v6633_v17 = vor.u32 %v8454_v9, %v6630_v1  ;;  %4948 = vmatpush.bf16.msra.mxu2 %v7177_v10  ;;  %v9598_v10 = vpop.f32.mrf.mxu2 }
 0x39f   :  { %v8674_v8 = vld [vmem:[#allocation9 + $0xc34] sm:$0xf0]  ;;  %v6790_v9 = vld [vmem:[#allocation9 + $0x6b8] sm:$0xf0] }
 0x3a0   :  { %v7748_v11 = vld [vmem:[#allocation9 + $0xe18] sm:$0xf]  ;;  %v7493_v32 = vor.u32 %v8674_v8, %v7492_v59  ;;  %4811 = vmatpush.bf16.msra.mxu3 %v6213_v30  ;;  %v1587_v59 = vperm.slane %v9589_v39, 4  ;;  %v8558_v1 = vld [vmem:[#allocation9 + $0x89c] sm:$0xf] }
 0x3a1   :  { %v8738_v18 = vld [vmem:[#allocation9 + $0xe34] sm:$0xf0] }
 0x3a2   :  { %v7460_v20 = vld [vmem:[#allocation9 + $0xbd8] sm:$0xf]  ;;  %v7749_v23 = vor.u32 %v8738_v18, %v7748_v11  ;;  %4876 = vmatpush.bf16.msra.mxu0 %v7493_v32  ;;  %v6889_v11 = vor.u32 %v8518_v2, %v6886_v48  ;;  %v7145_v18 = vor.u32 %v8582_v44, %v7142_v6  ;;  %v1603_v22 = vmul.f32 %v1587_v59, %v9457_v16  ;;  %v4672_v2 = vpop.f32.mrf.mxu0  ;;  %v4685_v44 = vpop.f32.mrf.mxu1 }
 0x3a3   :  { %v8666_v41 = vld [vmem:[#allocation9 + $0xbf4] sm:$0xf0]  ;;  %4812 = vmatmul.bf16.vlgmr.msra.gmra.mxu3 %v9417_v49  ;;  %v6601_v32 = vor.u32 %v8446_v55, %v6598_v54  ;;  %v8486_v55 = vld [vmem:[#allocation9 + $0x65c] sm:$0xf] }
 0x3a4   :  { %v7461_v37 = vor.u32 %v8666_v41, %v7460_v20  ;;  %v7428_v58 = vld [vmem:[#allocation9 + $0xb98] sm:$0xf]  ;;  %4889 = vmatpush.bf16.msrb.mxu1 %v7749_v23  ;;  %v6854_v20 = vld [vmem:[#allocation9 + $0x738] sm:$0xf0]  ;;  %4949 = vmatpush.bf16.msra.mxu2 %v7145_v18  ;;  %v4593_v25 = vadd.f32 %v9563_v29, %v1603_v22 }
 0x3a5   :  { %v8658_v45 = vld [vmem:[#allocation9 + $0xbb4] sm:$0xf0]  ;;  %4877 = vmatmul.bf16.vlgmr.msra.gmra.mxu0 %v9419_v51  ;;  %v8574_v41 = vld [vmem:[#allocation9 + $0x91c] sm:$0xf]  ;;  %v6857_v35 = vor.u32 %v8510_v19, %v6854_v20 }
 0x3a6   :  { %4856 = vmatpush.bf16.msrb.mxu3 %v7461_v37  ;;  %4921 = vmatpush.bf16.msrb.mxu0 %v6697_v13  ;;  %v7429_v38 = vor.u32 %v8658_v45, %v7428_v58  ;;  %v7396_v3 = vld [vmem:[#allocation9 + $0xb58] sm:$0xf]  ;;  %v7113_v23 = vor.u32 %v8574_v41, %v7110_v62  ;;  %v6566_v37 = vld [vmem:[#allocation9 + $0x4f8] sm:$0xf0] }
 0x3a7   :  { %v8650_v61 = vld [vmem:[#allocation9 + $0xb74] sm:$0xf0]  ;;  %4890 = vmatmul.bf16.vlgmr.msrb.gmra.mxu1 %v9421_v60  ;;  %v8502_v13 = vld [vmem:[#allocation9 + $0x6dc] sm:$0xf]  ;;  %v6569_v28 = vor.u32 %v8438_v21, %v6566_v37 }
 0x3a8   :  { %4934 = vmatpush.bf16.msra.mxu1 %v6953_v15  ;;  %v7397_v8 = vor.u32 %v8650_v61, %v7396_v3  ;;  %v7364_v46 = vld [vmem:[#allocation9 + $0xb18] sm:$0xf]  ;;  %v6822_v58 = vld [vmem:[#allocation9 + $0x6f8] sm:$0xf0]  ;;  %4950 = vmatpush.bf16.msra.mxu2 %v7113_v23 }
 0x3a9   :  { %v8642_v47 = vld [vmem:[#allocation9 + $0xb34] sm:$0xf0]  ;;  %v8566_v45 = vld [vmem:[#allocation9 + $0x8dc] sm:$0xf]  ;;  %v6825_v42 = vor.u32 %v8502_v13, %v6822_v58  ;;  %v4698_v58 = vpop.f32.mrf.mxu2 }
 0x3aa   :  { %4857 = vmatpush.bf16.msrb.mxu3 %v7429_v38  ;;  %4922 = vmatpush.bf16.msrb.mxu0 %v6665_v43  ;;  %v7365_v30 = vor.u32 %v8642_v47, %v7364_v46  ;;  %v7332_v52 = vld [vmem:[#allocation9 + $0xad8] sm:$0xf]  ;;  %v7078_v15 = vld [vmem:[#allocation9 + $0x8f8] sm:$0xf0]  ;;  %v4605_v38 = vpop.f32.mrf.mxu3 }
 0x3ab   :  { %v8634_v34 = vld [vmem:[#allocation9 + $0xaf4] sm:$0xf0]  ;;  %v7081_v4 = vor.u32 %v8566_v45, %v7078_v15  ;;  %v8430_v43 = vld [vmem:[#allocation9 + $0x49c] sm:$0xf] }
 0x3ac   :  { %4935 = vmatpush.bf16.msra.mxu1 %v6921_v57  ;;  %v7333_v40 = vor.u32 %v8634_v34, %v7332_v52  ;;  %v7300_v24 = vld [vmem:[#allocation9 + $0xa98] sm:$0xf]  ;;  %v6534_v3 = vld [vmem:[#allocation9 + $0x4b8] sm:$0xf0]  ;;  %v4606_v57 = vadd.f32 %v4605_v38, %v4593_v25 }
 0x3ad   :  { %v8626_v27 = vld [vmem:[#allocation9 + $0xab4] sm:$0xf0]  ;;  %v8494_v61 = vld [vmem:[#allocation9 + $0x69c] sm:$0xf]  ;;  %v6537_v59 = vor.u32 %v8430_v43, %v6534_v3  ;;  %4951 = vmatpush.bf16.msra.mxu2 %v7081_v4 }
 0x3ae   :  { %4858 = vmatpush.bf16.msrb.mxu3 %v7397_v8  ;;  %4923 = vmatpush.bf16.msrb.mxu0 %v6633_v17  ;;  %v7046_v29 = vld [vmem:[#allocation9 + $0x8b8] sm:$0xf0]  ;;  %v4619_v48 = vadd.f32 %v9574_v7, %v4606_v57  ;;  %v7301_v6 = vor.u32 %v8626_v27, %v7300_v24  ;;  %v7268_v8 = vld [vmem:[#allocation9 + $0xa58] sm:$0xf]  ;;  %v6793_v46 = vor.u32 %v8494_v61, %v6790_v9  ;;  %v8802_v61 = vld [vmem:[#allocation13 + $0x38] sm:$0xff] }
 0x3af   :  { %v8618_v17 = vld [vmem:[#allocation9 + $0xa74] sm:$0xf0]  ;;  %v7049_v47 = vor.u32 %v8558_v1, %v7046_v29  ;;  %v6502_v18 = vld [vmem:[#allocation9 + $0x478] sm:$0xf0] }
 0x3b0   :  { %4936 = vmatpush.bf16.msra.mxu1 %v6889_v11  ;;  %v8422_v11 = vld [vmem:[#allocation9 + $0x45c] sm:$0xf]  ;;  %v4632_v41 = vadd.f32 %v9576_v12, %v4619_v48  ;;  %v7269_v7 = vor.u32 %v8618_v17, %v7268_v8  ;;  %v7236_v22 = vld [vmem:[#allocation9 + $0xa18] sm:$0xf]  ;;  %v8801_v8 = vld [vmem:[#allocation13 + $0x30] sm:$0xff] }
 0x3b1   :  { %v6758_v54 = vld [vmem:[#allocation9 + $0x678] sm:$0xf0]  ;;  %v6505_v62 = vor.u32 %v8422_v11, %v6502_v18  ;;  %4952 = vmatpush.bf16.msra.mxu2 %v7049_v47 }
 0x3b2   :  { %4859 = vmatpush.bf16.msrb.mxu3 %v7365_v30  ;;  %4924 = vmatpush.bf16.msrb.mxu0 %v6601_v32  ;;  %v8550_v19 = vld [vmem:[#allocation9 + $0x85c] sm:$0xf]  ;;  %v8610_v30 = vld [vmem:[#allocation9 + $0xa34] sm:$0xf0]  ;;  %v9603_v52 = vadd.f32 %v9579_v50, %v4632_v41  ;;  %v6761_v34 = vor.u32 %v8486_v55, %v6758_v54  ;;  %v4607_v23 = vpop.f32.mrf.mxu3  ;;  %v8800_v41 = vld [vmem:[#allocation13 + $0x28] sm:$0xff] }
 0x3b3   :  { %v7014_v20 = vld [vmem:[#allocation9 + $0x878] sm:$0xf0]  ;;  %v7237_v24 = vor.u32 %v8610_v30, %v7236_v22  ;;  %v9611_v23 = vld [vmem:[#allocation10 + $0x1] ss:$2 sm:$0xff] }
 0x3b4   :  { %4937 = vmatpush.bf16.msra.mxu1 %v6857_v35  ;;  %v8414_v32 = vld [vmem:[#allocation9 + $0x41c] sm:$0xf]  ;;  %v7017_v35 = vor.u32 %v8550_v19, %v7014_v20 }
 0x3b5   :  { %v6470_v21 = vld [vmem:[#allocation9 + $0x438] sm:$0xf0] }
 0x3b6   :  { %4860 = vmatpush.bf16.msrb.mxu3 %v7333_v40  ;;  %4925 = vmatpush.bf16.msrb.mxu0 %v6569_v28  ;;  %v8478_v37 = vld [vmem:[#allocation9 + $0x61c] sm:$0xf]  ;;  %v6473_v50 = vor.u32 %v8414_v32, %v6470_v21 }
 0x3b7   :  { %v6726_v13 = vld [vmem:[#allocation9 + $0x638] sm:$0xf0]  ;;  %4953 = vmatpush.bf16.msra.mxu2 %v7017_v35  ;;  %v9609_v35 = vpop.f32.mrf.mxu0 }
 0x3b8   :  { %4938 = vmatpush.bf16.msra.mxu1 %v6825_v42  ;;  %v8542_v12 = vld [vmem:[#allocation9 + $0x81c] sm:$0xf]  ;;  %v6729_v4 = vor.u32 %v8478_v37, %v6726_v13 }
 0x3b9   :  { %v6982_v45 = vld [vmem:[#allocation9 + $0x838] sm:$0xf0] }
 0x3ba   :  { %4861 = vmatpush.bf16.msrb.mxu3 %v7301_v6  ;;  %4926 = vmatpush.bf16.msrb.mxu0 %v6537_v59  ;;  %v8406_v15 = vld [vmem:[#allocation9 + $0x3dc] sm:$0xf]  ;;  %v6985_v38 = vor.u32 %v8542_v12, %v6982_v45 }
 0x3bb   :  { %v6438_v25 = vld [vmem:[#allocation9 + $0x3f8] sm:$0xf0] }
 0x3bc   :  { %4939 = vmatpush.bf16.msra.mxu1 %v6793_v46  ;;  %v8726_v40 = vld [vmem:[#allocation9 + $0xddc] sm:$0xf]  ;;  %v6441_v43 = vor.u32 %v8406_v15, %v6438_v25  ;;  %4954 = vmatpush.bf16.msra.mxu2 %v6985_v38 }
 0x3bd   :  { %v7718_v28 = vld [vmem:[#allocation9 + $0xdf8] sm:$0xf0] }
 0x3be   :  { %4862 = vmatpush.bf16.msrb.mxu3 %v7269_v7  ;;  %4927 = vmatpush.bf16.msrb.mxu0 %v6505_v62  ;;  %v8790_v27 = vld [vmem:[#allocation9 + $0xfdc] sm:$0xf]  ;;  %v7721_v3 = vor.u32 %v8726_v40, %v7718_v28  ;;  %v5006_v28 = vperm.slane %v9611_v23, 0 }
 0x3bf   :  { %v7974_v42 = vld [vmem:[#allocation9 + $0xff8] sm:$0xf0]  ;;  %4955 = vmatmul.bf16.vlgmr.msra.gmra.mxu2 %v9411_v5 }
 0x3c0   :  { %4940 = vmatpush.bf16.msra.mxu1 %v6761_v34  ;;  %v8398_v57 = vld [vmem:[#allocation9 + $0x39c] sm:$0xf]  ;;  %v7977_v9 = vor.u32 %v8790_v27, %v7974_v42  ;;  %5596 = vmatpush.bf16.msrb.mxu2 %v8802_v61  ;;  %v8798_v42 = vld [vmem:[#allocation13 + $0x18] sm:$0xff] }
 0x3c1   :  { %v6406_v1 = vld [vmem:[#allocation9 + $0x3b8] sm:$0xf0] }
 0x3c2   :  { %v8718_v29 = vld [vmem:[#allocation9 + $0xd9c] sm:$0xf]  ;;  %4863 = vmatpush.bf16.msrb.mxu3 %v7237_v24  ;;  %4928 = vmatpush.bf16.msrb.mxu0 %v6473_v50  ;;  %v6409_v6 = vor.u32 %v8398_v57, %v6406_v1  ;;  %v9616_v24 = vpop.permute.xlu0 %5002  ;;  %v9619_v1 = vpop.f32.mrf.mxu2 }
 0x3c3   :  { %v7686_v2 = vld [vmem:[#allocation9 + $0xdb8] sm:$0xf0] }
 0x3c4   :  { %v8782_v48 = vld [vmem:[#allocation9 + $0xf9c] sm:$0xf]  ;;  %4941 = vmatpush.bf16.msra.mxu1 %v6729_v4  ;;  %v7689_v59 = vor.u32 %v8718_v29, %v7686_v2  ;;  %5597 = vmatpush.bf16.msrb.mxu2 %v8801_v8 }
 0x3c5   :  { %v7942_v44 = vld [vmem:[#allocation9 + $0xfb8] sm:$0xf0]  ;;  %4864 = vmatmul.bf16.vlgmr.msrb.gmra.mxu3 %v9428_v14  ;;  %4929 = vmatmul.bf16.vlgmr.msrb.gmra.mxu0 %v9407_v63 }
 0x3c6   :  { %4908 = vmatpush.bf16.msra.mxu3 %v6441_v43  ;;  %4973 = vmatpush.bf16.msra.mxu0 %v7721_v3  ;;  %v8390_v17 = vld [vmem:[#allocation9 + $0x35c] sm:$0xf]  ;;  %v7945_v46 = vor.u32 %v8782_v48, %v7942_v44  ;;  %v4657_v43 = vpop.f32.mrf.mxu3  ;;  %v5022_v48 = vmul.f32 %v5006_v28, %v9616_v24  ;;  %v4724_v44 = vpop.f32.mrf.mxu0 }
 0x3c7   :  { %v6374_v47 = vld [vmem:[#allocation9 + $0x378] sm:$0xf0]  ;;  %4942 = vmatmul.bf16.vlgmr.msra.gmra.mxu1 %v9409_v0  ;;  %v9613_v0 = vpop.f32.mrf.mxu1 }
 0x3c8   :  { %4986 = vmatpush.bf16.msrb.mxu1 %v7977_v9  ;;  %v8710_v11 = vld [vmem:[#allocation9 + $0xd5c] sm:$0xf]  ;;  %v6377_v19 = vor.u32 %v8390_v17, %v6374_v47  ;;  %5598 = vmatpush.bf16.msrb.mxu2 %v8800_v41  ;;  %v4658_v9 = vadd.f32 %v4657_v43, %v9603_v52  ;;  %v8797_v47 = vld [vmem:[#allocation13 + $0x10] sm:$0xff] }
 0x3c9   :  { %v7654_v18 = vld [vmem:[#allocation9 + $0xd78] sm:$0xf0] }
 0x3ca   :  { %v8774_v55 = vld [vmem:[#allocation9 + $0xf5c] sm:$0xf]  ;;  %4909 = vmatpush.bf16.msra.mxu3 %v6409_v6  ;;  %4974 = vmatpush.bf16.msra.mxu0 %v7689_v59  ;;  %v7657_v20 = vor.u32 %v8710_v11, %v7654_v18  ;;  %v9622_v6 = vld [vmem:[#allocation12] sm:$0xff]  ;;  %v4671_v59 = vadd.f32 %v9592_v53, %v4658_v9  ;;  %v8825_v9 = vld [vmem:[#allocation13 + $0xf0] sm:$0xff] }
 0x3cb   :  { %v7910_v54 = vld [vmem:[#allocation9 + $0xf78] sm:$0xf0]  ;;  %v5040_v53 = vperm.slane %v9622_v6, 0 }
 0x3cc   :  { %v8382_v7 = vld [vmem:[#allocation9 + $0x31c] sm:$0xf]  ;;  %4987 = vmatpush.bf16.msrb.mxu1 %v7945_v46  ;;  %v7913_v62 = vor.u32 %v8774_v55, %v7910_v54 }
 0x3cd   :  { %v6342_v22 = vld [vmem:[#allocation9 + $0x338] sm:$0xf0] }
 0x3ce   :  { %v8702_v30 = vld [vmem:[#allocation9 + $0xd1c] sm:$0xf]  ;;  %4910 = vmatpush.bf16.msra.mxu3 %v6377_v19  ;;  %4975 = vmatpush.bf16.msra.mxu0 %v7657_v20  ;;  %v6345_v5 = vor.u32 %v8382_v7, %v6342_v22  ;;  %v9626_v19 = vadd.f32 %v9595_v31, %v4671_v59  ;;  %v5030_v7 = vadd.f32 %v5022_v48, %v9482_v56  ;;  %v1588_v59 = vperm.slane %v9589_v39, 5 }
 0x3cf   :  { %v7622_v32 = vld [vmem:[#allocation9 + $0xd38] sm:$0xf0]  ;;  %v4737_v8 = vpop.f32.mrf.mxu1 }
 0x3d0   :  { %v8766_v34 = vld [vmem:[#allocation9 + $0xf1c] sm:$0xf]  ;;  %v7625_v21 = vor.u32 %v8702_v30, %v7622_v32  ;;  %4988 = vmatpush.bf16.msrb.mxu1 %v7913_v62  ;;  %v8796_v30 = vld [vmem:[#allocation13 + $0x8] sm:$0xff] }
 0x3d1   :  { %v7878_v63 = vld [vmem:[#allocation9 + $0xf38] sm:$0xf0] }
 0x3d2   :  { %v8799_v37 = vld [vmem:[#allocation13 + $0x20] sm:$0xff]  ;;  %v7881_v58 = vor.u32 %v8766_v34, %v7878_v63  ;;  %4911 = vmatpush.bf16.msra.mxu3 %v6345_v5  ;;  %4976 = vmatpush.bf16.msra.mxu0 %v7625_v21  ;;  %v4659_v63 = vpop.f32.mrf.mxu3 }
 0x3d3   :  { %v8374_v13 = vld [vmem:[#allocation9 + $0x2dc] sm:$0xf]  ;;  %5599 = vmatpush.bf16.msrb.mxu2 %v8799_v37  ;;  %v4750_v37 = vpop.f32.mrf.mxu2  ;;  %v8822_v63 = vld [vmem:[#allocation13 + $0xd8] sm:$0xff] }
 0x3d4   :  { %v6310_v12 = vld [vmem:[#allocation9 + $0x2f8] sm:$0xf0]  ;;  %4989 = vmatpush.bf16.msrb.mxu1 %v7881_v58 }
 0x3d5   :  { %v8694_v45 = vld [vmem:[#allocation9 + $0xcdc] sm:$0xf]  ;;  %v6313_v50 = vor.u32 %v8374_v13, %v6310_v12 }
 0x3d6   :  { %v7590_v15 = vld [vmem:[#allocation9 + $0xcf8] sm:$0xf0] }
 0x3d7   :  { %v8758_v25 = vld [vmem:[#allocation9 + $0xedc] sm:$0xf]  ;;  %v7593_v27 = vor.u32 %v8694_v45, %v7590_v15  ;;  %4912 = vmatpush.bf16.msra.mxu3 %v6313_v50  ;;  %5600 = vmatpush.bf16.msrb.mxu2 %v8798_v42  ;;  %v5056_v45 = vadd.f32 %v5040_v53, %v5030_v7  ;;  %v8826_v42 = vld [vmem:[#allocation13 + $0xf8] sm:$0xff] }
 0x3d8   :  { %v7846_v40 = vld [vmem:[#allocation9 + $0xef8] sm:$0xf0] }
 0x3d9   :  { %v8366_v4 = vld [vmem:[#allocation9 + $0x29c] sm:$0xf]  ;;  %v7849_v38 = vor.u32 %v8758_v25, %v7846_v40  ;;  %4977 = vmatpush.bf16.msra.mxu0 %v7593_v27  ;;  %v8818_v27 = vld [vmem:[#allocation13 + $0xb8] sm:$0xff] }
 0x3da   :  { %v6278_v3 = vld [vmem:[#allocation9 + $0x2b8] sm:$0xf0] }
 0x3db   :  { %v8686_v61 = vld [vmem:[#allocation9 + $0xc9c] sm:$0xf]  ;;  %v6281_v17 = vor.u32 %v8366_v4, %v6278_v3  ;;  %4990 = vmatpush.bf16.msrb.mxu1 %v7849_v38  ;;  %5601 = vmatpush.bf16.msrb.mxu2 %v8797_v47  ;;  %v8834_v4 = vld [vmem:[#allocation13 + $0x138] sm:$0xff]  ;;  %v5064_v38 = vmax.f32 %v5056_v45, 0.0  ;;  %v8832_v47 = vld [vmem:[#allocation13 + $0x128] sm:$0xff]  ;;  %v9646_v45 = vpop.f32.mrf.mxu2 }
 0x3dc   :  { %v7558_v57 = vld [vmem:[#allocation9 + $0xcb8] sm:$0xf0] }
 0x3dd   :  { %v8750_v29 = vld [vmem:[#allocation9 + $0xe9c] sm:$0xf]  ;;  %v7561_v46 = vor.u32 %v8686_v61, %v7558_v57  ;;  %4913 = vmatpush.bf16.msra.mxu3 %v6281_v17  ;;  %v8817_v57 = vld [vmem:[#allocation13 + $0xb0] sm:$0xff]  ;;  %v8816_v17 = vld [vmem:[#allocation13 + $0xa8] sm:$0xff] }
 0x3de   :  { %v7814_v2 = vld [vmem:[#allocation9 + $0xeb8] sm:$0xf0] }
 0x3df   :  { %v8358_v11 = vld [vmem:[#allocation9 + $0x25c] sm:$0xf]  ;;  %v7817_v52 = vor.u32 %v8750_v29, %v7814_v2  ;;  %4978 = vmatpush.bf16.msra.mxu0 %v7561_v46  ;;  %5602 = vmatpush.bf16.msrb.mxu2 %v8796_v30  ;;  %v5072_v29 = vpack.c.bf16 %v5064_v38, %v5064_v38  ;;  %v8833_v2 = vld [vmem:[#allocation13 + $0x130] sm:$0xff]  ;;  %v8824_v46 = vld [vmem:[#allocation13 + $0xe8] sm:$0xff] }
 0x3e0   :  { %v6246_v18 = vld [vmem:[#allocation9 + $0x278] sm:$0xf0]  ;;  %v8829_v38 = vld [vmem:[#allocation13 + $0x110] sm:$0xff] }
 0x3e1   :  { %v8678_v55 = vld [vmem:[#allocation9 + $0xc5c] sm:$0xf]  ;;  %v6249_v62 = vor.u32 %v8358_v11, %v6246_v18  ;;  %4991 = vmatpush.bf16.msrb.mxu1 %v7817_v52  ;;  %v9634_v18 = vpop.f32.mrf.mxu0 }
 0x3e2   :  { %v7526_v54 = vld [vmem:[#allocation9 + $0xc78] sm:$0xf0] }
 0x3e3   :  { %v8742_v20 = vld [vmem:[#allocation9 + $0xe5c] sm:$0xf]  ;;  %v7529_v22 = vor.u32 %v8678_v55, %v7526_v54  ;;  %4914 = vmatpush.bf16.msra.mxu3 %v6249_v62  ;;  %v5009_v62 = vperm.slane %v9611_v23, 3 }
 0x3e4   :  { %v7782_v41 = vld [vmem:[#allocation9 + $0xe78] sm:$0xf0] }
 0x3e5   :  { %v8350_v32 = vld [vmem:[#allocation9 + $0x21c] sm:$0xf]  ;;  %v7785_v34 = vor.u32 %v8742_v20, %v7782_v41  ;;  %4979 = vmatpush.bf16.msra.mxu0 %v7529_v22  ;;  %v5008_v20 = vperm.slane %v9611_v23, 2  ;;  %v5010_v22 = vperm.slane %v9611_v23, 4 }
 0x3e6   :  { %v6214_v5 = vld [vmem:[#allocation9 + $0x238] sm:$0xf0] }
 0x3e7   :  { %v8670_v21 = vld [vmem:[#allocation9 + $0xc1c] sm:$0xf]  ;;  %v6217_v15 = vor.u32 %v8350_v32, %v6214_v5  ;;  %4992 = vmatpush.bf16.msrb.mxu1 %v7785_v34  ;;  %v8814_v34 = vld [vmem:[#allocation13 + $0x98] sm:$0xff]  ;;  %v5024_v5 = vmul.f32 %v5008_v20, %v9616_v24 }
 0x3e8   :  { %v7494_v31 = vld [vmem:[#allocation9 + $0xc38] sm:$0xf0] }
 0x3e9   :  { %v8734_v13 = vld [vmem:[#allocation9 + $0xe1c] sm:$0xf]  ;;  %v7497_v25 = vor.u32 %v8670_v21, %v7494_v31  ;;  %4915 = vmatpush.bf16.msra.mxu3 %v6217_v15  ;;  %v8830_v21 = vld [vmem:[#allocation13 + $0x118] sm:$0xff]  ;;  %v4709_v31 = vpop.f32.mrf.mxu3  ;;  %v5042_v15 = vperm.slane %v9622_v6, 2 }
 0x3ea   :  { %v7750_v58 = vld [vmem:[#allocation9 + $0xe38] sm:$0xf0] }
 0x3eb   :  { %v8662_v12 = vld [vmem:[#allocation9 + $0xbdc] sm:$0xf]  ;;  %v7753_v40 = vor.u32 %v8734_v13, %v7750_v58  ;;  %4980 = vmatpush.bf16.msra.mxu0 %v7497_v25  ;;  %v5025_v58 = vmul.f32 %v5009_v62, %v9616_v24  ;;  %v8808_v62 = vld [vmem:[#allocation13 + $0x68] sm:$0xff] }
 0x3ec   :  { %v7462_v56 = vld [vmem:[#allocation9 + $0xbf8] sm:$0xf0]  ;;  %4916 = vmatmul.bf16.vlgmr.msra.gmra.mxu3 %v9417_v49  ;;  %v1604_v49 = vmul.f32 %v1588_v59, %v9457_v16  ;;  %v8828_v59 = vld [vmem:[#allocation13 + $0x108] sm:$0xff] }
 0x3ed   :  { %v8795_v28 = vld [vmem:[#allocation13] sm:$0xff]  ;;  %v7465_v50 = vor.u32 %v8662_v12, %v7462_v56  ;;  %4993 = vmatpush.bf16.msrb.mxu1 %v7753_v40  ;;  %v5026_v12 = vmul.f32 %v5010_v22, %v9616_v24 }
 0x3ee   :  { %v8654_v43 = vld [vmem:[#allocation9 + $0xb9c] sm:$0xf]  ;;  %5603 = vmatpush.bf16.msrb.mxu2 %v8795_v28  ;;  %4981 = vmatmul.bf16.vlgmr.msra.gmra.mxu0 %v9419_v51  ;;  %v9637_v51 = vpop.f32.mrf.mxu1  ;;  %v4697_v30 = vadd.f32 %v9598_v10, %v1604_v49  ;;  %v4776_v10 = vpop.f32.mrf.mxu0 }
 0x3ef   :  { %v7430_v3 = vld [vmem:[#allocation9 + $0xbb8] sm:$0xf0]  ;;  %4960 = vmatpush.bf16.msrb.mxu3 %v7465_v50  ;;  %5622 = vmatpush.bf16.msrb.mxu0 %v8818_v27  ;;  %v8813_v50 = vld [vmem:[#allocation13 + $0x90] sm:$0xff]  ;;  %v5041_v10 = vperm.slane %v9622_v6, 1 }
 0x3f0   :  { %v7433_v61 = vor.u32 %v8654_v43, %v7430_v3  ;;  %v8646_v48 = vld [vmem:[#allocation9 + $0xb5c] sm:$0xf]  ;;  %4994 = vmatmul.bf16.vlgmr.msrb.gmra.mxu1 %v9421_v60  ;;  %v4710_v56 = vadd.f32 %v4709_v31, %v4697_v30  ;;  %v8821_v27 = vld [vmem:[#allocation13 + $0xd0] sm:$0xff] }
 0x3f1   :  { %5635 = vmatpush.bf16.msra.mxu1 %v8826_v42  ;;  %v7398_v44 = vld [vmem:[#allocation9 + $0xb78] sm:$0xf0]  ;;  %5604 = vmatmul.bf16.vlgmr.msrb.gmra.mxu2 %v5072_v29  ;;  %v5032_v42 = vadd.f32 %v5024_v5, %v9550_v26  ;;  %v8820_v26 = vld [vmem:[#allocation13 + $0xc8] sm:$0xff] }
 0x3f2   :  { %5648 = vmatpush.bf16.msra.mxu2 %v8834_v4  ;;  %v7401_v8 = vor.u32 %v8646_v48, %v7398_v44  ;;  %v8638_v11 = vld [vmem:[#allocation9 + $0xb1c] sm:$0xf]  ;;  %v4723_v25 = vadd.f32 %v9609_v35, %v4710_v56  ;;  %v5043_v4 = vperm.slane %v9622_v6, 3 }
 0x3f3   :  { %4961 = vmatpush.bf16.msrb.mxu3 %v7433_v61  ;;  %5623 = vmatpush.bf16.msrb.mxu0 %v8817_v57  ;;  %v7366_v52 = vld [vmem:[#allocation9 + $0xb38] sm:$0xf0]  ;;  %v5033_v61 = vadd.f32 %v5025_v58, %v9583_v36  ;;  %v5034_v57 = vadd.f32 %v5026_v12, %v9626_v19  ;;  %v5058_v44 = vadd.f32 %v5042_v15, %v5032_v42  ;;  %v8805_v12 = vld [vmem:[#allocation13 + $0x50] sm:$0xff] }
 0x3f4   :  { %v7369_v60 = vor.u32 %v8638_v11, %v7366_v52  ;;  %v8815_v55 = vld [vmem:[#allocation13 + $0xa0] sm:$0xff]  ;;  %v4736_v35 = vadd.f32 %v9613_v0, %v4723_v25  ;;  %v8804_v25 = vld [vmem:[#allocation13 + $0x48] sm:$0xff] }
 0x3f5   :  { %5636 = vmatpush.bf16.msra.mxu1 %v8825_v9  ;;  %v8823_v54 = vld [vmem:[#allocation13 + $0xe0] sm:$0xff]  ;;  %v5044_v9 = vperm.slane %v9622_v6, 4  ;;  %v5066_v52 = vmax.f32 %v5058_v44, 0.0 }
 0x3f6   :  { %5649 = vmatpush.bf16.msra.mxu2 %v8833_v2  ;;  %v8831_v41 = vld [vmem:[#allocation13 + $0x120] sm:$0xff]  ;;  %v4789_v40 = vpop.f32.mrf.mxu1  ;;  %v8812_v2 = vld [vmem:[#allocation13 + $0x88] sm:$0xff]  ;;  %v4749_v48 = vadd.f32 %v9619_v1, %v4736_v35  ;;  %v5011_v35 = vperm.slane %v9611_v23, 5 }
 0x3f7   :  { %4962 = vmatpush.bf16.msrb.mxu3 %v7401_v8  ;;  %5624 = vmatpush.bf16.msrb.mxu0 %v8816_v17  ;;  %v8630_v7 = vld [vmem:[#allocation9 + $0xadc] sm:$0xf]  ;;  %v4711_v8 = vpop.f32.mrf.mxu3  ;;  %v5060_v19 = vadd.f32 %v5044_v9, %v5034_v57  ;;  %v5074_v20 = vpack.c.bf16 %v5066_v52, %v5066_v52  ;;  %v1589_v52 = vperm.slane %v9589_v39, 6 }
 0x3f8   :  { %v7334_v53 = vld [vmem:[#allocation9 + $0xaf8] sm:$0xf0] }
 0x3f9   :  { %5637 = vmatpush.bf16.msra.mxu1 %v8824_v46  ;;  %v7337_v32 = vor.u32 %v8630_v7, %v7334_v53  ;;  %v8622_v37 = vld [vmem:[#allocation9 + $0xa9c] sm:$0xf]  ;;  %v5059_v46 = vadd.f32 %v5043_v4, %v5033_v61  ;;  %v8809_v53 = vld [vmem:[#allocation13 + $0x70] sm:$0xff]  ;;  %v8842_v4 = vld [vmem:[#allocation13 + $0x178] sm:$0xff] }
 0x3fa   :  { %5650 = vmatpush.bf16.msra.mxu2 %v8832_v47  ;;  %v7302_v13 = vld [vmem:[#allocation9 + $0xab8] sm:$0xf0]  ;;  %v4802_v47 = vpop.f32.mrf.mxu2 }
 0x3fb   :  { %4963 = vmatpush.bf16.msrb.mxu3 %v7369_v60  ;;  %5625 = vmatpush.bf16.msrb.mxu0 %v8815_v55  ;;  %v7305_v28 = vor.u32 %v8622_v37, %v7302_v13  ;;  %v8614_v43 = vld [vmem:[#allocation9 + $0xa5c] sm:$0xf]  ;;  %v5067_v1 = vmax.f32 %v5059_v46, 0.0  ;;  %v5068_v55 = vmax.f32 %v5060_v19, 0.0  ;;  %v5045_v19 = vperm.slane %v9622_v6, 5 }
 0x3fc   :  { %v7270_v3 = vld [vmem:[#allocation9 + $0xa78] sm:$0xf0]  ;;  %v9658_v22 = vpop.f32.mrf.mxu0 }
 0x3fd   :  { %5638 = vmatpush.bf16.msra.mxu1 %v8823_v54  ;;  %v7273_v29 = vor.u32 %v8614_v43, %v7270_v3  ;;  %v8606_v17 = vld [vmem:[#allocation9 + $0xa1c] sm:$0xf]  ;;  %v8810_v54 = vld [vmem:[#allocation13 + $0x78] sm:$0xff]  ;;  %v5076_v7 = vpack.c.bf16 %v5068_v55, %v5068_v55  ;;  %v8848_v3 = vld [vmem:[#allocation13 + $0x1a8] sm:$0xff] }
 0x3fe   :  { %5651 = vmatpush.bf16.msra.mxu2 %v8831_v41  ;;  %v7238_v36 = vld [vmem:[#allocation9 + $0xa38] sm:$0xf0]  ;;  %v5075_v41 = vpack.c.bf16 %v5067_v1, %v5067_v1  ;;  %v9660_v30 = vpop.f32.mrf.mxu1 }
 0x3ff   :  { %4964 = vmatpush.bf16.msrb.mxu3 %v7337_v32  ;;  %5626 = vmatpush.bf16.msrb.mxu0 %v8814_v34  ;;  %v7241_v0 = vor.u32 %v8606_v17, %v7238_v36  ;;  %v8811_v11 = vld [vmem:[#allocation13 + $0x80] sm:$0xff]  ;;  %v5007_v34 = vperm.slane %v9611_v23, 1  ;;  %v8837_v17 = vld [vmem:[#allocation13 + $0x150] sm:$0xff] }
 0x400   :  { %v8819_v49 = vld [vmem:[#allocation13 + $0xc0] sm:$0xff]  ;;  %v8845_v36 = vld [vmem:[#allocation13 + $0x190] sm:$0xff] }
 0x401   :  { %5639 = vmatpush.bf16.msra.mxu1 %v8822_v63  ;;  %v8827_v60 = vld [vmem:[#allocation13 + $0x100] sm:$0xff]  ;;  %v8806_v63 = vld [vmem:[#allocation13 + $0x58] sm:$0xff]  ;;  %v5023_v5 = vmul.f32 %v5007_v34, %v9616_v24 }
 0x402   :  { %5652 = vmatpush.bf16.msra.mxu2 %v8830_v21  ;;  %v8807_v32 = vld [vmem:[#allocation13 + $0x60] sm:$0xff]  ;;  %v4761_v21 = vpop.f32.mrf.mxu3 }
 0x403   :  { %4965 = vmatpush.bf16.msrb.mxu3 %v7305_v28  ;;  %5627 = vmatpush.bf16.msrb.mxu0 %v8813_v50  ;;  %v4762_v31 = vadd.f32 %v4761_v21, %v4749_v48  ;;  %v5031_v56 = vadd.f32 %v5023_v5, %v9515_v33  ;;  %v8841_v33 = vld [vmem:[#allocation13 + $0x170] sm:$0xff]  ;;  %v8847_v61 = vld [vmem:[#allocation13 + $0x1a0] sm:$0xff]  ;;  %v5027_v48 = vmul.f32 %v5011_v35, %v9616_v24  ;;  %v8852_v35 = vld [vmem:[#allocation13 + $0x1c8] sm:$0xff] }
 0x404   :  { %v4828_v37 = vpop.f32.mrf.mxu0  ;;  %v8839_v9 = vld [vmem:[#allocation13 + $0x160] sm:$0xff] }
 0x405   :  { %5640 = vmatpush.bf16.msra.mxu1 %v8821_v27  ;;  %v4775_v13 = vadd.f32 %v9634_v18, %v4762_v31  ;;  %v5057_v40 = vadd.f32 %v5041_v10, %v5031_v56  ;;  %v8803_v27 = vld [vmem:[#allocation13 + $0x40] sm:$0xff]  ;;  %v8849_v18 = vld [vmem:[#allocation13 + $0x1b0] sm:$0xff]  ;;  %v5012_v31 = vperm.slane %v9611_v23, 6 }
 0x406   :  { %5653 = vmatpush.bf16.msra.mxu2 %v8829_v38  ;;  %v4841_v58 = vpop.f32.mrf.mxu1  ;;  %v8850_v38 = vld [vmem:[#allocation13 + $0x1b8] sm:$0xff]  ;;  %v8835_v55 = vld [vmem:[#allocation13 + $0x140] sm:$0xff] }
 0x407   :  { %4966 = vmatpush.bf16.msrb.mxu3 %v7273_v29  ;;  %5628 = vmatpush.bf16.msrb.mxu0 %v8812_v2  ;;  %v4788_v15 = vadd.f32 %v9637_v51, %v4775_v13  ;;  %v5065_v42 = vmax.f32 %v5057_v40, 0.0  ;;  %v8840_v51 = vld [vmem:[#allocation13 + $0x168] sm:$0xff]  ;;  %v8838_v2 = vld [vmem:[#allocation13 + $0x158] sm:$0xff] }
 0x408   :  { %v8858_v40 = vld [vmem:[#allocation13 + $0x1f8] sm:$0xff] }
 0x409   :  { %5641 = vmatpush.bf16.msra.mxu1 %v8820_v26  ;;  %v5073_v43 = vpack.c.bf16 %v5065_v42, %v5065_v42  ;;  %v8846_v26 = vld [vmem:[#allocation13 + $0x198] sm:$0xff]  ;;  %v5035_v46 = vadd.f32 %v5027_v48, %v4788_v15 }
 0x40a   :  { %5654 = vmatpush.bf16.msra.mxu2 %v8828_v59  ;;  %v4763_v28 = vpop.f32.mrf.mxu3 }
 0x40b   :  { %4967 = vmatpush.bf16.msrb.mxu3 %v7241_v0  ;;  %5629 = vmatpush.bf16.msrb.mxu0 %v8811_v11  ;;  %v8836_v0 = vld [vmem:[#allocation13 + $0x148] sm:$0xff] }
 0x40c   :  { %v8844_v11 = vld [vmem:[#allocation13 + $0x188] sm:$0xff] }
 0x40d   :  { %5642 = vmatpush.bf16.msra.mxu1 %v8819_v49  ;;  %v5061_v49 = vadd.f32 %v5045_v19, %v5035_v46 }
 0x40e   :  { %5655 = vmatpush.bf16.msra.mxu2 %v8827_v60  ;;  %4968 = vmatmul.bf16.vlgmr.msrb.gmra.mxu3 %v9428_v14  ;;  %v9664_v14 = vpop.f32.mrf.mxu2 }
 0x40f   :  { %5609 = vmatpush.bf16.msra.mxu3 %v8810_v54  ;;  %5630 = vmatmul.bf16.vlgmr.msrb.gmra.mxu0 %v5074_v20  ;;  %v8843_v54 = vld [vmem:[#allocation13 + $0x180] sm:$0xff]  ;;  %v1605_v20 = vmul.f32 %v1589_v52, %v9457_v16 }
 0x410   :  { %5643 = vmatmul.bf16.vlgmr.msra.gmra.mxu1 %v5075_v41  ;;  %5674 = vmatpush.bf16.msra.mxu0 %v8850_v38  ;;  %v5069_v41 = vmax.f32 %v5061_v49, 0.0  ;;  %v8855_v38 = vld [vmem:[#allocation13 + $0x1e0] sm:$0xff]  ;;  %v5013_v49 = vperm.slane %v9611_v23, 7 }
 0x411   :  { %5656 = vmatmul.bf16.vlgmr.msra.gmra.mxu2 %v5076_v7  ;;  %v4801_v7 = vadd.f32 %v9646_v45, %v1605_v20  ;;  %v5028_v45 = vmul.f32 %v5012_v31, %v9616_v24  ;;  %5687 = vmatpush.bf16.msrb.mxu1 %v8858_v40  ;;  %v5047_v20 = vperm.slane %v9622_v6, 7 }
 0x413   :  { %5610 = vmatpush.bf16.msra.mxu3 %v8809_v53  ;;  %v5077_v53 = vpack.c.bf16 %v5069_v41, %v5069_v41 }
 0x414   :  { %5675 = vmatpush.bf16.msra.mxu0 %v8849_v18 }
 0x416   :  { %v4854_v50 = vpop.f32.mrf.mxu2 }
 0x417   :  { %5611 = vmatpush.bf16.msra.mxu3 %v8808_v62 }
 0x418   :  { %5676 = vmatpush.bf16.msra.mxu0 %v8848_v3 }
 0x41b   :  { %5612 = vmatpush.bf16.msra.mxu3 %v8807_v32 }
 0x41c   :  { %5677 = vmatpush.bf16.msra.mxu0 %v8847_v61 }
 0x41e   :  { %v9672_v59 = vpop.f32.mrf.mxu2 }
 0x41f   :  { %5613 = vmatpush.bf16.msra.mxu3 %v8806_v63 }
 0x420   :  { %5678 = vmatpush.bf16.msra.mxu0 %v8846_v26  ;;  %v8851_v26 = vld [vmem:[#allocation13 + $0x1c0] sm:$0xff] }
 0x422   :  { %v4878_v57 = vpop.f32.mrf.mxu0 }
 0x423   :  { %5614 = vmatpush.bf16.msra.mxu3 %v8805_v12 }
 0x424   :  { %v4891_v29 = vpop.f32.mrf.mxu1  ;;  %5679 = vmatpush.bf16.msra.mxu0 %v8845_v36 }
 0x426   :  { %v4813_v44 = vpop.f32.mrf.mxu3  ;;  %v4906_v1 = vpop.f32.mrf.mxu2 }
 0x427   :  { %5615 = vmatpush.bf16.msra.mxu3 %v8804_v25  ;;  %v4814_v62 = vadd.f32 %v4813_v44, %v4801_v7  ;;  %v5046_v25 = vperm.slane %v9622_v6, 6 }
 0x428   :  { %5680 = vmatpush.bf16.msra.mxu0 %v8844_v11 }
 0x429   :  { %v4827_v32 = vadd.f32 %v9658_v22, %v4814_v62 }
 0x42a   :  { %v4880_v8 = vpop.f32.mrf.mxu0 }
 0x42b   :  { %5616 = vmatpush.bf16.msra.mxu3 %v8803_v27  ;;  %v4840_v5 = vadd.f32 %v9660_v30, %v4827_v32 }
 0x42c   :  { %v4893_v47 = vpop.f32.mrf.mxu1  ;;  %5681 = vmatpush.bf16.msra.mxu0 %v8843_v54 }
 0x42d   :  { %v4853_v21 = vadd.f32 %v9664_v14, %v4840_v5  ;;  %v8857_v14 = vld [vmem:[#allocation13 + $0x1f0] sm:$0xff] }
 0x42e   :  { %5617 = vmatmul.bf16.vlgmr.msra.gmra.mxu3 %v5073_v43  ;;  %v4815_v60 = vpop.f32.mrf.mxu3  ;;  %5688 = vmatpush.bf16.msrb.mxu1 %v8857_v14 }
 0x42f   :  { %5661 = vmatpush.bf16.msrb.mxu3 %v8842_v4  ;;  %v8856_v4 = vld [vmem:[#allocation13 + $0x1e8] sm:$0xff] }
 0x432   :  { %5689 = vmatpush.bf16.msrb.mxu1 %v8856_v4 }
 0x433   :  { %5662 = vmatpush.bf16.msrb.mxu3 %v8841_v33  ;;  %v8854_v33 = vld [vmem:[#allocation13 + $0x1d8] sm:$0xff] }
 0x436   :  { %5690 = vmatpush.bf16.msrb.mxu1 %v8855_v38 }
 0x437   :  { %5663 = vmatpush.bf16.msrb.mxu3 %v8840_v51  ;;  %v8853_v51 = vld [vmem:[#allocation13 + $0x1d0] sm:$0xff] }
 0x43a   :  { %5691 = vmatpush.bf16.msrb.mxu1 %v8854_v33 }
 0x43b   :  { %5664 = vmatpush.bf16.msrb.mxu3 %v8839_v9 }
 0x43e   :  { %5692 = vmatpush.bf16.msrb.mxu1 %v8853_v51 }
 0x43f   :  { %5665 = vmatpush.bf16.msrb.mxu3 %v8838_v2 }
 0x442   :  { %v4930_v34 = vpop.f32.mrf.mxu0  ;;  %v4956_v58 = vpop.f32.mrf.mxu2  ;;  %5693 = vmatpush.bf16.msrb.mxu1 %v8852_v35 }
 0x443   :  { %5666 = vmatpush.bf16.msrb.mxu3 %v8837_v17 }
 0x444   :  { %v4943_v63 = vpop.f32.mrf.mxu1 }
 0x446   :  { %5694 = vmatpush.bf16.msrb.mxu1 %v8851_v26 }
 0x447   :  { %5667 = vmatpush.bf16.msrb.mxu3 %v8836_v0 }
 0x448   :  { %v4865_v37 = vpop.f32.mrf.mxu3 }
 0x449   :  { %v4866_v13 = vadd.f32 %v4865_v37, %v4853_v21 }
 0x44a   :  { %v4932_v12 = vpop.f32.mrf.mxu0  ;;  %v4958_v30 = vpop.f32.mrf.mxu2 }
 0x44b   :  { %5668 = vmatpush.bf16.msrb.mxu3 %v8835_v55  ;;  %v4879_v56 = vadd.f32 %v4878_v57, %v4866_v13 }
 0x44c   :  { %v4945_v10 = vpop.f32.mrf.mxu1 }
 0x44d   :  { %v4892_v15 = vadd.f32 %v4891_v29, %v4879_v56  ;;  %v1590_v29 = vperm.slane %v9589_v39, 7 }
 0x44e   :  { %5669 = vmatmul.bf16.vlgmr.msrb.gmra.mxu3 %v5077_v53 }
 0x44f   :  { %v5036_v22 = vadd.f32 %v5028_v45, %v4892_v15  ;;  %v1606_v44 = vmul.f32 %v1590_v29, %v9457_v16  ;;  %v5029_v16 = vmul.f32 %v5013_v49, %v9616_v24  ;;  %v9126_v45 = vmov 3  }
 0x450   :  { %v4867_v28 = vpop.f32.mrf.mxu3  ;;  %8877 = vset.pattern.permute.xlu1 %v9126_v45  ;;  %8878 = vset.pattern.permute.xlu2 %v9126_v45 }
 0x451   :  { %v5062_v50 = vadd.f32 %v5046_v25, %v5036_v22  ;;  %v4905_v8 = vadd.f32 %v9672_v59, %v1606_v44  ;;  %8879 = vset.pattern.permute.xlu0 %v9126_v45 }
 0x453   :  { %v5070_v27 = vmax.f32 %v5062_v50, 0.0 }
 0x455   :  { %v5078_v42 = vpack.c.bf16 %v5070_v27, %v5070_v27 }
 0x457   :  { %5682 = vmatmul.bf16.vlgmr.msra.gmra.mxu0 %v5078_v42 }
 0x46b   :  { %v4982_v18 = vpop.f32.mrf.mxu0 }
 0x46d   :  { %v4995_v43 = vpop.f32.mrf.mxu1 }
 0x46f   :  { %v4917_v3 = vpop.f32.mrf.mxu3 }
 0x470   :  { %v4918_v17 = vadd.f32 %v4917_v3, %v4905_v8 }
 0x472   :  { %v4931_v36 = vadd.f32 %v4930_v34, %v4918_v17  ;;  %v8882_v34 = vld [vmem:[#allocation15] ss:$0 sm:$0xff] }
 0x473   :  { %v4984_v57 = vpop.f32.mrf.mxu0 }
 0x474   :  { %v5605_v61 = vpop.f32.mrf.mxu2  ;;  %v4944_v47 = vadd.f32 %v4943_v63, %v4931_v36 }
 0x475   :  { %v4997_v9 = vpop.f32.mrf.mxu1  ;;  %v5606_v63 = vadd.f32 %v8882_v34, %v5605_v61 }
 0x476   :  { %v4957_v0 = vadd.f32 %v4956_v58, %v4944_v47 }
 0x477   :  { %v4919_v2 = vpop.f32.mrf.mxu3 }
 0x47c   :  { %v5607_v48 = vpop.f32.mrf.mxu2 }
 0x48c   :  { %v5631_v46 = vpop.f32.mrf.mxu0 }
 0x48d   :  { %v5644_v19 = vpop.f32.mrf.mxu1 }
 0x491   :  { %v4969_v11 = vpop.f32.mrf.mxu3 }
 0x492   :  { %v4970_v52 = vadd.f32 %v4969_v11, %v4957_v0 }
 0x494   :  { %v5657_v39 = vpop.f32.mrf.mxu2  ;;  %v5633_v60 = vpop.f32.mrf.mxu0  ;;  %v4983_v1 = vadd.f32 %v4982_v18, %v4970_v52 }
 0x495   :  { %v5646_v55 = vpop.f32.mrf.mxu1 }
 0x496   :  { %v4996_v54 = vadd.f32 %v4995_v43, %v4983_v1 }
 0x498   :  { %v5037_v59 = vadd.f32 %v5029_v16, %v4996_v54 }
 0x499   :  { %v4971_v41 = vpop.f32.mrf.mxu3 }
 0x49a   :  { %v5063_v7 = vadd.f32 %v5047_v20, %v5037_v59 }
 0x49c   :  { %v5659_v53 = vpop.f32.mrf.mxu2  ;;  %v5071_v62 = vmax.f32 %v5063_v7, 0.0 }
 0x49e   :  { %v5079_v32 = vpack.c.bf16 %v5071_v62, %v5071_v62 }
 0x4a0   :  { %5695 = vmatmul.bf16.vlgmr.msrb.gmra.mxu1 %v5079_v32 }
 0x4b1   :  { %v5618_v5 = vpop.f32.mrf.mxu3 }
 0x4b2   :  { %v5619_v23 = vadd.f32 %v5618_v5, %v5606_v63 }
 0x4b4   :  { %v5632_v21 = vadd.f32 %v5631_v46, %v5619_v23 }
 0x4b6   :  { %v5645_v31 = vadd.f32 %v5644_v19, %v5632_v21 }
 0x4b8   :  { %v5658_v37 = vadd.f32 %v5657_v39, %v5645_v31 }
 0x4b9   :  { %v5620_v13 = vpop.f32.mrf.mxu3 }
 0x4d1   :  { %v5670_v58 = vpop.f32.mrf.mxu3 }
 0x4d2   :  { %v5671_v12 = vadd.f32 %v5670_v58, %v5658_v37 }
 0x4d4   :  { %v5683_v56 = vpop.f32.mrf.mxu0 }
 0x4d5   :  { %v5684_v10 = vadd.f32 %v5683_v56, %v5671_v12 }
 0x4d9   :  { %v5672_v24 = vpop.f32.mrf.mxu3 }
 0x4dc   :  { %v5685_v6 = vpop.f32.mrf.mxu0 }
 0x51d   :  { %v5696_v15 = vpop.f32.mrf.mxu1 }
 0x51e   :  { %v5697_v25 = vadd.f32 %v5696_v15, %v5684_v10 }
 0x520   :  { %5700 = vadd.xlane.f32.xlu1 %v5697_v25 }
 0x525   :  { %v5698_v22 = vpop.f32.mrf.mxu1 }
 0x539   :  { %5706 = vperm.xlu1 %8877, %v5697_v25  }
 0x593   :  { %v5701_v40 = vpop.xlane.xlu1 %5700 }
 0x594   :  { %v5702_v28 = vsub.f32 %v5701_v40, %v5697_v25 }
 0x596   :  { %v5703_v50 = vmul.f32 0.33333334, %v5702_v28 }
 0x598   :  { %5712 = vperm.xlu2 %8878, %v5703_v50  }
 0x5ab   :  { %v5707_v30 = vpop.permute.xlu1 %5706 }
 0x5ac   :  { %v5709_v14 = vadd.f32 %v5707_v30, %v5697_v25 }
 0x5f2   :  { %v5713_v27 = vpop.permute.xlu2 %5712 }
 0x5f3   :  { %v5715_v42 = vsub.f32 %v5709_v14, %v5713_v27 }
 0x5f5   :  { %5716 = vst [vmem:[%s9704_s11] sm:$0xff] %v5715_v42 }
 0x5f6   :  { %5721 = vsyncpa [#allocation3], 1 }
 0x5f7   :  { %5722 = vsyncpa [#allocation5], 1 }
 0x5f8   :  { %5723 = vsyncpa [#allocation8], 1 }
 0x5f9   :  { %5724 = vsyncpa [#allocation11], 1 }
 0x5fa   :  { %5725 = vsyncpa [#allocation14], 1 }

</bundles_post_ra>
